<compile_context>
chip_gen: v7x
topology: tpu7x:2x2x1
jax: 0.10.0
libtpu: 0.0.40
codegen_flags: <defaults>
</compile_context>

<pallas_src>
import functools
import math

import jax
import jax.numpy as jnp
import numpy as np
from jax.experimental import pallas as pl
from jax.experimental.pallas import tpu as pltpu


# ----------------------------- math helpers (used by kernel & reference) ----

def _ln(h, eps=1e-6):
    # nn.LayerNorm(elementwise_affine=False): biased variance, eps inside sqrt
    mu = jnp.mean(h, axis=-1, keepdims=True)
    var = jnp.mean(jnp.square(h - mu), axis=-1, keepdims=True)
    return (h - mu) * jax.lax.rsqrt(var + eps)


def _silu(h):
    return h * jax.nn.sigmoid(h)


def _gelu_tanh(h):
    # GELU(approximate="tanh"), identical formula to PyTorch
    return 0.5 * h * (1.0 + jnp.tanh(0.7978845608028654 * (h + 0.044715 * h * h * h)))


# ----------------------------- fused DiT trunk kernel -----------------------

def dit_trunk_kernel(
        # inputs --------------------------------------------------------------
        tfreq_ref, patches_ref, pos_ref,
        te_w1_ref, te_b1_ref, te_w2_ref, te_b2_ref,
        pe_w_ref, pe_b_ref,
        ada_w_ref, ada_b_ref, qkv_w_ref, qkv_b_ref, proj_w_ref, proj_b_ref,
        mlp1_w_ref, mlp1_b_ref, mlp2_w_ref, mlp2_b_ref,
        fada_w_ref, fada_b_ref, fin_w_ref, fin_b_ref,
        # output / scratch -----------------------------------------------------
        out_ref, x_sc, c_sc,
        *, hidden, num_heads, eps):
    """One grid step = (batch element b, transformer block d).

    x_sc (T, hidden) and c_sc (1, hidden) persist in VMEM across the depth
    axis; the output is written once per batch element on the last block.
    """
    H = hidden
    hd = H // num_heads
    d = pl.program_id(1)
    last = pl.num_programs(1) - 1

    def mm(a, w):  # bf16 MXU matmul with f32 accumulation
        return jnp.dot(a.astype(jnp.bfloat16), w, preferred_element_type=jnp.float32)

    # ---- d == 0: timestep-embedder MLP + patch embedding + pos embed --------
    @pl.when(d == 0)
    def _():
        tf = tfreq_ref[0]                                        # (1, FREQ) f32
        h = _silu(mm(tf, te_w1_ref[...]) + te_b1_ref[...])
        c_sc[...] = mm(h, te_w2_ref[...]) + te_b2_ref[...]       # c = t_emb
        pt = patches_ref[0]                                      # (T, p*p*C) f32
        x_sc[...] = mm(pt, pe_w_ref[...]) + pe_b_ref[...] + pos_ref[...]

    # ---- adaLN modulation parameters for block d -----------------------------
    c = c_sc[...]                                                # (1, H) f32
    ada = mm(_silu(c), ada_w_ref[0]) + ada_b_ref[0]              # (1, 6H)
    shift_msa = ada[:, 0 * H:1 * H]
    scale_msa = ada[:, 1 * H:2 * H]
    gate_msa = ada[:, 2 * H:3 * H]
    shift_mlp = ada[:, 3 * H:4 * H]
    scale_mlp = ada[:, 4 * H:5 * H]
    gate_mlp = ada[:, 5 * H:6 * H]

    x = x_sc[...]                                                # (T, H) f32

    # ---- multi-head self-attention branch ------------------------------------
    h1 = _ln(x, eps) * (1.0 + scale_msa) + shift_msa             # modulate(norm1(x))
    qkv = mm(h1, qkv_w_ref[0]) + qkv_b_ref[0]                    # (T, 3H) f32
    attn_scale = 1.0 / math.sqrt(hd)
    heads = []
    for i in range(num_heads):
        q = qkv[:, i * hd:(i + 1) * hd] * attn_scale
        k = qkv[:, H + i * hd:H + (i + 1) * hd]
        v = qkv[:, 2 * H + i * hd:2 * H + (i + 1) * hd]
        # q @ k^T without an explicit transpose (contract both last dims)
        s = jax.lax.dot_general(q, k, (((1,), (1,)), ((), ())),
                                preferred_element_type=jnp.float32)  # (T, T)
        s = s - jnp.max(s, axis=-1, keepdims=True)
        e = jnp.exp(s)
        p = e / jnp.sum(e, axis=-1, keepdims=True)
        heads.append(jnp.dot(p, v, preferred_element_type=jnp.float32))
    attn = jnp.concatenate(heads, axis=-1)                       # (T, H)
    attn = mm(attn, proj_w_ref[0]) + proj_b_ref[0]
    x = x + gate_msa * attn

    # ---- MLP branch -----------------------------------------------------------
    h2 = _ln(x, eps) * (1.0 + scale_mlp) + shift_mlp             # modulate(norm2(x))
    m = _gelu_tanh(mm(h2, mlp1_w_ref[0]) + mlp1_b_ref[0])
    m = mm(m, mlp2_w_ref[0]) + mlp2_b_ref[0]
    x = x + gate_mlp * m
    x_sc[...] = x

    # ---- d == last: FinalLayer (adaLN modulate + linear) ----------------------
    @pl.when(d == last)
    def _():
        fada = mm(_silu(c_sc[...]), fada_w_ref[...]) + fada_b_ref[...]  # (1, 2H)
        shift, scale = fada[:, :H], fada[:, H:]
        xf = _ln(x_sc[...], eps) * (1.0 + scale) + shift
        out_ref[0] = (mm(xf, fin_w_ref[...]) + fin_b_ref[...]).astype(out_ref.dtype)


def dit_trunk_pallas(patches, tfreq, pos, params, *, hidden, num_heads, eps=1e-6):
    """patches: (B, T, p*p*C) f32; tfreq: (B, 1, FREQ) f32; pos: (T, hidden) f32."""
    B, T, PPC = patches.shape
    depth = params["ada_w"].shape[0]
    mlp_hidden = params["mlp1_w"].shape[2]
    ppoc = params["fin_w"].shape[1]
    freq_dim = tfreq.shape[-1]
    hd = hidden // num_heads

    def full(a):                      # whole array resident, fetched once
        nd = a.ndim
        return pl.BlockSpec(a.shape, lambda b, d: (0,) * nd)

    def per_batch(a):                 # (B, ...) -> one batch element per step
        return pl.BlockSpec((1,) + a.shape[1:], lambda b, d: (b, 0, 0))

    def stacked(a):                   # (depth, ...) -> one block's weights per step
        return pl.BlockSpec((1,) + a.shape[1:], lambda b, d: (d, 0, 0))

    in_specs = [
        per_batch(tfreq), per_batch(patches), full(pos),
        full(params["te_w1"]), full(params["te_b1"]),
        full(params["te_w2"]), full(params["te_b2"]),
        full(params["pe_w"]), full(params["pe_b"]),
        stacked(params["ada_w"]), stacked(params["ada_b"]),
        stacked(params["qkv_w"]), stacked(params["qkv_b"]),
        stacked(params["proj_w"]), stacked(params["proj_b"]),
        stacked(params["mlp1_w"]), stacked(params["mlp1_b"]),
        stacked(params["mlp2_w"]), stacked(params["mlp2_b"]),
        full(params["fada_w"]), full(params["fada_b"]),
        full(params["fin_w"]), full(params["fin_b"]),
    ]
    args = (tfreq, patches, pos,
            params["te_w1"], params["te_b1"], params["te_w2"], params["te_b2"],
            params["pe_w"], params["pe_b"],
            params["ada_w"], params["ada_b"], params["qkv_w"], params["qkv_b"],
            params["proj_w"], params["proj_b"], params["mlp1_w"], params["mlp1_b"],
            params["mlp2_w"], params["mlp2_b"],
            params["fada_w"], params["fada_b"], params["fin_w"], params["fin_b"])

    # Advisory cost estimate so XLA can schedule around this fused custom call.
    flops_block = 2 * (hidden * 6 * hidden
                       + T * hidden * 3 * hidden
                       + 2 * num_heads * T * T * hd
                       + T * hidden * hidden
                       + 2 * T * hidden * mlp_hidden)
    flops = B * (depth * flops_block
                 + 2 * T * PPC * hidden
                 + 2 * (freq_dim * hidden + hidden * hidden)
                 + 2 * (hidden * 2 * hidden + T * hidden * ppoc))
    transc = B * depth * (num_heads * T * T + T * mlp_hidden + 8 * hidden)
    bytes_accessed = (sum(int(np.prod(a.shape)) * a.dtype.itemsize for a in args)
                      + B * T * ppoc * 4)

    kernel = functools.partial(dit_trunk_kernel, hidden=hidden,
                               num_heads=num_heads, eps=eps)

    return pl.pallas_call(
        kernel,
        out_shape=jax.ShapeDtypeStruct((B, T, ppoc), jnp.float32),
        grid=(B, depth),
        in_specs=in_specs,
        out_specs=pl.BlockSpec((1, T, ppoc), lambda b, d: (b, 0, 0)),
        scratch_shapes=[pltpu.VMEM((T, hidden), jnp.float32),   # x_sc (activation)
                        pltpu.VMEM((1, hidden), jnp.float32)],  # c_sc (conditioning)
        compiler_params=pltpu.CompilerParams(
            dimension_semantics=("parallel", "arbitrary")),
        cost_estimate=pl.CostEstimate(flops=int(flops),
                                      transcendentals=int(transc),
                                      bytes_accessed=int(bytes_accessed)),
    )(*args)


# ----------------------------- host-side layout helpers ---------------------

def patchify(x, p):
    # Conv2d(kernel=stride=p) == per-patch flatten in (C, p, p) order + linear.
    B, C, H, W = x.shape
    h, w = H // p, W // p
    x = x.reshape(B, C, h, p, w, p).transpose(0, 2, 4, 1, 3, 5)   # (B, h, w, C, p, p)
    return x.reshape(B, h * w, C * p * p)


def unpatchify(y, p, out_c):
    # matches ViT_Classifier.unpatchify: 'nhwpqc -> nchpwq'
    B, T, _ = y.shape
    h = w = int(round(math.sqrt(T)))
    y = y.reshape(B, h, w, p, p, out_c).transpose(0, 5, 1, 3, 2, 4)
    return y.reshape(B, out_c, h * p, w * p)


def timestep_embedding(t, dim, max_period=10000.0):
    half = dim // 2
    freqs = jnp.exp(-math.log(max_period) *
                    jnp.arange(half, dtype=jnp.float32) / half)
    args = t[:, None].astype(jnp.float32) * freqs[None, :]
    return jnp.concatenate([jnp.cos(args), jnp.sin(args)], axis=-1)


# ----------------------------- sin-cos pos-embed (numpy, init-time) ---------

def get_1d_sincos_pos_embed_from_grid(embed_dim, pos):
    assert embed_dim % 2 == 0
    omega = np.arange(embed_dim // 2, dtype=np.float64)
    omega /= embed_dim / 2.0
    omega = 1.0 / 10000 ** omega
    pos = pos.reshape(-1)
    out = np.einsum('m,d->md', pos, omega)
    return np.concatenate([np.sin(out), np.cos(out)], axis=1)


def get_2d_sincos_pos_embed_from_grid(embed_dim, grid):
    assert embed_dim % 2 == 0
    emb_h = get_1d_sincos_pos_embed_from_grid(embed_dim // 2, grid[0])
    emb_w = get_1d_sincos_pos_embed_from_grid(embed_dim // 2, grid[1])
    return np.concatenate([emb_h, emb_w], axis=1)


def get_2d_sincos_pos_embed(embed_dim, grid_size):
    grid_h = np.arange(grid_size, dtype=np.float32)
    grid_w = np.arange(grid_size, dtype=np.float32)
    grid = np.meshgrid(grid_w, grid_h)
    grid = np.stack(grid, axis=0).reshape([2, 1, grid_size, grid_size])
    return get_2d_sincos_pos_embed_from_grid(embed_dim, grid)


# ----------------------------- forward & reference --------------------------

def vit_classifier_forward(x, t, params, *, patch, hidden, num_heads,
                           pos_embed, freq_dim=256, eps=1e-6):
    patches = patchify(x, patch)
    tfreq = timestep_embedding(t, freq_dim)[:, None, :]
    y = dit_trunk_pallas(patches, tfreq, pos_embed, params,
                         hidden=hidden, num_heads=num_heads, eps=eps)
    out_c = params["fin_w"].shape[1] // (patch * patch)
    return unpatchify(y, patch, out_c)


def vit_classifier_reference(x, t, params, *, patch, hidden, num_heads,
                             pos_embed, freq_dim=256, eps=1e-6):
    f32 = lambda a: a.astype(jnp.float32)
    B = x.shape[0]
    H = hidden
    hd = H // num_heads

    patches = patchify(x, patch)
    xe = patches @ f32(params["pe_w"]) + params["pe_b"] + pos_embed[None]
    tf = timestep_embedding(t, freq_dim)
    c = _silu(tf @ f32(params["te_w1"]) + params["te_b1"]) @ f32(params["te_w2"]) \
        + params["te_b2"]                                        # (B, H)
    T = xe.shape[1]
    depth = params["ada_w"].shape[0]
    for d in range(depth):
        ada = _silu(c) @ f32(params["ada_w"][d]) + params["ada_b"][d]
        sm, scm, gm, sp, scp, gp = [ada[:, i * H:(i + 1) * H] for i in range(6)]
        h1 = _ln(xe, eps) * (1.0 + scm[:, None, :]) + sm[:, None, :]
        qkv = h1 @ f32(params["qkv_w"][d]) + params["qkv_b"][d]
        q, k, v = qkv[..., :H], qkv[..., H:2 * H], qkv[..., 2 * H:]
        sh = lambda z: z.reshape(B, T, num_heads, hd).transpose(0, 2, 1, 3)
        q, k, v = sh(q), sh(k), sh(v)
        s = jnp.einsum("bhqd,bhkd->bhqk", q, k) / math.sqrt(hd)
        s = s - jnp.max(s, axis=-1, keepdims=True)
        e = jnp.exp(s)
        p = e / jnp.sum(e, axis=-1, keepdims=True)
        a = jnp.einsum("bhqk,bhkd->bhqd", p, v).transpose(0, 2, 1, 3).reshape(B, T, H)
        a = a @ f32(params["proj_w"][d]) + params["proj_b"][d]
        xe = xe + gm[:, None, :] * a
        h2 = _ln(xe, eps) * (1.0 + scp[:, None, :]) + sp[:, None, :]
        m = _gelu_tanh(h2 @ f32(params["mlp1_w"][d]) + params["mlp1_b"][d])
        m = m @ f32(params["mlp2_w"][d]) + params["mlp2_b"][d]
        xe = xe + gp[:, None, :] * m
    fada = _silu(c) @ f32(params["fada_w"]) + params["fada_b"]
    shift, scale = fada[:, :H], fada[:, H:]
    y = _ln(xe, eps) * (1.0 + scale[:, None, :]) + shift[:, None, :]
    y = y @ f32(params["fin_w"]) + params["fin_b"]
    out_c = params["fin_w"].shape[1] // (patch * patch)
    return unpatchify(y, patch, out_c)


# ----------------------------- parameter init -------------------------------

def init_vit_params(key, *, in_channels, patch, hidden, depth, num_heads,
                    mlp_ratio, learn_sigma, freq_dim=256):
    del num_heads
    out_c = in_channels * 2 if learn_sigma else in_channels
    ppc = patch * patch * in_channels
    ppoc = patch * patch * out_c
    mlp_hidden = int(hidden * mlp_ratio)
    H = hidden

    def xavier(k, fi, fo):
        b = math.sqrt(6.0 / (fi + fo))
        return jax.random.uniform(k, (fi, fo), jnp.float32, -b, b)

    def normal(k, fi, fo, std):
        return std * jax.random.normal(k, (fi, fo), jnp.float32)

    def bias(k, n, std=0.02):
        # NOTE: the real module zero-inits all biases (and zero-inits adaLN /
        # the final linear); small random values are used so the numerical
        # check below actually exercises every term of the kernel.
        return std * jax.random.normal(k, (1, n), jnp.float32)

    keys = iter(jax.random.split(key, 8 + 12 * depth + 8))
    nk = lambda: next(keys)

    p = {
        "pe_w": xavier(nk(), ppc, H), "pe_b": bias(nk(), H),
        "te_w1": normal(nk(), freq_dim, H, 0.02), "te_b1": bias(nk(), H),
        "te_w2": normal(nk(), H, H, 0.02), "te_b2": bias(nk(), H),
        "ada_w": jnp.stack([xavier(nk(), H, 6 * H) for _ in range(depth)]),
        "ada_b": jnp.stack([bias(nk(), 6 * H) for _ in range(depth)]),
        "qkv_w": jnp.stack([xavier(nk(), H, 3 * H) for _ in range(depth)]),
        "qkv_b": jnp.stack([bias(nk(), 3 * H) for _ in range(depth)]),
        "proj_w": jnp.stack([xavier(nk(), H, H) for _ in range(depth)]),
        "proj_b": jnp.stack([bias(nk(), H) for _ in range(depth)]),
        "mlp1_w": jnp.stack([xavier(nk(), H, mlp_hidden) for _ in range(depth)]),
        "mlp1_b": jnp.stack([bias(nk(), mlp_hidden) for _ in range(depth)]),
        "mlp2_w": jnp.stack([xavier(nk(), mlp_hidden, H) for _ in range(depth)]),
        "mlp2_b": jnp.stack([bias(nk(), H) for _ in range(depth)]),
        "fada_w": xavier(nk(), H, 2 * H), "fada_b": bias(nk(), 2 * H),
        "fin_w": xavier(nk(), H, ppoc), "fin_b": bias(nk(), ppoc),
    }
    # bf16 weight matrices (full-rate MXU, half the weight DMA traffic);
    # biases stay f32 and are added after the f32-accumulated matmul.
    for name in list(p):
        if name.endswith("_w"):
            p[name] = p[name].astype(jnp.bfloat16)
    return p


# ------------------------------ demo / self-check ----------------------------

if __name__ == "__main__":
    INPUT_SIZE, PATCH, IN_CH = 16, 2, 4
    HIDDEN, DEPTH, HEADS, MLP_RATIO = 128, 2, 4, 4.0
    LEARN_SIGMA = True
    FREQ = 256
    B = 2

    key = jax.random.PRNGKey(0)
    kx, kt, kp = jax.random.split(key, 3)
    x = jax.random.normal(kx, (B, IN_CH, INPUT_SIZE, INPUT_SIZE), jnp.float32)
    t = jax.random.uniform(kt, (B,), jnp.float32, 0.0, 1000.0)

    params = init_vit_params(kp, in_channels=IN_CH, patch=PATCH, hidden=HIDDEN,
                             depth=DEPTH, num_heads=HEADS, mlp_ratio=MLP_RATIO,
                             learn_sigma=LEARN_SIGMA, freq_dim=FREQ)

    grid_size = INPUT_SIZE // PATCH
    pos = jnp.asarray(get_2d_sincos_pos_embed(HIDDEN, grid_size), jnp.float32)

    out = vit_classifier_forward(x, t, params, patch=PATCH, hidden=HIDDEN,
                                 num_heads=HEADS, pos_embed=pos, freq_dim=FREQ)
    out = jax.block_until_ready(out)

    ref = vit_classifier_reference(x, t, params, patch=PATCH, hidden=HIDDEN,
                                   num_heads=HEADS, pos_embed=pos, freq_dim=FREQ)

    OUT_CH = IN_CH * 2 if LEARN_SIGMA else IN_CH
    assert out.shape == (B, OUT_CH, INPUT_SIZE, INPUT_SIZE), out.shape
    max_err = float(jnp.max(jnp.abs(out - ref)))
    ref_scale = max(float(jnp.max(jnp.abs(ref))), 1.0)
    # kernel uses bf16 weights / MXU inputs, reference is full f32
    assert max_err <= 0.06 * ref_scale, (max_err, ref_scale)

    print("KERNEL_OK")
</pallas_src>

<mosaic_0001>
module attributes {stable_mosaic.version = 11 : i64} {
  func.func @dit_trunk_kernel(%arg0: i32, %arg1: i32, %arg2: memref<1x1x256xf32, #tpu.memory_space<vmem>>, %arg3: memref<1x64x16xf32, #tpu.memory_space<vmem>>, %arg4: memref<64x128xf32, #tpu.memory_space<vmem>>, %arg5: memref<256x128xf32, #tpu.memory_space<vmem>>, %arg6: memref<1x128xf32, #tpu.memory_space<vmem>>, %arg7: memref<128x128xf32, #tpu.memory_space<vmem>>, %arg8: memref<1x128xf32, #tpu.memory_space<vmem>>, %arg9: memref<16x128xbf16, #tpu.memory_space<vmem>>, %arg10: memref<1x128xf32, #tpu.memory_space<vmem>>, %arg11: memref<1x128x768xbf16, #tpu.memory_space<vmem>>, %arg12: memref<1x1x768xf32, #tpu.memory_space<vmem>>, %arg13: memref<1x128x384xbf16, #tpu.memory_space<vmem>>, %arg14: memref<1x1x384xf32, #tpu.memory_space<vmem>>, %arg15: memref<1x128x128xbf16, #tpu.memory_space<vmem>>, %arg16: memref<1x1x128xf32, #tpu.memory_space<vmem>>, %arg17: memref<1x128x512xbf16, #tpu.memory_space<vmem>>, %arg18: memref<1x1x512xf32, #tpu.memory_space<vmem>>, %arg19: memref<1x512x128xbf16, #tpu.memory_space<vmem>>, %arg20: memref<1x1x128xf32, #tpu.memory_space<vmem>>, %arg21: memref<128x256xbf16, #tpu.memory_space<vmem>>, %arg22: memref<1x256xf32, #tpu.memory_space<vmem>>, %arg23: memref<128x32xbf16, #tpu.memory_space<vmem>>, %arg24: memref<1x32xf32, #tpu.memory_space<vmem>>, %arg25: memref<1x64x32xf32, #tpu.memory_space<vmem>>, %arg26: memref<64x128xf32, #tpu.memory_space<vmem>>, %arg27: memref<1x128xf32, #tpu.memory_space<vmem>>) attributes {dimension_semantics = [#tpu.dimension_semantics<parallel>, #tpu.dimension_semantics<arbitrary>], iteration_bounds = array<i64: 2, 2>, scalar_prefetch = 0 : i64, scratch_operands = 2 : i64, tpu.core_type = #tpu.core_type<tc>, window_params = [{transform_indices = @transform_0, window_bounds = array<i64: 1, 1, 256>}, {transform_indices = @transform_1, window_bounds = array<i64: 1, 64, 16>}, {pipeline_mode = #tpu.pipeline_mode<synchronous>, transform_indices = @transform_2, window_bounds = array<i64: 64, 128>}, {pipeline_mode = #tpu.pipeline_mode<synchronous>, transform_indices = @transform_3, window_bounds = array<i64: 256, 128>}, {pipeline_mode = #tpu.pipeline_mode<synchronous>, transform_indices = @transform_4, window_bounds = array<i64: 1, 128>}, {pipeline_mode = #tpu.pipeline_mode<synchronous>, transform_indices = @transform_5, window_bounds = array<i64: 128, 128>}, {pipeline_mode = #tpu.pipeline_mode<synchronous>, transform_indices = @transform_6, window_bounds = array<i64: 1, 128>}, {pipeline_mode = #tpu.pipeline_mode<synchronous>, transform_indices = @transform_7, window_bounds = array<i64: 16, 128>}, {pipeline_mode = #tpu.pipeline_mode<synchronous>, transform_indices = @transform_8, window_bounds = array<i64: 1, 128>}, {transform_indices = @transform_9, window_bounds = array<i64: 1, 128, 768>}, {transform_indices = @transform_10, window_bounds = array<i64: 1, 1, 768>}, {transform_indices = @transform_11, window_bounds = array<i64: 1, 128, 384>}, {transform_indices = @transform_12, window_bounds = array<i64: 1, 1, 384>}, {transform_indices = @transform_13, window_bounds = array<i64: 1, 128, 128>}, {transform_indices = @transform_14, window_bounds = array<i64: 1, 1, 128>}, {transform_indices = @transform_15, window_bounds = array<i64: 1, 128, 512>}, {transform_indices = @transform_16, window_bounds = array<i64: 1, 1, 512>}, {transform_indices = @transform_17, window_bounds = array<i64: 1, 512, 128>}, {transform_indices = @transform_18, window_bounds = array<i64: 1, 1, 128>}, {pipeline_mode = #tpu.pipeline_mode<synchronous>, transform_indices = @transform_19, window_bounds = array<i64: 128, 256>}, {pipeline_mode = #tpu.pipeline_mode<synchronous>, transform_indices = @transform_20, window_bounds = array<i64: 1, 256>}, {pipeline_mode = #tpu.pipeline_mode<synchronous>, transform_indices = @transform_21, window_bounds = array<i64: 128, 32>}, {pipeline_mode = #tpu.pipeline_mode<synchronous>, transform_indices = @transform_22, window_bounds = array<i64: 1, 32>}, {transform_indices = @transform_23, window_bounds = array<i64: 1, 64, 32>}]} {
    %c0_i32 = arith.constant 0 : i32
    %0 = arith.cmpi eq, %arg1, %c0_i32 : i32
    %1 = arith.extui %0 : i1 to i32
    %c0_i32_0 = arith.constant 0 : i32
    %2 = arith.cmpi ne, %1, %c0_i32_0 : i32
    scf.if %2 {
      %c0_78 = arith.constant 0 : index
      %c0_79 = arith.constant 0 : index
      %c0_80 = arith.constant 0 : index
      %192 = vector.load %arg2[%c0_78, %c0_79, %c0_80] : memref<1x1x256xf32, #tpu.memory_space<vmem>>, vector<1x1x256xf32>
      %193 = vector.shape_cast %192 : vector<1x1x256xf32> to vector<1x256xf32>
      %c0_81 = arith.constant 0 : index
      %c0_82 = arith.constant 0 : index
      %194 = vector.load %arg5[%c0_81, %c0_82] : memref<256x128xf32, #tpu.memory_space<vmem>>, vector<256x128xf32>
      %195 = arith.truncf %193 : vector<1x256xf32> to vector<1x256xbf16>
      %cst_83 = arith.constant dense<0.000000e+00> : vector<1x128xf32>
      %196 = tpu.matmul %195, %194, %cst_83 {dimension_numbers = #tpu.dot_dimension_numbers<[1], [0], [0], [1], [0, 0, 1, 1], [], []>} : vector<1x256xbf16>, vector<256x128xf32>, vector<1x128xf32> -> vector<1x128xf32>
      %c0_84 = arith.constant 0 : index
      %c0_85 = arith.constant 0 : index
      %197 = vector.load %arg6[%c0_84, %c0_85] : memref<1x128xf32, #tpu.memory_space<vmem>>, vector<1x128xf32>
      %198 = arith.addf %196, %197 : vector<1x128xf32>
      %199 = arith.negf %198 : vector<1x128xf32>
      %200 = math.exp %199 : vector<1x128xf32>
      %cst_86 = arith.constant 1.000000e+00 : f32
      %201 = vector.broadcast %cst_86 : f32 to vector<1x128xf32>
      %202 = arith.addf %201, %200 : vector<1x128xf32>
      %203 = arith.divf %201, %202 : vector<1x128xf32>
      %204 = arith.mulf %198, %203 : vector<1x128xf32>
      %c0_87 = arith.constant 0 : index
      %c0_88 = arith.constant 0 : index
      %205 = vector.load %arg7[%c0_87, %c0_88] : memref<128x128xf32, #tpu.memory_space<vmem>>, vector<128x128xf32>
      %206 = arith.truncf %204 : vector<1x128xf32> to vector<1x128xbf16>
      %cst_89 = arith.constant dense<0.000000e+00> : vector<1x128xf32>
      %207 = tpu.matmul %206, %205, %cst_89 {dimension_numbers = #tpu.dot_dimension_numbers<[1], [0], [0], [1], [0, 0, 1, 1], [], []>} : vector<1x128xbf16>, vector<128x128xf32>, vector<1x128xf32> -> vector<1x128xf32>
      %c0_90 = arith.constant 0 : index
      %c0_91 = arith.constant 0 : index
      %208 = vector.load %arg8[%c0_90, %c0_91] : memref<1x128xf32, #tpu.memory_space<vmem>>, vector<1x128xf32>
      %209 = arith.addf %207, %208 : vector<1x128xf32>
      %c0_92 = arith.constant 0 : index
      %c0_93 = arith.constant 0 : index
      %210 = vector.load %arg27[%c0_92, %c0_93] : memref<1x128xf32, #tpu.memory_space<vmem>>, vector<1x128xf32>
      tpu.vector_store %arg27[%c0_92, %c0_93], %209 {strides = array<i32>} : memref<1x128xf32, #tpu.memory_space<vmem>>, vector<1x128xf32>,
      %c0_94 = arith.constant 0 : index
      %c0_95 = arith.constant 0 : index
      %c0_96 = arith.constant 0 : index
      %211 = vector.load %arg3[%c0_94, %c0_95, %c0_96] : memref<1x64x16xf32, #tpu.memory_space<vmem>>, vector<1x64x16xf32>
      %212 = vector.shape_cast %211 : vector<1x64x16xf32> to vector<64x16xf32>
      %c0_97 = arith.constant 0 : index
      %c0_98 = arith.constant 0 : index
      %213 = vector.load %arg9[%c0_97, %c0_98] : memref<16x128xbf16, #tpu.memory_space<vmem>>, vector<16x128xbf16>
      %214 = arith.truncf %212 : vector<64x16xf32> to vector<64x16xbf16>
      %cst_99 = arith.constant dense<0.000000e+00> : vector<64x128xf32>
      %215 = tpu.matmul %214, %213, %cst_99 {dimension_numbers = #tpu.dot_dimension_numbers<[1], [0], [0], [1], [0, 0, 1, 1], [], []>} : vector<64x16xbf16>, vector<16x128xbf16>, vector<64x128xf32> -> vector<64x128xf32>
      %c0_100 = arith.constant 0 : index
      %c0_101 = arith.constant 0 : index
      %216 = vector.load %arg10[%c0_100, %c0_101] : memref<1x128xf32, #tpu.memory_space<vmem>>, vector<1x128xf32>
      %217 = vector.broadcast %216 : vector<1x128xf32> to vector<64x128xf32>
      %218 = arith.addf %215, %217 : vector<64x128xf32>
      %c0_102 = arith.constant 0 : index
      %c0_103 = arith.constant 0 : index
      %219 = vector.load %arg4[%c0_102, %c0_103] : memref<64x128xf32, #tpu.memory_space<vmem>>, vector<64x128xf32>
      %220 = arith.addf %218, %219 : vector<64x128xf32>
      %c0_104 = arith.constant 0 : index
      %c0_105 = arith.constant 0 : index
      %221 = vector.load %arg26[%c0_104, %c0_105] : memref<64x128xf32, #tpu.memory_space<vmem>>, vector<64x128xf32>
      tpu.vector_store %arg26[%c0_104, %c0_105], %220 {strides = array<i32>} : memref<64x128xf32, #tpu.memory_space<vmem>>, vector<64x128xf32>,
    } else {
    }
    %c0 = arith.constant 0 : index
    %c0_1 = arith.constant 0 : index
    %3 = vector.load %arg27[%c0, %c0_1] : memref<1x128xf32, #tpu.memory_space<vmem>>, vector<1x128xf32>
    %4 = arith.negf %3 : vector<1x128xf32>
    %5 = math.exp %4 : vector<1x128xf32>
    %cst = arith.constant 1.000000e+00 : f32
    %6 = vector.broadcast %cst : f32 to vector<1x128xf32>
    %7 = arith.addf %6, %5 : vector<1x128xf32>
    %8 = arith.divf %6, %7 : vector<1x128xf32>
    %9 = arith.mulf %3, %8 : vector<1x128xf32>
    %c0_2 = arith.constant 0 : index
    %c0_3 = arith.constant 0 : index
    %c0_4 = arith.constant 0 : index
    %10 = vector.load %arg11[%c0_2, %c0_3, %c0_4] : memref<1x128x768xbf16, #tpu.memory_space<vmem>>, vector<1x128x768xbf16>
    %11 = vector.shape_cast %10 : vector<1x128x768xbf16> to vector<128x768xbf16>
    %12 = arith.truncf %9 : vector<1x128xf32> to vector<1x128xbf16>
    %cst_5 = arith.constant dense<0.000000e+00> : vector<1x768xf32>
    %13 = tpu.matmul %12, %11, %cst_5 {dimension_numbers = #tpu.dot_dimension_numbers<[1], [0], [0], [1], [0, 0, 1, 1], [], []>} : vector<1x128xbf16>, vector<128x768xbf16>, vector<1x768xf32> -> vector<1x768xf32>
    %c0_6 = arith.constant 0 : index
    %c0_7 = arith.constant 0 : index
    %c0_8 = arith.constant 0 : index
    %14 = vector.load %arg12[%c0_6, %c0_7, %c0_8] : memref<1x1x768xf32, #tpu.memory_space<vmem>>, vector<1x1x768xf32>
    %15 = vector.shape_cast %14 : vector<1x1x768xf32> to vector<1x768xf32>
    %16 = arith.addf %13, %15 : vector<1x768xf32>
    %17 = vector.extract_strided_slice %16 {offsets = [0, 0], sizes = [1, 128], strides = [1, 1]} : vector<1x768xf32> to vector<1x128xf32>
    %18 = vector.extract_strided_slice %16 {offsets = [0, 128], sizes = [1, 128], strides = [1, 1]} : vector<1x768xf32> to vector<1x128xf32>
    %19 = vector.extract_strided_slice %16 {offsets = [0, 256], sizes = [1, 128], strides = [1, 1]} : vector<1x768xf32> to vector<1x128xf32>
    %20 = vector.extract_strided_slice %16 {offsets = [0, 384], sizes = [1, 128], strides = [1, 1]} : vector<1x768xf32> to vector<1x128xf32>
    %21 = vector.extract_strided_slice %16 {offsets = [0, 512], sizes = [1, 128], strides = [1, 1]} : vector<1x768xf32> to vector<1x128xf32>
    %22 = vector.extract_strided_slice %16 {offsets = [0, 640], sizes = [1, 128], strides = [1, 1]} : vector<1x768xf32> to vector<1x128xf32>
    %c0_9 = arith.constant 0 : index
    %c0_10 = arith.constant 0 : index
    %23 = vector.load %arg26[%c0_9, %c0_10] : memref<64x128xf32, #tpu.memory_space<vmem>>, vector<64x128xf32>
    %cst_11 = arith.constant dense<0.000000e+00> : vector<64xf32>
    %24 = vector.multi_reduction <add>, %23, %cst_11 [1] : vector<64x128xf32> to vector<64xf32>
    %25 = vector.shape_cast %24 : vector<64xf32> to vector<64x1xf32>
    %cst_12 = arith.constant 1.280000e+02 : f32
    %26 = vector.broadcast %cst_12 : f32 to vector<64x1xf32>
    %27 = arith.divf %25, %26 : vector<64x1xf32>
    %28 = vector.broadcast %27 : vector<64x1xf32> to vector<64x128xf32>
    %29 = arith.subf %23, %28 : vector<64x128xf32>
    %30 = arith.mulf %29, %29 : vector<64x128xf32>
    %cst_13 = arith.constant dense<0.000000e+00> : vector<64xf32>
    %31 = vector.multi_reduction <add>, %30, %cst_13 [1] : vector<64x128xf32> to vector<64xf32>
    %32 = vector.shape_cast %31 : vector<64xf32> to vector<64x1xf32>
    %cst_14 = arith.constant 1.280000e+02 : f32
    %33 = vector.broadcast %cst_14 : f32 to vector<64x1xf32>
    %34 = arith.divf %32, %33 : vector<64x1xf32>
    %35 = vector.broadcast %27 : vector<64x1xf32> to vector<64x128xf32>
    %36 = arith.subf %23, %35 : vector<64x128xf32>
    %cst_15 = arith.constant 9.99999997E-7 : f32
    %37 = vector.broadcast %cst_15 : f32 to vector<64x1xf32>
    %38 = arith.addf %34, %37 : vector<64x1xf32>
    %39 = math.rsqrt %38 : vector<64x1xf32>
    %40 = vector.broadcast %39 : vector<64x1xf32> to vector<64x128xf32>
    %41 = arith.mulf %36, %40 : vector<64x128xf32>
    %cst_16 = arith.constant 1.000000e+00 : f32
    %42 = vector.broadcast %cst_16 : f32 to vector<1x128xf32>
    %43 = arith.addf %42, %18 : vector<1x128xf32>
    %44 = vector.broadcast %43 : vector<1x128xf32> to vector<64x128xf32>
    %45 = arith.mulf %41, %44 : vector<64x128xf32>
    %46 = vector.broadcast %17 : vector<1x128xf32> to vector<64x128xf32>
    %47 = arith.addf %45, %46 : vector<64x128xf32>
    %c0_17 = arith.constant 0 : index
    %c0_18 = arith.constant 0 : index
    %c0_19 = arith.constant 0 : index
    %48 = vector.load %arg13[%c0_17, %c0_18, %c0_19] : memref<1x128x384xbf16, #tpu.memory_space<vmem>>, vector<1x128x384xbf16>
    %49 = vector.shape_cast %48 : vector<1x128x384xbf16> to vector<128x384xbf16>
    %50 = arith.truncf %47 : vector<64x128xf32> to vector<64x128xbf16>
    %cst_20 = arith.constant dense<0.000000e+00> : vector<64x384xf32>
    %51 = tpu.matmul %50, %49, %cst_20 {dimension_numbers = #tpu.dot_dimension_numbers<[1], [0], [0], [1], [0, 0, 1, 1], [], []>} : vector<64x128xbf16>, vector<128x384xbf16>, vector<64x384xf32> -> vector<64x384xf32>
    %c0_21 = arith.constant 0 : index
    %c0_22 = arith.constant 0 : index
    %c0_23 = arith.constant 0 : index
    %52 = vector.load %arg14[%c0_21, %c0_22, %c0_23] : memref<1x1x384xf32, #tpu.memory_space<vmem>>, vector<1x1x384xf32>
    %53 = vector.shape_cast %52 : vector<1x1x384xf32> to vector<1x384xf32>
    %54 = vector.broadcast %53 : vector<1x384xf32> to vector<64x384xf32>
    %55 = arith.addf %51, %54 : vector<64x384xf32>
    %56 = vector.extract_strided_slice %55 {offsets = [0, 0], sizes = [64, 32], strides = [1, 1]} : vector<64x384xf32> to vector<64x32xf32>
    %cst_24 = arith.constant 0.176776692 : f32
    %57 = vector.broadcast %cst_24 : f32 to vector<64x32xf32>
    %58 = arith.mulf %56, %57 : vector<64x32xf32>
    %59 = vector.extract_strided_slice %55 {offsets = [0, 128], sizes = [64, 32], strides = [1, 1]} : vector<64x384xf32> to vector<64x32xf32>
    %60 = vector.extract_strided_slice %55 {offsets = [0, 256], sizes = [64, 32], strides = [1, 1]} : vector<64x384xf32> to vector<64x32xf32>
    %cst_25 = arith.constant dense<0.000000e+00> : vector<64x64xf32>
    %61 = tpu.matmul %58, %59, %cst_25 {dimension_numbers = #tpu.dot_dimension_numbers<[1], [1], [0], [0], [0, 0, 1, 0], [], []>} : vector<64x32xf32>, vector<64x32xf32>, vector<64x64xf32> -> vector<64x64xf32>
    %cst_26 = arith.constant dense<0xFF800000> : vector<64xf32>
    %62 = vector.multi_reduction <maximumf>, %61, %cst_26 [1] : vector<64x64xf32> to vector<64xf32>
    %63 = vector.shape_cast %62 : vector<64xf32> to vector<64x1xf32>
    %64 = vector.broadcast %63 : vector<64x1xf32> to vector<64x64xf32>
    %65 = arith.subf %61, %64 : vector<64x64xf32>
    %66 = math.exp %65 : vector<64x64xf32>
    %cst_27 = arith.constant dense<0.000000e+00> : vector<64xf32>
    %67 = vector.multi_reduction <add>, %66, %cst_27 [1] : vector<64x64xf32> to vector<64xf32>
    %68 = vector.shape_cast %67 : vector<64xf32> to vector<64x1xf32>
    %69 = vector.broadcast %68 : vector<64x1xf32> to vector<64x64xf32>
    %70 = arith.divf %66, %69 : vector<64x64xf32>
    %cst_28 = arith.constant dense<0.000000e+00> : vector<64x32xf32>
    %71 = tpu.matmul %70, %60, %cst_28 {dimension_numbers = #tpu.dot_dimension_numbers<[1], [0], [0], [1], [0, 0, 1, 1], [], []>} : vector<64x64xf32>, vector<64x32xf32>, vector<64x32xf32> -> vector<64x32xf32>
    %72 = vector.extract_strided_slice %55 {offsets = [0, 32], sizes = [64, 32], strides = [1, 1]} : vector<64x384xf32> to vector<64x32xf32>
    %cst_29 = arith.constant 0.176776692 : f32
    %73 = vector.broadcast %cst_29 : f32 to vector<64x32xf32>
    %74 = arith.mulf %72, %73 : vector<64x32xf32>
    %75 = vector.extract_strided_slice %55 {offsets = [0, 160], sizes = [64, 32], strides = [1, 1]} : vector<64x384xf32> to vector<64x32xf32>
    %76 = vector.extract_strided_slice %55 {offsets = [0, 288], sizes = [64, 32], strides = [1, 1]} : vector<64x384xf32> to vector<64x32xf32>
    %cst_30 = arith.constant dense<0.000000e+00> : vector<64x64xf32>
    %77 = tpu.matmul %74, %75, %cst_30 {dimension_numbers = #tpu.dot_dimension_numbers<[1], [1], [0], [0], [0, 0, 1, 0], [], []>} : vector<64x32xf32>, vector<64x32xf32>, vector<64x64xf32> -> vector<64x64xf32>
    %cst_31 = arith.constant dense<0xFF800000> : vector<64xf32>
    %78 = vector.multi_reduction <maximumf>, %77, %cst_31 [1] : vector<64x64xf32> to vector<64xf32>
    %79 = vector.shape_cast %78 : vector<64xf32> to vector<64x1xf32>
    %80 = vector.broadcast %79 : vector<64x1xf32> to vector<64x64xf32>
    %81 = arith.subf %77, %80 : vector<64x64xf32>
    %82 = math.exp %81 : vector<64x64xf32>
    %cst_32 = arith.constant dense<0.000000e+00> : vector<64xf32>
    %83 = vector.multi_reduction <add>, %82, %cst_32 [1] : vector<64x64xf32> to vector<64xf32>
    %84 = vector.shape_cast %83 : vector<64xf32> to vector<64x1xf32>
    %85 = vector.broadcast %84 : vector<64x1xf32> to vector<64x64xf32>
    %86 = arith.divf %82, %85 : vector<64x64xf32>
    %cst_33 = arith.constant dense<0.000000e+00> : vector<64x32xf32>
    %87 = tpu.matmul %86, %76, %cst_33 {dimension_numbers = #tpu.dot_dimension_numbers<[1], [0], [0], [1], [0, 0, 1, 1], [], []>} : vector<64x64xf32>, vector<64x32xf32>, vector<64x32xf32> -> vector<64x32xf32>
    %88 = vector.extract_strided_slice %55 {offsets = [0, 64], sizes = [64, 32], strides = [1, 1]} : vector<64x384xf32> to vector<64x32xf32>
    %cst_34 = arith.constant 0.176776692 : f32
    %89 = vector.broadcast %cst_34 : f32 to vector<64x32xf32>
    %90 = arith.mulf %88, %89 : vector<64x32xf32>
    %91 = vector.extract_strided_slice %55 {offsets = [0, 192], sizes = [64, 32], strides = [1, 1]} : vector<64x384xf32> to vector<64x32xf32>
    %92 = vector.extract_strided_slice %55 {offsets = [0, 320], sizes = [64, 32], strides = [1, 1]} : vector<64x384xf32> to vector<64x32xf32>
    %cst_35 = arith.constant dense<0.000000e+00> : vector<64x64xf32>
    %93 = tpu.matmul %90, %91, %cst_35 {dimension_numbers = #tpu.dot_dimension_numbers<[1], [1], [0], [0], [0, 0, 1, 0], [], []>} : vector<64x32xf32>, vector<64x32xf32>, vector<64x64xf32> -> vector<64x64xf32>
    %cst_36 = arith.constant dense<0xFF800000> : vector<64xf32>
    %94 = vector.multi_reduction <maximumf>, %93, %cst_36 [1] : vector<64x64xf32> to vector<64xf32>
    %95 = vector.shape_cast %94 : vector<64xf32> to vector<64x1xf32>
    %96 = vector.broadcast %95 : vector<64x1xf32> to vector<64x64xf32>
    %97 = arith.subf %93, %96 : vector<64x64xf32>
    %98 = math.exp %97 : vector<64x64xf32>
    %cst_37 = arith.constant dense<0.000000e+00> : vector<64xf32>
    %99 = vector.multi_reduction <add>, %98, %cst_37 [1] : vector<64x64xf32> to vector<64xf32>
    %100 = vector.shape_cast %99 : vector<64xf32> to vector<64x1xf32>
    %101 = vector.broadcast %100 : vector<64x1xf32> to vector<64x64xf32>
    %102 = arith.divf %98, %101 : vector<64x64xf32>
    %cst_38 = arith.constant dense<0.000000e+00> : vector<64x32xf32>
    %103 = tpu.matmul %102, %92, %cst_38 {dimension_numbers = #tpu.dot_dimension_numbers<[1], [0], [0], [1], [0, 0, 1, 1], [], []>} : vector<64x64xf32>, vector<64x32xf32>, vector<64x32xf32> -> vector<64x32xf32>
    %104 = vector.extract_strided_slice %55 {offsets = [0, 96], sizes = [64, 32], strides = [1, 1]} : vector<64x384xf32> to vector<64x32xf32>
    %cst_39 = arith.constant 0.176776692 : f32
    %105 = vector.broadcast %cst_39 : f32 to vector<64x32xf32>
    %106 = arith.mulf %104, %105 : vector<64x32xf32>
    %107 = vector.extract_strided_slice %55 {offsets = [0, 224], sizes = [64, 32], strides = [1, 1]} : vector<64x384xf32> to vector<64x32xf32>
    %108 = vector.extract_strided_slice %55 {offsets = [0, 352], sizes = [64, 32], strides = [1, 1]} : vector<64x384xf32> to vector<64x32xf32>
    %cst_40 = arith.constant dense<0.000000e+00> : vector<64x64xf32>
    %109 = tpu.matmul %106, %107, %cst_40 {dimension_numbers = #tpu.dot_dimension_numbers<[1], [1], [0], [0], [0, 0, 1, 0], [], []>} : vector<64x32xf32>, vector<64x32xf32>, vector<64x64xf32> -> vector<64x64xf32>
    %cst_41 = arith.constant dense<0xFF800000> : vector<64xf32>
    %110 = vector.multi_reduction <maximumf>, %109, %cst_41 [1] : vector<64x64xf32> to vector<64xf32>
    %111 = vector.shape_cast %110 : vector<64xf32> to vector<64x1xf32>
    %112 = vector.broadcast %111 : vector<64x1xf32> to vector<64x64xf32>
    %113 = arith.subf %109, %112 : vector<64x64xf32>
    %114 = math.exp %113 : vector<64x64xf32>
    %cst_42 = arith.constant dense<0.000000e+00> : vector<64xf32>
    %115 = vector.multi_reduction <add>, %114, %cst_42 [1] : vector<64x64xf32> to vector<64xf32>
    %116 = vector.shape_cast %115 : vector<64xf32> to vector<64x1xf32>
    %117 = vector.broadcast %116 : vector<64x1xf32> to vector<64x64xf32>
    %118 = arith.divf %114, %117 : vector<64x64xf32>
    %cst_43 = arith.constant dense<0.000000e+00> : vector<64x32xf32>
    %119 = tpu.matmul %118, %108, %cst_43 {dimension_numbers = #tpu.dot_dimension_numbers<[1], [0], [0], [1], [0, 0, 1, 1], [], []>} : vector<64x64xf32>, vector<64x32xf32>, vector<64x32xf32> -> vector<64x32xf32>
    %120 = tpu.concatenate %71, %87, %103, %119 in 1 : vector<64x32xf32>, vector<64x32xf32>, vector<64x32xf32>, vector<64x32xf32> -> vector<64x128xf32>
    %c0_44 = arith.constant 0 : index
    %c0_45 = arith.constant 0 : index
    %c0_46 = arith.constant 0 : index
    %121 = vector.load %arg15[%c0_44, %c0_45, %c0_46] : memref<1x128x128xbf16, #tpu.memory_space<vmem>>, vector<1x128x128xbf16>
    %122 = vector.shape_cast %121 : vector<1x128x128xbf16> to vector<128x128xbf16>
    %123 = arith.truncf %120 : vector<64x128xf32> to vector<64x128xbf16>
    %cst_47 = arith.constant dense<0.000000e+00> : vector<64x128xf32>
    %124 = tpu.matmul %123, %122, %cst_47 {dimension_numbers = #tpu.dot_dimension_numbers<[1], [0], [0], [1], [0, 0, 1, 1], [], []>} : vector<64x128xbf16>, vector<128x128xbf16>, vector<64x128xf32> -> vector<64x128xf32>
    %c0_48 = arith.constant 0 : index
    %c0_49 = arith.constant 0 : index
    %c0_50 = arith.constant 0 : index
    %125 = vector.load %arg16[%c0_48, %c0_49, %c0_50] : memref<1x1x128xf32, #tpu.memory_space<vmem>>, vector<1x1x128xf32>
    %126 = vector.shape_cast %125 : vector<1x1x128xf32> to vector<1x128xf32>
    %127 = vector.broadcast %126 : vector<1x128xf32> to vector<64x128xf32>
    %128 = arith.addf %124, %127 : vector<64x128xf32>
    %129 = vector.broadcast %19 : vector<1x128xf32> to vector<64x128xf32>
    %130 = arith.mulf %129, %128 : vector<64x128xf32>
    %131 = arith.addf %23, %130 : vector<64x128xf32>
    %cst_51 = arith.constant dense<0.000000e+00> : vector<64xf32>
    %132 = vector.multi_reduction <add>, %131, %cst_51 [1] : vector<64x128xf32> to vector<64xf32>
    %133 = vector.shape_cast %132 : vector<64xf32> to vector<64x1xf32>
    %cst_52 = arith.constant 1.280000e+02 : f32
    %134 = vector.broadcast %cst_52 : f32 to vector<64x1xf32>
    %135 = arith.divf %133, %134 : vector<64x1xf32>
    %136 = vector.broadcast %135 : vector<64x1xf32> to vector<64x128xf32>
    %137 = arith.subf %131, %136 : vector<64x128xf32>
    %138 = arith.mulf %137, %137 : vector<64x128xf32>
    %cst_53 = arith.constant dense<0.000000e+00> : vector<64xf32>
    %139 = vector.multi_reduction <add>, %138, %cst_53 [1] : vector<64x128xf32> to vector<64xf32>
    %140 = vector.shape_cast %139 : vector<64xf32> to vector<64x1xf32>
    %cst_54 = arith.constant 1.280000e+02 : f32
    %141 = vector.broadcast %cst_54 : f32 to vector<64x1xf32>
    %142 = arith.divf %140, %141 : vector<64x1xf32>
    %143 = vector.broadcast %135 : vector<64x1xf32> to vector<64x128xf32>
    %144 = arith.subf %131, %143 : vector<64x128xf32>
    %cst_55 = arith.constant 9.99999997E-7 : f32
    %145 = vector.broadcast %cst_55 : f32 to vector<64x1xf32>
    %146 = arith.addf %142, %145 : vector<64x1xf32>
    %147 = math.rsqrt %146 : vector<64x1xf32>
    %148 = vector.broadcast %147 : vector<64x1xf32> to vector<64x128xf32>
    %149 = arith.mulf %144, %148 : vector<64x128xf32>
    %cst_56 = arith.constant 1.000000e+00 : f32
    %150 = vector.broadcast %cst_56 : f32 to vector<1x128xf32>
    %151 = arith.addf %150, %21 : vector<1x128xf32>
    %152 = vector.broadcast %151 : vector<1x128xf32> to vector<64x128xf32>
    %153 = arith.mulf %149, %152 : vector<64x128xf32>
    %154 = vector.broadcast %20 : vector<1x128xf32> to vector<64x128xf32>
    %155 = arith.addf %153, %154 : vector<64x128xf32>
    %c0_57 = arith.constant 0 : index
    %c0_58 = arith.constant 0 : index
    %c0_59 = arith.constant 0 : index
    %156 = vector.load %arg17[%c0_57, %c0_58, %c0_59] : memref<1x128x512xbf16, #tpu.memory_space<vmem>>, vector<1x128x512xbf16>
    %157 = vector.shape_cast %156 : vector<1x128x512xbf16> to vector<128x512xbf16>
    %158 = arith.truncf %155 : vector<64x128xf32> to vector<64x128xbf16>
    %cst_60 = arith.constant dense<0.000000e+00> : vector<64x512xf32>
    %159 = tpu.matmul %158, %157, %cst_60 {dimension_numbers = #tpu.dot_dimension_numbers<[1], [0], [0], [1], [0, 0, 1, 1], [], []>} : vector<64x128xbf16>, vector<128x512xbf16>, vector<64x512xf32> -> vector<64x512xf32>
    %c0_61 = arith.constant 0 : index
    %c0_62 = arith.constant 0 : index
    %c0_63 = arith.constant 0 : index
    %160 = vector.load %arg18[%c0_61, %c0_62, %c0_63] : memref<1x1x512xf32, #tpu.memory_space<vmem>>, vector<1x1x512xf32>
    %161 = vector.shape_cast %160 : vector<1x1x512xf32> to vector<1x512xf32>
    %162 = vector.broadcast %161 : vector<1x512xf32> to vector<64x512xf32>
    %163 = arith.addf %159, %162 : vector<64x512xf32>
    %cst_64 = arith.constant 5.000000e-01 : f32
    %164 = vector.broadcast %cst_64 : f32 to vector<64x512xf32>
    %165 = arith.mulf %164, %163 : vector<64x512xf32>
    %cst_65 = arith.constant 4.471500e-02 : f32
    %166 = vector.broadcast %cst_65 : f32 to vector<64x512xf32>
    %167 = arith.mulf %166, %163 : vector<64x512xf32>
    %168 = arith.mulf %167, %163 : vector<64x512xf32>
    %169 = arith.mulf %168, %163 : vector<64x512xf32>
    %170 = arith.addf %163, %169 : vector<64x512xf32>
    %cst_66 = arith.constant 0.797884583 : f32
    %171 = vector.broadcast %cst_66 : f32 to vector<64x512xf32>
    %172 = arith.mulf %171, %170 : vector<64x512xf32>
    %173 = math.tanh %172 : vector<64x512xf32>
    %cst_67 = arith.constant 1.000000e+00 : f32
    %174 = vector.broadcast %cst_67 : f32 to vector<64x512xf32>
    %175 = arith.addf %174, %173 : vector<64x512xf32>
    %176 = arith.mulf %165, %175 : vector<64x512xf32>
    %c0_68 = arith.constant 0 : index
    %c0_69 = arith.constant 0 : index
    %c0_70 = arith.constant 0 : index
    %177 = vector.load %arg19[%c0_68, %c0_69, %c0_70] : memref<1x512x128xbf16, #tpu.memory_space<vmem>>, vector<1x512x128xbf16>
    %178 = vector.shape_cast %177 : vector<1x512x128xbf16> to vector<512x128xbf16>
    %179 = arith.truncf %176 : vector<64x512xf32> to vector<64x512xbf16>
    %cst_71 = arith.constant dense<0.000000e+00> : vector<64x128xf32>
    %180 = tpu.matmul %179, %178, %cst_71 {dimension_numbers = #tpu.dot_dimension_numbers<[1], [0], [0], [1], [0, 0, 1, 1], [], []>} : vector<64x512xbf16>, vector<512x128xbf16>, vector<64x128xf32> -> vector<64x128xf32>
    %c0_72 = arith.constant 0 : index
    %c0_73 = arith.constant 0 : index
    %c0_74 = arith.constant 0 : index
    %181 = vector.load %arg20[%c0_72, %c0_73, %c0_74] : memref<1x1x128xf32, #tpu.memory_space<vmem>>, vector<1x1x128xf32>
    %182 = vector.shape_cast %181 : vector<1x1x128xf32> to vector<1x128xf32>
    %183 = vector.broadcast %182 : vector<1x128xf32> to vector<64x128xf32>
    %184 = arith.addf %180, %183 : vector<64x128xf32>
    %185 = vector.broadcast %22 : vector<1x128xf32> to vector<64x128xf32>
    %186 = arith.mulf %185, %184 : vector<64x128xf32>
    %187 = arith.addf %131, %186 : vector<64x128xf32>
    %c0_75 = arith.constant 0 : index
    %c0_76 = arith.constant 0 : index
    %188 = vector.load %arg26[%c0_75, %c0_76] : memref<64x128xf32, #tpu.memory_space<vmem>>, vector<64x128xf32>
    tpu.vector_store %arg26[%c0_75, %c0_76], %187 {strides = array<i32>} : memref<64x128xf32, #tpu.memory_space<vmem>>, vector<64x128xf32>,
    %c1_i32 = arith.constant 1 : i32
    %189 = arith.cmpi eq, %arg1, %c1_i32 : i32
    %190 = arith.extui %189 : i1 to i32
    %c0_i32_77 = arith.constant 0 : i32
    %191 = arith.cmpi ne, %190, %c0_i32_77 : i32
    scf.if %191 {
      %c0_78 = arith.constant 0 : index
      %c0_79 = arith.constant 0 : index
      %192 = vector.load %arg27[%c0_78, %c0_79] : memref<1x128xf32, #tpu.memory_space<vmem>>, vector<1x128xf32>
      %193 = arith.negf %192 : vector<1x128xf32>
      %194 = math.exp %193 : vector<1x128xf32>
      %cst_80 = arith.constant 1.000000e+00 : f32
      %195 = vector.broadcast %cst_80 : f32 to vector<1x128xf32>
      %196 = arith.addf %195, %194 : vector<1x128xf32>
      %197 = arith.divf %195, %196 : vector<1x128xf32>
      %198 = arith.mulf %192, %197 : vector<1x128xf32>
      %c0_81 = arith.constant 0 : index
      %c0_82 = arith.constant 0 : index
      %199 = vector.load %arg21[%c0_81, %c0_82] : memref<128x256xbf16, #tpu.memory_space<vmem>>, vector<128x256xbf16>
      %200 = arith.truncf %198 : vector<1x128xf32> to vector<1x128xbf16>
      %cst_83 = arith.constant dense<0.000000e+00> : vector<1x256xf32>
      %201 = tpu.matmul %200, %199, %cst_83 {dimension_numbers = #tpu.dot_dimension_numbers<[1], [0], [0], [1], [0, 0, 1, 1], [], []>} : vector<1x128xbf16>, vector<128x256xbf16>, vector<1x256xf32> -> vector<1x256xf32>
      %c0_84 = arith.constant 0 : index
      %c0_85 = arith.constant 0 : index
      %202 = vector.load %arg22[%c0_84, %c0_85] : memref<1x256xf32, #tpu.memory_space<vmem>>, vector<1x256xf32>
      %203 = arith.addf %201, %202 : vector<1x256xf32>
      %204 = vector.extract_strided_slice %203 {offsets = [0, 0], sizes = [1, 128], strides = [1, 1]} : vector<1x256xf32> to vector<1x128xf32>
      %205 = vector.extract_strided_slice %203 {offsets = [0, 128], sizes = [1, 128], strides = [1, 1]} : vector<1x256xf32> to vector<1x128xf32>
      %c0_86 = arith.constant 0 : index
      %c0_87 = arith.constant 0 : index
      %206 = vector.load %arg26[%c0_86, %c0_87] : memref<64x128xf32, #tpu.memory_space<vmem>>, vector<64x128xf32>
      %cst_88 = arith.constant dense<0.000000e+00> : vector<64xf32>
      %207 = vector.multi_reduction <add>, %206, %cst_88 [1] : vector<64x128xf32> to vector<64xf32>
      %208 = vector.shape_cast %207 : vector<64xf32> to vector<64x1xf32>
      %cst_89 = arith.constant 1.280000e+02 : f32
      %209 = vector.broadcast %cst_89 : f32 to vector<64x1xf32>
      %210 = arith.divf %208, %209 : vector<64x1xf32>
      %211 = vector.broadcast %210 : vector<64x1xf32> to vector<64x128xf32>
      %212 = arith.subf %206, %211 : vector<64x128xf32>
      %213 = arith.mulf %212, %212 : vector<64x128xf32>
      %cst_90 = arith.constant dense<0.000000e+00> : vector<64xf32>
      %214 = vector.multi_reduction <add>, %213, %cst_90 [1] : vector<64x128xf32> to vector<64xf32>
      %215 = vector.shape_cast %214 : vector<64xf32> to vector<64x1xf32>
      %cst_91 = arith.constant 1.280000e+02 : f32
      %216 = vector.broadcast %cst_91 : f32 to vector<64x1xf32>
      %217 = arith.divf %215, %216 : vector<64x1xf32>
      %218 = vector.broadcast %210 : vector<64x1xf32> to vector<64x128xf32>
      %219 = arith.subf %206, %218 : vector<64x128xf32>
      %cst_92 = arith.constant 9.99999997E-7 : f32
      %220 = vector.broadcast %cst_92 : f32 to vector<64x1xf32>
      %221 = arith.addf %217, %220 : vector<64x1xf32>
      %222 = math.rsqrt %221 : vector<64x1xf32>
      %223 = vector.broadcast %222 : vector<64x1xf32> to vector<64x128xf32>
      %224 = arith.mulf %219, %223 : vector<64x128xf32>
      %cst_93 = arith.constant 1.000000e+00 : f32
      %225 = vector.broadcast %cst_93 : f32 to vector<1x128xf32>
      %226 = arith.addf %225, %205 : vector<1x128xf32>
      %227 = vector.broadcast %226 : vector<1x128xf32> to vector<64x128xf32>
      %228 = arith.mulf %224, %227 : vector<64x128xf32>
      %229 = vector.broadcast %204 : vector<1x128xf32> to vector<64x128xf32>
      %230 = arith.addf %228, %229 : vector<64x128xf32>
      %c0_94 = arith.constant 0 : index
      %c0_95 = arith.constant 0 : index
      %231 = vector.load %arg23[%c0_94, %c0_95] : memref<128x32xbf16, #tpu.memory_space<vmem>>, vector<128x32xbf16>
      %232 = arith.truncf %230 : vector<64x128xf32> to vector<64x128xbf16>
      %cst_96 = arith.constant dense<0.000000e+00> : vector<64x32xf32>
      %233 = tpu.matmul %232, %231, %cst_96 {dimension_numbers = #tpu.dot_dimension_numbers<[1], [0], [0], [1], [0, 0, 1, 1], [], []>} : vector<64x128xbf16>, vector<128x32xbf16>, vector<64x32xf32> -> vector<64x32xf32>
      %c0_97 = arith.constant 0 : index
      %c0_98 = arith.constant 0 : index
      %234 = vector.load %arg24[%c0_97, %c0_98] : memref<1x32xf32, #tpu.memory_space<vmem>>, vector<1x32xf32>
      %235 = vector.broadcast %234 : vector<1x32xf32> to vector<64x32xf32>
      %236 = arith.addf %233, %235 : vector<64x32xf32>
      %c0_99 = arith.constant 0 : index
      %c0_100 = arith.constant 0 : index
      %c0_101 = arith.constant 0 : index
      %237 = vector.load %arg25[%c0_99, %c0_100, %c0_101] : memref<1x64x32xf32, #tpu.memory_space<vmem>>, vector<1x64x32xf32>
      %238 = vector.shape_cast %237 : vector<1x64x32xf32> to vector<64x32xf32>
      %239 = vector.shape_cast %236 : vector<64x32xf32> to vector<1x64x32xf32>
      tpu.vector_store %arg25[%c0_99, %c0_100, %c0_101], %239 {strides = array<i32>} : memref<1x64x32xf32, #tpu.memory_space<vmem>>, vector<1x64x32xf32>,
    } else {
    }
    return
  }
  func.func @transform_0(%arg0: i32, %arg1: i32) -> (i32, i32, i32) {
    %c0_i32 = arith.constant 0 : i32
    %c0_i32_0 = arith.constant 0 : i32
    %c0_i32_1 = arith.constant 0 : i32
    return %arg0, %c0_i32, %c0_i32_0 : i32, i32, i32
  }
  func.func @transform_1(%arg0: i32, %arg1: i32) -> (i32, i32, i32) {
    %c0_i32 = arith.constant 0 : i32
    %c0_i32_0 = arith.constant 0 : i32
    %c0_i32_1 = arith.constant 0 : i32
    return %arg0, %c0_i32, %c0_i32_0 : i32, i32, i32
  }
  func.func @transform_2(%arg0: i32, %arg1: i32) -> (i32, i32) {
    %c0_i32 = arith.constant 0 : i32
    %c0_i32_0 = arith.constant 0 : i32
    %c0_i32_1 = arith.constant 0 : i32
    return %c0_i32, %c0_i32_0 : i32, i32
  }
  func.func @transform_3(%arg0: i32, %arg1: i32) -> (i32, i32) {
    %c0_i32 = arith.constant 0 : i32
    %c0_i32_0 = arith.constant 0 : i32
    %c0_i32_1 = arith.constant 0 : i32
    return %c0_i32, %c0_i32_0 : i32, i32
  }
  func.func @transform_4(%arg0: i32, %arg1: i32) -> (i32, i32) {
    %c0_i32 = arith.constant 0 : i32
    %c0_i32_0 = arith.constant 0 : i32
    %c0_i32_1 = arith.constant 0 : i32
    return %c0_i32, %c0_i32_0 : i32, i32
  }
  func.func @transform_5(%arg0: i32, %arg1: i32) -> (i32, i32) {
    %c0_i32 = arith.constant 0 : i32
    %c0_i32_0 = arith.constant 0 : i32
    %c0_i32_1 = arith.constant 0 : i32
    return %c0_i32, %c0_i32_0 : i32, i32
  }
  func.func @transform_6(%arg0: i32, %arg1: i32) -> (i32, i32) {
    %c0_i32 = arith.constant 0 : i32
    %c0_i32_0 = arith.constant 0 : i32
    %c0_i32_1 = arith.constant 0 : i32
    return %c0_i32, %c0_i32_0 : i32, i32
  }
  func.func @transform_7(%arg0: i32, %arg1: i32) -> (i32, i32) {
    %c0_i32 = arith.constant 0 : i32
    %c0_i32_0 = arith.constant 0 : i32
    %c0_i32_1 = arith.constant 0 : i32
    return %c0_i32, %c0_i32_0 : i32, i32
  }
  func.func @transform_8(%arg0: i32, %arg1: i32) -> (i32, i32) {
    %c0_i32 = arith.constant 0 : i32
    %c0_i32_0 = arith.constant 0 : i32
    %c0_i32_1 = arith.constant 0 : i32
    return %c0_i32, %c0_i32_0 : i32, i32
  }
  func.func @transform_9(%arg0: i32, %arg1: i32) -> (i32, i32, i32) {
    %c0_i32 = arith.constant 0 : i32
    %c0_i32_0 = arith.constant 0 : i32
    %c0_i32_1 = arith.constant 0 : i32
    return %arg1, %c0_i32, %c0_i32_0 : i32, i32, i32
  }
  func.func @transform_10(%arg0: i32, %arg1: i32) -> (i32, i32, i32) {
    %c0_i32 = arith.constant 0 : i32
    %c0_i32_0 = arith.constant 0 : i32
    %c0_i32_1 = arith.constant 0 : i32
    return %arg1, %c0_i32, %c0_i32_0 : i32, i32, i32
  }
  func.func @transform_11(%arg0: i32, %arg1: i32) -> (i32, i32, i32) {
    %c0_i32 = arith.constant 0 : i32
    %c0_i32_0 = arith.constant 0 : i32
    %c0_i32_1 = arith.constant 0 : i32
    return %arg1, %c0_i32, %c0_i32_0 : i32, i32, i32
  }
  func.func @transform_12(%arg0: i32, %arg1: i32) -> (i32, i32, i32) {
    %c0_i32 = arith.constant 0 : i32
    %c0_i32_0 = arith.constant 0 : i32
    %c0_i32_1 = arith.constant 0 : i32
    return %arg1, %c0_i32, %c0_i32_0 : i32, i32, i32
  }
  func.func @transform_13(%arg0: i32, %arg1: i32) -> (i32, i32, i32) {
    %c0_i32 = arith.constant 0 : i32
    %c0_i32_0 = arith.constant 0 : i32
    %c0_i32_1 = arith.constant 0 : i32
    return %arg1, %c0_i32, %c0_i32_0 : i32, i32, i32
  }
  func.func @transform_14(%arg0: i32, %arg1: i32) -> (i32, i32, i32) {
    %c0_i32 = arith.constant 0 : i32
    %c0_i32_0 = arith.constant 0 : i32
    %c0_i32_1 = arith.constant 0 : i32
    return %arg1, %c0_i32, %c0_i32_0 : i32, i32, i32
  }
  func.func @transform_15(%arg0: i32, %arg1: i32) -> (i32, i32, i32) {
    %c0_i32 = arith.constant 0 : i32
    %c0_i32_0 = arith.constant 0 : i32
    %c0_i32_1 = arith.constant 0 : i32
    return %arg1, %c0_i32, %c0_i32_0 : i32, i32, i32
  }
  func.func @transform_16(%arg0: i32, %arg1: i32) -> (i32, i32, i32) {
    %c0_i32 = arith.constant 0 : i32
    %c0_i32_0 = arith.constant 0 : i32
    %c0_i32_1 = arith.constant 0 : i32
    return %arg1, %c0_i32, %c0_i32_0 : i32, i32, i32
  }
  func.func @transform_17(%arg0: i32, %arg1: i32) -> (i32, i32, i32) {
    %c0_i32 = arith.constant 0 : i32
    %c0_i32_0 = arith.constant 0 : i32
    %c0_i32_1 = arith.constant 0 : i32
    return %arg1, %c0_i32, %c0_i32_0 : i32, i32, i32
  }
  func.func @transform_18(%arg0: i32, %arg1: i32) -> (i32, i32, i32) {
    %c0_i32 = arith.constant 0 : i32
    %c0_i32_0 = arith.constant 0 : i32
    %c0_i32_1 = arith.constant 0 : i32
    return %arg1, %c0_i32, %c0_i32_0 : i32, i32, i32
  }
  func.func @transform_19(%arg0: i32, %arg1: i32) -> (i32, i32) {
    %c0_i32 = arith.constant 0 : i32
    %c0_i32_0 = arith.constant 0 : i32
    %c0_i32_1 = arith.constant 0 : i32
    return %c0_i32, %c0_i32_0 : i32, i32
  }
  func.func @transform_20(%arg0: i32, %arg1: i32) -> (i32, i32) {
    %c0_i32 = arith.constant 0 : i32
    %c0_i32_0 = arith.constant 0 : i32
    %c0_i32_1 = arith.constant 0 : i32
    return %c0_i32, %c0_i32_0 : i32, i32
  }
  func.func @transform_21(%arg0: i32, %arg1: i32) -> (i32, i32) {
    %c0_i32 = arith.constant 0 : i32
    %c0_i32_0 = arith.constant 0 : i32
    %c0_i32_1 = arith.constant 0 : i32
    return %c0_i32, %c0_i32_0 : i32, i32
  }
  func.func @transform_22(%arg0: i32, %arg1: i32) -> (i32, i32) {
    %c0_i32 = arith.constant 0 : i32
    %c0_i32_0 = arith.constant 0 : i32
    %c0_i32_1 = arith.constant 0 : i32
    return %c0_i32, %c0_i32_0 : i32, i32
  }
  func.func @transform_23(%arg0: i32, %arg1: i32) -> (i32, i32, i32) {
    %c0_i32 = arith.constant 0 : i32
    %c0_i32_0 = arith.constant 0 : i32
    %c0_i32_1 = arith.constant 0 : i32
    return %arg0, %c0_i32, %c0_i32_0 : i32, i32, i32
  }
}

</mosaic_0001>

<bundles_post_ra>
// kernel: tpu_custom_call.1
= control target key start
LH: loop header
LB: loop body
LE: loop exit
PB: predicated region body
PF: predicated region fallthrough
CT: control target
= control target key end

     0   :  { %s11118_s0 = inlined_call_operand.hbm [shape: f32[2,1,256], index: 0, kind: input, shape index: {}]   ;;  %s11119_s1 = inlined_call_operand.vmem [shape: f32[2,64,16], index: 1, kind: input, shape index: {}]   ;;  %s11120_s2 = inlined_call_operand.hbm [shape: f32[64,128], index: 2, kind: input, shape index: {}]   ;;  %s11121_s3 = inlined_call_operand.hbm [shape: f32[256,128], index: 3, kind: input, shape index: {}]   ;;  %s11122_s4 = inlined_call_operand.vmem [shape: f32[1,128], index: 4, kind: input, shape index: {}]   ;;  %s11123_s5 = inlined_call_operand.vmem [shape: f32[128,128], index: 5, kind: input, shape index: {}]   ;;  %s11124_s6 = inlined_call_operand.hbm [shape: f32[1,128], index: 6, kind: input, shape index: {}]   ;;  %s11125_s7 = inlined_call_operand.hbm [shape: bf16[16,128], index: 7, kind: input, shape index: {}]   ;;  %s11126_s8 = inlined_call_operand.hbm [shape: f32[1,128], index: 8, kind: input, shape index: {}]   ;;  %s11127_s9 = inlined_call_operand.hbm [shape: bf16[2,128,768], index: 9, kind: input, shape index: {}]   ;;  %s11128_s10 = inlined_call_operand.hbm [shape: f32[2,1,768], index: 10, kind: input, shape index: {}]   ;;  %s11129_s11 = inlined_call_operand.hbm [shape: bf16[2,128,384], index: 11, kind: input, shape index: {}]   ;;  %s11130_s12 = inlined_call_operand.hbm [shape: f32[2,1,384], index: 12, kind: input, shape index: {}]   ;;  %s11131_s13 = inlined_call_operand.vmem [shape: bf16[2,128,128], index: 13, kind: input, shape index: {}]   ;;  %s11132_s14 = inlined_call_operand.vmem [shape: f32[2,1,128], index: 14, kind: input, shape index: {}]   ;;  %s11133_s15 = inlined_call_operand.hbm [shape: bf16[2,128,512], index: 15, kind: input, shape index: {}]   ;;  %s11134_s16 = inlined_call_operand.vmem [shape: f32[2,1,512], index: 16, kind: input, shape index: {}]   ;;  %s11135_s17 = inlined_call_operand.hbm [shape: bf16[2,512,128], index: 17, kind: input, shape index: {}]   ;;  %s11136_s18 = inlined_call_operand.vmem [shape: f32[2,1,128], index: 18, kind: input, shape index: {}]   ;;  %s11137_s19 = inlined_call_operand.hbm [shape: bf16[128,256], index: 19, kind: input, shape index: {}]   ;;  %s11138_s20 = inlined_call_operand.vmem [shape: f32[1,256], index: 20, kind: input, shape index: {}]   ;;  %s11139_s21 = inlined_call_operand.vmem [shape: bf16[128,32], index: 21, kind: input, shape index: {}]   ;;  %s11140_s22 = inlined_call_operand.vmem [shape: f32[1,32], index: 22, kind: input, shape index: {}]   ;;  %s11141_s23 = inlined_call_operand.vmem [shape: f32[2,64,32], index: 23, kind: output, shape index: {}]  }
   0x1   :  { %11217 = sst [smem:[#allocation65_spill]] %s11118_s0 }
   0x2   :  { %11218 = sst [smem:[#allocation66_spill]] %s11119_s1 }
   0x3   :  { %11219 = sst [smem:[#allocation67_spill]] %s11120_s2 }
   0x4   :  { %11220 = sst [smem:[#allocation68_spill]] %s11121_s3 }
   0x5   :  { %11221 = sst [smem:[#allocation69_spill]] %s11122_s4 }
   0x6   :  { %11222 = sst [smem:[#allocation70_spill]] %s11123_s5 }
   0x7   :  { %11223 = sst [smem:[#allocation71_spill]] %s11124_s6 }
   0x8   :  { %11224 = sst [smem:[#allocation72_spill]] %s11125_s7 }
   0x9   :  { %11225 = sst [smem:[#allocation73_spill]] %s11126_s8 }
   0xa   :  { %11226 = sst [smem:[#allocation74_spill]] %s11127_s9 }
   0xb   :  { %11227 = sst [smem:[#allocation75_spill]] %s11128_s10 }
   0xc   :  { %11228 = sst [smem:[#allocation76_spill]] %s11129_s11 }
   0xd   :  { %11229 = sst [smem:[#allocation77_spill]] %s11130_s12 }
   0xe   :  { %11230 = sst [smem:[#allocation78_spill]] %s11131_s13 }
   0xf   :  { %11231 = sst [smem:[#allocation79_spill]] %s11132_s14 }
  0x10   :  { %11232 = sst [smem:[#allocation80_spill]] %s11133_s15 }
  0x11   :  { %11233 = sst [smem:[#allocation81_spill]] %s11134_s16 }
  0x12   :  { %11234 = sst [smem:[#allocation82_spill]] %s11135_s17 }
  0x13   :  { %11235 = sst [smem:[#allocation83_spill]] %s11136_s18 }
  0x14   :  { %11236 = sst [smem:[#allocation84_spill]] %s11137_s19 }
  0x15   :  { %11237 = sst [smem:[#allocation85_spill]] %s11138_s20 }
  0x16   :  { %11238 = sst [smem:[#allocation86_spill]] %s11139_s21 }
  0x17   :  { %11239 = sst [smem:[#allocation87_spill]] %s11140_s22 }
  0x18   :  { %11240 = sst [smem:[#allocation88_spill]] %s11141_s23 }
  0x19   :  { %28 = vsyncpa [#allocation5], 0 }
  0x1a   :  { %30 = vsyncpa [#allocation5 + $0x1], 0 }
  0x1b   :  { %31 = vsyncpa [#allocation7], 0 }
  0x1c   :  { %32 = vsyncpa [#allocation10], 0 }
  0x1d   :  { %33 = vsyncpa [#allocation13], 0  ;;  %s8926_s4 = smov 0   ;;  %s8928_s30 = smov 0  }
  0x1e   :  { %s8930_s24 = smov 0   ;;  %s8932_s25 = smov 0  }
  0x1f   :  { %s8934_s5 = smov 0   ;;  %s8936_s1 = smov 0  }
  0x20   :  { %s8938_s26 = smov 0   ;;  %s8940_s2 = smov 0  }
  0x21   :  { %s8942_s6 = smov 0   ;;  %s8944_s27 = smov 0  }
  0x22   :  { %s8946_s7 = smov 0  }
  0x23 LB: > { %11241 = sst [smem:[#allocation27_spill]] %s8737_s30  ;;  %s11149_s28 = sadd.s32 4294967295, %s8773_s7   ;;  %s8773_s7 = sphi %s8946_s7, %s39_s7   ;;  %s8769_s27 = sphi %s8944_s27, %s11386_s27   ;;  %s8765_s6 = sphi %s8942_s6, %s11385_s6   ;;  %s8761_s2 = sphi %s8940_s2, %s11384_s2   ;;  %s8757_s26 = sphi %s8938_s26, %s11383_s26   ;;  %s8753_s1 = sphi %s8936_s1, %s11382_s1   ;;  %s8749_s5 = sphi %s8934_s5, %s11381_s5   ;;  %s8745_s25 = sphi %s8932_s25, %s11380_s25   ;;  %s8741_s24 = sphi %s8930_s24, %s11379_s24   ;;  %s8737_s30 = sphi %s8928_s30, %s11378_s30   ;;  %s8733_s4 = sphi %s8926_s4, %s11377_s4  }
  0x24   : > { %11242 = sst [smem:[#allocation28_spill]] %s8741_s24  ;;  %s48_s29 = sadd.s32 1, %s8765_s6 }
  0x25   : > { %11243 = sst [smem:[#allocation29_spill]] %s8749_s5  ;;  %p49_p0 = scmp.ge.s32.totalorder %s48_s29, 2 }
  0x26   : > { %11244 = sst [smem:[#allocation30_spill]] %s8753_s1  ;;  %s51_s3 = sadd.s32 1, %s8769_s27 }
  0x27   : > { %11245 = sst [smem:[#allocation31_spill]] %s8757_s26  ;;  %s58_s0 = sadd.s32 1, %s8753_s1 }
  0x28   : > { %11246 = sst [smem:[#allocation32_spill]] %s8761_s2  ;;  %p65_p1 = scmp.ne.s32.totalorder %s8753_s1, %s8749_s5 }
  0x29   : > { %11247 = sst [smem:[#allocation33_spill]] %s8765_s6  ;;  %s11388_s29 = smov (%p49_p0, %s48_s29), 0 }
  0x2a   : > { %11248 = sst [smem:[#allocation34_spill]] %s8769_s27  ;;  %s11390_s3 = smov (!%p49_p0, %s51_s3), %s8769_s27 }
  0x2b   : > { %11249 = sst [smem:[#allocation35_spill]] %s8773_s7  ;;  %p66_p2 = scmp.eq.s32.totalorder %s8773_s7, 0 }
  0x2c   : > { %11250 = sst [smem:[#allocation36_spill]] %s11388_s29  ;;  %p71_p3 = scmp.ne.s32.totalorder %s8749_s5, %s8745_s25 }
  0x2d   : > { %p53_p4 = scmp.ge.s32.totalorder %s11390_s3, 2  ;;  %p8992_p5 = scmp.eq.s32.totalorder %s11149_s28, 0 }
  0x2e   : > { %p8998_p6 = por %p66_p2, %p65_p1  ;;  %s254_s21 = ssub.s32 %s8765_s6, %s11388_s29 }
  0x2f   : > { %s11251_s22 = scalar_select %p8992_p5, 1, 0 }
  0x30   : > { %s11392_s3 = smov (%p53_p4, %s11390_s3), 0  ;;  %p9008_p7 = por %p8992_p5, %p71_p3 }
  0x31   : > { %11252 = sst [smem:[#allocation37_spill]] %s11251_s22  ;;  %p255_p8 = scmp.eq.s32.totalorder %s254_s21, 0 }
  0x32   : > { %11254 = sst [smem:[#allocation38_spill]] %s11392_s3  ;;  %s55_s28 = ssub.s32 %s8769_s27, %s11392_s3 }
  0x33   : > { %s11255_s25 = scalar_select %p9008_p7, 1, 0 }
  0x34   : > { %s257_s23 = sadd.s32 1, %s8741_s24  ;;  %p56_p9 = scmp.eq.s32.totalorder %s55_s28, 0 }
  0x35   : > { %11256 = sst [smem:[#allocation39_spill]] %s11255_s25  ;;  %p264_p10 = scmp.ne.s32.totalorder %s8741_s24, %s8737_s30 }
  0x36   : > { %s9018_s16 = scalar_select %p255_p8, %s8741_s24, %s257_s23  }
  0x37   : > { %s9021_s18 = scalar_select %p56_p9, %s8753_s1, %s58_s0  }
  0x38   : > { %11257 = sst [smem:[#allocation40_spill]] %s9018_s16  ;;  %p9025_p11 = por %p264_p10, %p66_p2 }
  0x39   : > { %11258 = sst [smem:[#allocation41_spill]] %s9021_s18  ;;  %p270_p12 = scmp.ne.s32.totalorder %s8737_s30, %s8733_s4 }
  0x3a   : > { %p7499_p0 = scmp.lt.s32.totalorder %s8773_s7, 4  ;;  %s727_s28 = sand.u32 1, %s8773_s7  }
  0x3b   : > { %p9033_p13 = por %p270_p12, %p8992_p5  ;;  %s729_s3 = sand.u32 1, %s8753_s1  }
  0x3c   : > { %s6222_s23 = sshll.u32 %s729_s3, 1  ;;  %s6532_s16 = sshll.u32 %s8769_s27, 5 }
  0x3d   : > { %s11260_s21 = scalar_select %p9033_p13, 1, 0 }
  0x3e   : > { %s11262_s18 = sld [smem:[#allocation65_spill]]  ;;  %s731_s26 = scalar_lea.vmem [#allocation4], %s6222_s23 }
  0x3f   : > { %11261 = sst [smem:[#allocation42_spill]] %s11260_s21  ;;  %s739_s4 = sshll.u32 %s731_s26, 4  ;;  %s9046_s4 = int_to_ptr.vmem [resolvable:$true] %s739_s4 }
  0x40   : > { %p9050_p1 = pnand %p7499_p0, %p8998_p6  ;;  %p9056_p2 = pnand %p7499_p0, %p9025_p11 }
  0x41   : > { %s9064_s26 = scalar_lea.sflag [#allocation5], %s727_s28 }
  0x42   : > { %s11264_s14 = scalar_select %p9056_p2, 1, 0 }
  0x43   : > { %p8287_p4 = pneg %p9050_p1 }
  0x44   : > { %s9044_s13 = scalar_lea.hbm %s11262_s18, %s6532_s16  ;;  %s9061_s16 = sand.u32 1, %s8741_s24  }
  0x45   : > { %s7402_s3 = smul.u32 384, %s9061_s16  ;;  %s8285_s23 = scalar_lea.hbm %s9044_s13, 32 }
  0x46   : > { %p8286_p3 = scmp.ne.s32.totalorder %s9044_s13, %s8285_s23  ;;  %s8290_s0 = scalar_lea.hbm %s11262_s18, 64 }
  0x47   : > { %p8291_p9 = scmp.lt.u32.totalorder %s9044_s13, %s11262_s18  ;;  %p8292_p10 = scmp.lt.u32.totalorder %s8290_s0, %s8285_s23 }
  0x48   : > { %p8288_p6 = pnand %p8287_p4, %p8286_p3  ;;  %p8294_p12 = scmp.lt.u32.totalorder %s8285_s23, %s9044_s13 }
  0x49   : > { %p8293_p11 = por %p8292_p10, %p8291_p9 }
  0x4a   : > { %p8289_p8 = pneg %p8288_p6 }
  0x4b   : > { %p8295_p0 = por %p8294_p12, %p8293_p11 }
  0x4d   : > { %p8296_p13 = pnand %p8295_p0, %p8289_p8 }
  0x4f   : > { %8299 = shalt.err (!%p8296_p13)
}
  0x50   : > { %s8300_s28 = scalar_lea.vmem %s9046_s4, 32  ;;  %s8775_s20 = smov [#allocation4]  }
  0x51   : > { %p8301_p3 = scmp.ne.s32.totalorder %s9046_s4, %s8300_s28  ;;  %s8305_s29 = sshll.u32 %s8775_s20, 4  ;;  %s8306_s29 = int_to_ptr.vmem [resolvable:$false] %s8305_s29 }
  0x52   : > { %s8307_s1 = scalar_lea.vmem %s8306_s29, 64  ;;  %p8308_p5 = scmp.lt.s32.totalorder %s9046_s4, %s8306_s29 }
  0x53   : > { %p8303_p6 = pnand %p8301_p3, %p8287_p4  ;;  %p8309_p9 = scmp.lt.s32.totalorder %s8307_s1, %s8300_s28 }
  0x55   : > { %p8304_p7 = pneg %p8303_p6  ;;  %p8310_p10 = por %p8309_p9, %p8308_p5 }
  0x57   : > { %p8311_p11 = pnand %p8310_p10, %p8304_p7 }
  0x59   : > { %8314 = shalt.err (!%p8311_p11)
}
  0x5a   : > { %7474 = dma.hbm_to_vmem [thread:$0]  (!%p9050_p1), %s9044_s13, 32, %s9046_s4, %s9064_s26  }
  0x5b   : > { %s7403_s27 = smul.u32 6144, %s8765_s6  ;;  %s758_s23 = scalar_lea.vmem [#allocation14], %s7402_s3 }
  0x5c   : > { %s765_s0 = sshll.u32 %s758_s23, 4  ;;  %s11265_s9 = sld [smem:[#allocation74_spill]]  ;;  %s9095_s0 = int_to_ptr.vmem [resolvable:$true] %s765_s0 }
  0x5d   : > { %p9106_p7 = pneg %p9056_p2 }
  0x5f   : > { %s11266_s13 = scalar_select %p9106_p7, 1, 0 }
  0x62   : > { %s9100_s29 = scalar_lea.hbm %s11265_s9, %s7403_s27  ;;  %s8320_s1 = scalar_lea.hbm %s11265_s9, 12288 }
  0x63   : > { %s8315_s2 = scalar_lea.hbm %s9100_s29, 6144  ;;  %p8321_p4 = scmp.lt.u32.totalorder %s9100_s29, %s11265_s9 }
  0x64   : > { %p8316_p5 = scmp.ne.s32.totalorder %s9100_s29, %s8315_s2  ;;  %p8322_p8 = scmp.lt.u32.totalorder %s8320_s1, %s8315_s2 }
  0x65   : > { %p8324_p0 = scmp.lt.u32.totalorder %s8315_s2, %s9100_s29 }
  0x66   : > { %p8318_p13 = pnand %p9106_p7, %p8316_p5  ;;  %p8323_p12 = por %p8322_p8, %p8321_p4 }
  0x68   : > { %p8319_p1 = pneg %p8318_p13  ;;  %p8325_p3 = por %p8324_p0, %p8323_p12 }
  0x6a   : > { %p8326_p6 = pnand %p8325_p3, %p8319_p1 }
  0x6c   : > { %8329 = shalt.err (!%p8326_p6)
}
  0x6d   : > { %s8330_s20 = scalar_lea.vmem %s9095_s0, 6144  ;;  %s8776_s28 = smov [#allocation14]  }
  0x6e   : > { %p8331_p9 = scmp.ne.s32.totalorder %s9095_s0, %s8330_s20  ;;  %s8335_s4 = sshll.u32 %s8776_s28, 4  ;;  %s8336_s4 = int_to_ptr.vmem [resolvable:$false] %s8335_s4 }
  0x6f   : > { %s8337_s3 = scalar_lea.vmem %s8336_s4, 12288  ;;  %p8338_p5 = scmp.lt.s32.totalorder %s9095_s0, %s8336_s4 }
  0x70   : > { %p8333_p10 = pnand %p8331_p9, %p9106_p7  ;;  %p8339_p13 = scmp.lt.s32.totalorder %s8337_s3, %s8330_s20 }
  0x72   : > { %p8334_p11 = pneg %p8333_p10  ;;  %p8340_p4 = por %p8339_p13, %p8338_p5 }
  0x74   : > { %p8341_p8 = pnand %p8340_p4, %p8334_p11 }
  0x76   : > { %8344 = shalt.err (!%p8341_p8)
}
  0x77   : > { %s8777_s2 = smov 384   ;;  %s8778_s1 = smov 24  }
  0x78   : > { %7477 = dma.hbm_to_vmem [thread:$0]  (!%p9056_p2), %s9100_s29, 6144, %s9095_s0, %s9064_s26, %s8777_s2, %s8777_s2, %s8778_s1  }
  0x79   : > { %s7404_s27 = smul.u32 6, %s9061_s16  ;;  %s11267_s10 = sld [smem:[#allocation75_spill]] }
  0x7a   : > { %s7405_s23 = smul.u32 96, %s8765_s6 }
  0x7b   : > { %s7406_s28 = smul.u32 192, %s9061_s16  ;;  %s779_s9 = scalar_lea.vmem [#allocation15], %s7404_s27 }
  0x7c   : > { %s787_s18 = sshll.u32 %s779_s9, 4  ;;  %s788_s18 = int_to_ptr.vmem [resolvable:$true] %s787_s18 }
  0x7f   : > { %s9136_s3 = scalar_lea.hbm %s11267_s10, %s7405_s23  ;;  %s8350_s2 = scalar_lea.hbm %s11267_s10, 192 }
  0x80   : > { %s8345_s24 = scalar_lea.hbm %s9136_s3, 96  ;;  %p8351_p3 = scmp.lt.u32.totalorder %s9136_s3, %s11267_s10 }
  0x81   : > { %p8346_p1 = scmp.ne.s32.totalorder %s9136_s3, %s8345_s24  ;;  %p8352_p6 = scmp.lt.u32.totalorder %s8350_s2, %s8345_s24 }
  0x82   : > { %p8354_p10 = scmp.lt.u32.totalorder %s8345_s24, %s9136_s3 }
  0x83   : > { %p8348_p12 = pnand %p8346_p1, %p9106_p7  ;;  %p8353_p9 = por %p8352_p6, %p8351_p3 }
  0x85   : > { %p8349_p0 = pneg %p8348_p12  ;;  %p8355_p11 = por %p8354_p10, %p8353_p9 }
  0x87   : > { %p8356_p5 = pnand %p8355_p11, %p8349_p0 }
  0x89   : > { %8359 = shalt.err (!%p8356_p5)
}
  0x8a   : > { %s8360_s9 = scalar_lea.vmem %s788_s18, 96  ;;  %s8779_s27 = smov [#allocation15]  }
  0x8b   : > { %p8361_p13 = scmp.ne.s32.totalorder %s788_s18, %s8360_s9  ;;  %s8365_s23 = sshll.u32 %s8779_s27, 4  ;;  %s8366_s23 = int_to_ptr.vmem [resolvable:$false] %s8365_s23 }
  0x8c   : > { %s8367_s20 = scalar_lea.vmem %s8366_s23, 192  ;;  %p8368_p1 = scmp.lt.s32.totalorder %s788_s18, %s8366_s23 }
  0x8d   : > { %p8363_p4 = pnand %p8361_p13, %p9106_p7  ;;  %p8369_p12 = scmp.lt.s32.totalorder %s8367_s20, %s8360_s9 }
  0x8f   : > { %p8364_p8 = pneg %p8363_p4  ;;  %p8370_p2 = por %p8369_p12, %p8368_p1 }
  0x91   : > { %p8371_p3 = pnand %p8370_p2, %p8364_p8 }
  0x93   : > { %8374 = shalt.err (!%p8371_p3)
}
  0x94   : > { %p11268_p6 = scmp.ne.s32.totalorder %s11264_s14, 0  ;;  %s7407_s24 = smul.u32 3072, %s8765_s6 }
  0x95   : > { %s798_s0 = scalar_lea.vmem [#allocation16], %s7406_s28  ;;  %s11269_s11 = sld [smem:[#allocation76_spill]] }
  0x96   : > { %7480 = dma.hbm_to_vmem [thread:$0]  (!%p11268_p6), %s9136_s3, 96, %s788_s18, %s9064_s26  }
  0x97   : > { %s805_s29 = sshll.u32 %s798_s0, 4  ;;  %s9159_s29 = int_to_ptr.vmem [resolvable:$true] %s805_s29 }
  0x9b   : > { %s9164_s4 = scalar_lea.hbm %s11269_s11, %s7407_s24  ;;  %s8380_s28 = scalar_lea.hbm %s11269_s11, 6144 }
  0x9c   : > { %s8375_s9 = scalar_lea.hbm %s9164_s4, 3072  ;;  %p8381_p10 = scmp.lt.u32.totalorder %s9164_s4, %s11269_s11 }
  0x9d   : > { %p8376_p2 = scmp.ne.s32.totalorder %s9164_s4, %s8375_s9  ;;  %p8382_p11 = scmp.lt.u32.totalorder %s8380_s28, %s8375_s9 }
  0x9e   : > { %p8384_p13 = scmp.lt.u32.totalorder %s8375_s9, %s9164_s4 }
  0x9f   : > { %p8378_p0 = pnand %p8376_p2, %p9106_p7  ;;  %p8383_p5 = por %p8382_p11, %p8381_p10 }
  0xa1   : > { %p8379_p9 = pneg %p8378_p0  ;;  %p8385_p4 = por %p8384_p13, %p8383_p5 }
  0xa3   : > { %p8386_p8 = pnand %p8385_p4, %p8379_p9 }
  0xa5   : > { %8389 = shalt.err (!%p8386_p8)
}
  0xa6   : > { %s8390_s20 = scalar_lea.vmem %s9159_s29, 3072  ;;  %s8780_s24 = smov [#allocation16]  }
  0xa7   : > { %p8391_p1 = scmp.ne.s32.totalorder %s9159_s29, %s8390_s20  ;;  %s8395_s0 = sshll.u32 %s8780_s24, 4  ;;  %s8396_s0 = int_to_ptr.vmem [resolvable:$false] %s8395_s0 }
  0xa8   : > { %s8397_s2 = scalar_lea.vmem %s8396_s0, 6144  ;;  %p8398_p2 = scmp.lt.s32.totalorder %s9159_s29, %s8396_s0 }
  0xa9   : > { %p8393_p12 = pnand %p8391_p1, %p9106_p7  ;;  %p8399_p0 = scmp.lt.s32.totalorder %s8397_s2, %s8390_s20 }
  0xab   : > { %p8394_p3 = pneg %p8393_p12  ;;  %p8400_p10 = por %p8399_p0, %p8398_p2 }
  0xad   : > { %p8401_p11 = pnand %p8400_p10, %p8394_p3 }
  0xaf   : > { %8404 = shalt.err (!%p8401_p11)
}
  0xb0   : > { %s8781_s1 = smov 192   ;;  %s8782_s9 = smov 12  }
  0xb1   : > { %7483 = dma.hbm_to_vmem [thread:$0]  (!%p11268_p6), %s9164_s4, 3072, %s9159_s29, %s9064_s26, %s8781_s1, %s8781_s1, %s8782_s9  }
  0xb2   : > { %p6214_p9 = scmp.ge.s32.totalorder %s8773_s7, 1  ;;  %p625_p5 = scmp.lt.s32.totalorder %s8773_s7, 5 }
  0xb3   : > { %s8783_s3 = smov [#allocation6]   ;;  %s7408_s27 = smul.u32 3, %s9061_s16 }
  0xb4   : > { %p9190_p13 = pnand %p6214_p9, %p625_p5  ;;  %s637_s28 = sshll.u32 %s8783_s3, 4  ;;  %s9194_s28 = int_to_ptr.vmem [resolvable:$true] %s637_s28 }
  0xb5   : > { %s7409_s23 = smul.u32 48, %s8765_s6  ;;  %p11271_p8 = scmp.ne.s32.totalorder %s11251_s22, 0 }
  0xb6   : > { %s11270_s18 = scalar_select %p9190_p13, 1, 0 }
  0xb7   : > { %p7452_p4 = pneg %p9190_p13  ;;  %s11273_s12 = sld [smem:[#allocation77_spill]] }
  0xb8   : > { %s819_s0 = scalar_lea.vmem [#allocation17], %s7408_s27  ;;  %s11274_s3 = sld [smem:[#allocation67_spill]] }
  0xb9   : > { %p9202_p1 = pnand %p7452_p4, %p11271_p8  ;;  %s827_s2 = sshll.u32 %s819_s0, 4  ;;  %s9211_s2 = int_to_ptr.vmem [resolvable:$true] %s827_s2 }
  0xbb   : > { %s11272_s20 = scalar_select %p9202_p1, 1, 0 }
  0xbc   : > { %p9221_p3 = pneg %p9202_p1 }
  0xbd   : > { %s9209_s24 = scalar_lea.hbm %s11273_s12, %s7409_s23 }
  0xbe   : > { %s8405_s10 = scalar_lea.hbm %s11274_s3, 1024 }
  0xbf   : > { %p8406_p12 = scmp.ne.s32.totalorder %s11274_s3, %s8405_s10  ;;  %p8412_p10 = scmp.lt.u32.totalorder %s8405_s10, %s11274_s3 }
  0xc0   : > { %s11275_s30 = scalar_select %p9221_p3, 1, 0 }
  0xc1   : > { %p8408_p2 = pnand %p9221_p3, %p8406_p12 }
  0xc3   : > { %p8409_p0 = pneg %p8408_p2 }
  0xc5   : > { %p8414_p11 = pnand %p8412_p10, %p8409_p0 }
  0xc7   : > { %8417 = shalt.err (!%p8414_p11)
}
  0xc8   : > { %s8418_s11 = scalar_lea.vmem %s9194_s28, 1024  ;;  %p8426_p8 = scmp.lt.s32.totalorder %s9194_s28, %s9194_s28 }
  0xc9   : > { %p8419_p9 = scmp.ne.s32.totalorder %s9194_s28, %s8418_s11  ;;  %p8427_p13 = scmp.lt.s32.totalorder %s8418_s11, %s8418_s11 }
  0xcb   : > { %p8421_p5 = pnand %p8419_p9, %p9221_p3  ;;  %p8428_p12 = por %p8427_p13, %p8426_p8 }
  0xcd   : > { %p8422_p4 = pneg %p8421_p5 }
  0xcf   : > { %p8429_p2 = pnand %p8428_p12, %p8422_p4 }
  0xd1   : > { %8432 = shalt.err (!%p8429_p2)
}
  0xd2   : > { %s11172_s21 = smov 128   ;;  %s11174_s10 = smov 8  }
  0xd3   : > { %7455 = dma.hbm_to_vmem [thread:$0]  (!%p9202_p1), %s11274_s3, 1024, %s9194_s28, [#allocation7], %s11172_s21, %s11172_s21, %s11174_s10  }
  0xd4   : > { %s8433_s0 = scalar_lea.hbm %s9209_s24, 48  ;;  %s8438_s27 = scalar_lea.hbm %s11273_s12, 96 }
  0xd5   : > { %p8434_p13 = scmp.ne.s32.totalorder %s9209_s24, %s8433_s0  ;;  %p8439_p11 = scmp.lt.u32.totalorder %s9209_s24, %s11273_s12 }
  0xd6   : > { %p8440_p9 = scmp.lt.u32.totalorder %s8438_s27, %s8433_s0  ;;  %p8442_p4 = scmp.lt.u32.totalorder %s8433_s0, %s9209_s24 }
  0xd7   : > { %p8436_p0 = pnand %p8434_p13, %p9106_p7 }
  0xd8   : > { %p8441_p5 = por %p8440_p9, %p8439_p11 }
  0xd9   : > { %p8437_p10 = pneg %p8436_p0 }
  0xda   : > { %p8443_p8 = por %p8442_p4, %p8441_p5 }
  0xdc   : > { %p8444_p12 = pnand %p8443_p8, %p8437_p10 }
  0xde   : > { %8447 = shalt.err (!%p8444_p12)
}
  0xdf   : > { %s8448_s28 = scalar_lea.vmem %s9211_s2, 48  ;;  %s8786_s29 = smov [#allocation17]  }
  0xe0   : > { %p8449_p2 = scmp.ne.s32.totalorder %s9211_s2, %s8448_s28  ;;  %s8453_s4 = sshll.u32 %s8786_s29, 4  ;;  %s8454_s4 = int_to_ptr.vmem [resolvable:$false] %s8453_s4 }
  0xe1   : > { %s8455_s1 = scalar_lea.vmem %s8454_s4, 96  ;;  %p8456_p1 = scmp.lt.s32.totalorder %s9211_s2, %s8454_s4 }
  0xe2   : > { %p8451_p13 = pnand %p8449_p2, %p9106_p7  ;;  %p8457_p3 = scmp.lt.s32.totalorder %s8455_s1, %s8448_s28 }
  0xe4   : > { %p8452_p0 = pneg %p8451_p13  ;;  %p8458_p11 = por %p8457_p3, %p8456_p1 }
  0xe6   : > { %p8459_p9 = pnand %p8458_p11, %p8452_p0 }
  0xe8   : > { %8462 = shalt.err (!%p8459_p9)
}
  0xe9   : > { %7486 = dma.hbm_to_vmem [thread:$0]  (!%p11268_p6), %s9209_s24, 48, %s9211_s2, %s9064_s26  }
  0xea   : > { %s8787_s0 = smov [#allocation8]   ;;  %s8788_s27 = smov [#allocation9]  }
  0xeb   : > { %s650_s9 = sshll.u32 %s8787_s0, 4  ;;  %s670_s23 = sshll.u32 %s8788_s27, 4  ;;  %s651_s9 = int_to_ptr.vmem [resolvable:$true] %s650_s9  ;;  %s671_s23 = int_to_ptr.vmem [resolvable:$true] %s670_s23 }
  0xec   : > { %s11276_s21 = sld [smem:[#allocation68_spill]]  ;;  %p11277_p3 = scmp.ne.s32.totalorder %s11275_s30, 0 }
  0xf2   : > { %s8463_s4 = scalar_lea.hbm %s11276_s21, 4096 }
  0xf3   : > { %p8464_p1 = scmp.ne.s32.totalorder %s11276_s21, %s8463_s4  ;;  %p8470_p4 = scmp.lt.u32.totalorder %s8463_s4, %s11276_s21 }
  0xf5   : > { %p8466_p10 = pnand %p8464_p1, %p11277_p3 }
  0xf7   : > { %p8467_p5 = pneg %p8466_p10 }
  0xf9   : > { %p8472_p8 = pnand %p8470_p4, %p8467_p5 }
  0xfb   : > { %8475 = shalt.err (!%p8472_p8)
}
  0xfc   : > { %s8476_s24 = scalar_lea.vmem %s651_s9, 4096  ;;  %p8484_p0 = scmp.lt.s32.totalorder %s651_s9, %s651_s9 }
  0xfd   : > { %p8477_p12 = scmp.ne.s32.totalorder %s651_s9, %s8476_s24  ;;  %p8485_p11 = scmp.lt.s32.totalorder %s8476_s24, %s8476_s24 }
  0xff   : > { %p8479_p2 = pnand %p8477_p12, %p11277_p3  ;;  %p8486_p9 = por %p8485_p11, %p8484_p0 }
 0x101   : > { %p8480_p13 = pneg %p8479_p2 }
 0x103   : > { %p8487_p6 = pnand %p8486_p9, %p8480_p13 }
 0x105   : > { %8490 = shalt.err (!%p8487_p6)
}
 0x106   : > { %p11278_p1 = scmp.ne.s32.totalorder %s11272_s20, 0  ;;  %s11279_s2 = smov 8  }
 0x107   : > { %s11280_s0 = smov 128   ;;  %s11185_s27 = sshll.u32 %s9061_s16, 8 }
 0x108   : > { %7458 = dma.hbm_to_vmem [thread:$0]  (!%p11278_p1), %s11276_s21, 4096, %s651_s9, [#allocation7], %s11280_s0, %s11280_s0, %s11279_s2  }
 0x109   : > { %s11281_s4 = sld [smem:[#allocation71_spill]] }
 0x10f   : > { %s11282_s28 = smov %s11281_s4  ;;  %s8491_s1 = scalar_lea.hbm %s11281_s4, 16 }
 0x110   : > { %p8492_p6 = scmp.ne.s32.totalorder %s11282_s28, %s8491_s1  ;;  %p8498_p4 = scmp.lt.u32.totalorder %s8491_s1, %s11282_s28 }
 0x112   : > { %p8494_p10 = pnand %p8492_p6, %p11277_p3 }
 0x114   : > { %p8495_p5 = pneg %p8494_p10 }
 0x116   : > { %p8500_p8 = pnand %p8498_p4, %p8495_p5 }
 0x118   : > { %8503 = shalt.err (!%p8500_p8)
}
 0x119   : > { %s8504_s9 = scalar_lea.vmem %s671_s23, 16  ;;  %s8511_s3 = scalar_lea.vmem %s671_s23, 32 }
 0x11a   : > { %p8505_p12 = scmp.ne.s32.totalorder %s671_s23, %s8504_s9  ;;  %p8512_p0 = scmp.lt.s32.totalorder %s671_s23, %s671_s23 }
 0x11b   : > { %p8513_p11 = scmp.lt.s32.totalorder %s8511_s3, %s8504_s9 }
 0x11c   : > { %p8507_p2 = pnand %p8505_p12, %p11277_p3 }
 0x11d   : > { %p8514_p9 = por %p8513_p11, %p8512_p0 }
 0x11e   : > { %p8508_p13 = pneg %p8507_p2 }
 0x120   : > { %p8515_p7 = pnand %p8514_p9, %p8508_p13 }
 0x122   : > { %8518 = shalt.err (!%p8515_p7)
}
 0x123   : > { %7461 = dma.hbm_to_vmem [thread:$0]  (!%p11278_p1), %s11282_s28, 16, %s671_s23, [#allocation10]  }
 0x124   : > { %s11186_s22 = sshll.u32 %s8765_s6, 12  ;;  %s11283_s15 = sld [smem:[#allocation80_spill]] }
 0x125   : > { %s852_s4 = scalar_lea.vmem [#allocation18], %s11185_s27  ;;  %p11284_p6 = scmp.ne.s32.totalorder %s11266_s13, 0 }
 0x126   : > { %s859_s1 = sshll.u32 %s852_s4, 4  ;;  %s9317_s1 = int_to_ptr.vmem [resolvable:$true] %s859_s1 }
 0x12a   : > { %s9313_s29 = scalar_lea.hbm %s11283_s15, %s11186_s22  ;;  %s8524_s3 = scalar_lea.hbm %s11283_s15, 8192 }
 0x12b   : > { %s8519_s24 = scalar_lea.hbm %s9313_s29, 4096  ;;  %p8525_p4 = scmp.lt.u32.totalorder %s9313_s29, %s11283_s15 }
 0x12c   : > { %p8520_p7 = scmp.ne.s32.totalorder %s9313_s29, %s8519_s24  ;;  %p8526_p8 = scmp.lt.u32.totalorder %s8524_s3, %s8519_s24 }
 0x12d   : > { %p8528_p2 = scmp.lt.u32.totalorder %s8519_s24, %s9313_s29 }
 0x12e   : > { %p8522_p10 = pnand %p8520_p7, %p11284_p6  ;;  %p8527_p12 = por %p8526_p8, %p8525_p4 }
 0x130   : > { %p8523_p5 = pneg %p8522_p10  ;;  %p8529_p13 = por %p8528_p2, %p8527_p12 }
 0x132   : > { %p8530_p0 = pnand %p8529_p13, %p8523_p5 }
 0x134   : > { %8533 = shalt.err (!%p8530_p0)
}
 0x135   : > { %s8534_s25 = scalar_lea.vmem %s9317_s1, 4096  ;;  %s8789_s11 = smov [#allocation18]  }
 0x136   : > { %p8535_p11 = scmp.ne.s32.totalorder %s9317_s1, %s8534_s25  ;;  %s8539_s4 = sshll.u32 %s8789_s11, 4  ;;  %s8540_s4 = int_to_ptr.vmem [resolvable:$false] %s8539_s4 }
 0x137   : > { %s8541_s23 = scalar_lea.vmem %s8540_s4, 8192  ;;  %p8542_p10 = scmp.lt.s32.totalorder %s9317_s1, %s8540_s4 }
 0x138   : > { %p8537_p9 = pnand %p8535_p11, %p11284_p6  ;;  %p8543_p1 = scmp.lt.s32.totalorder %s8541_s23, %s8534_s25 }
 0x13a   : > { %p8538_p7 = pneg %p8537_p9  ;;  %p8544_p4 = por %p8543_p1, %p8542_p10 }
 0x13c   : > { %p8545_p8 = pnand %p8544_p4, %p8538_p7 }
 0x13e   : > { %8548 = shalt.err (!%p8545_p8)
}
 0x13f   : > { %s8790_s24 = smov 256   ;;  %s8791_s9 = smov 16  }
 0x140   : > { %p11285_p5 = scmp.ne.s32.totalorder %s11264_s14, 0  ;;  %s8792_s3 = smov [#allocation11]  }
 0x141   : > { %s680_s12 = sshll.u32 %s8792_s3, 4  ;;  %s11286_s27 = sld [smem:[#allocation72_spill]]  ;;  %s681_s12 = int_to_ptr.vmem [resolvable:$true] %s680_s12 }
 0x142   : > { %7489 = dma.hbm_to_vmem [thread:$0]  (!%p11285_p5), %s9313_s29, 4096, %s9317_s1, %s9064_s26, %s8790_s24, %s8790_s24, %s8791_s9  }
 0x147   : > { %s11287_s22 = smov %s11286_s27  ;;  %s8549_s4 = scalar_lea.hbm %s11286_s27, 128 }
 0x148   : > { %p8550_p1 = scmp.ne.s32.totalorder %s11287_s22, %s8549_s4  ;;  %p8556_p13 = scmp.lt.u32.totalorder %s8549_s4, %s11287_s22 }
 0x14a   : > { %p8552_p12 = pnand %p8550_p1, %p11277_p3 }
 0x14c   : > { %p8553_p2 = pneg %p8552_p12 }
 0x14e   : > { %p8558_p0 = pnand %p8556_p13, %p8553_p2 }
 0x150   : > { %8561 = shalt.err (!%p8558_p0)
}
 0x151   : > { %s8562_s29 = scalar_lea.vmem %s681_s12, 128  ;;  %p8570_p10 = scmp.lt.s32.totalorder %s681_s12, %s681_s12 }
 0x152   : > { %p8563_p11 = scmp.ne.s32.totalorder %s681_s12, %s8562_s29  ;;  %p8571_p4 = scmp.lt.s32.totalorder %s8562_s29, %s8562_s29 }
 0x154   : > { %p8565_p9 = pnand %p8563_p11, %p11277_p3  ;;  %p8572_p8 = por %p8571_p4, %p8570_p10 }
 0x156   : > { %p8566_p7 = pneg %p8565_p9 }
 0x158   : > { %p8573_p5 = pnand %p8572_p8, %p8566_p7 }
 0x15a   : > { %8576 = shalt.err (!%p8573_p5)
}
 0x15b   : > { %s8793_s27 = smov 64   ;;  %s8794_s1 = smov 4  }
 0x15c   : > { %p11288_p1 = scmp.ne.s32.totalorder %s11272_s20, 0  ;;  %s8795_s24 = smov [#allocation12]  }
 0x15d   : > { %s694_s9 = sshll.u32 %s8795_s24, 4  ;;  %s8796_s3 = smov [#allocation20]   ;;  %s695_s9 = int_to_ptr.vmem [resolvable:$true] %s694_s9 }
 0x15e   : > { %7464 = dma.hbm_to_vmem [thread:$0]  (!%p11288_p1), %s11287_s22, 128, %s681_s12, [#allocation10], %s8793_s27, %s8793_s27, %s8794_s1  }
 0x15f   : > { %s704_s10 = sshll.u32 %s8796_s3, 4  ;;  %s11289_s8 = sld [smem:[#allocation73_spill]]  ;;  %s9362_s10 = int_to_ptr.vmem [resolvable:$true] %s704_s10 }
 0x165   : > { %s8577_s25 = scalar_lea.hbm %s11289_s8, 16 }
 0x166   : > { %p8578_p5 = scmp.ne.s32.totalorder %s11289_s8, %s8577_s25  ;;  %p8584_p13 = scmp.lt.u32.totalorder %s8577_s25, %s11289_s8 }
 0x168   : > { %p8580_p12 = pnand %p8578_p5, %p11277_p3 }
 0x16a   : > { %p8581_p2 = pneg %p8580_p12 }
 0x16c   : > { %p8586_p0 = pnand %p8584_p13, %p8581_p2 }
 0x16e   : > { %8589 = shalt.err (!%p8586_p0)
}
 0x16f   : > { %s8590_s21 = scalar_lea.vmem %s695_s9, 16  ;;  %s8597_s24 = scalar_lea.vmem %s695_s9, 32 }
 0x170   : > { %p8591_p11 = scmp.ne.s32.totalorder %s695_s9, %s8590_s21  ;;  %p8598_p10 = scmp.lt.s32.totalorder %s695_s9, %s695_s9 }
 0x171   : > { %p8599_p4 = scmp.lt.s32.totalorder %s8597_s24, %s8590_s21 }
 0x172   : > { %p8593_p9 = pnand %p8591_p11, %p11277_p3 }
 0x173   : > { %p8600_p8 = por %p8599_p4, %p8598_p10 }
 0x174   : > { %p8594_p7 = pneg %p8593_p9 }
 0x176   : > { %p8601_p6 = pnand %p8600_p8, %p8594_p7 }
 0x178   : > { %8604 = shalt.err (!%p8601_p6)
}
 0x179   : > { %7467 = dma.hbm_to_vmem [thread:$0]  (!%p11288_p1), %s11289_s8, 16, %s695_s9, [#allocation13]  }
 0x17a   : > { %s11290_s19 = sld [smem:[#allocation84_spill]] }
 0x180   : > { %s8605_s23 = scalar_lea.hbm %s11290_s19, 2048 }
 0x181   : > { %p8606_p5 = scmp.ne.s32.totalorder %s11290_s19, %s8605_s23  ;;  %p8612_p6 = scmp.lt.u32.totalorder %s8605_s23, %s11290_s19 }
 0x183   : > { %p8608_p12 = pnand %p8606_p5, %p11277_p3 }
 0x185   : > { %p8609_p2 = pneg %p8608_p12 }
 0x187   : > { %p8614_p13 = pnand %p8612_p6, %p8609_p2 }
 0x189   : > { %8617 = shalt.err (!%p8614_p13)
}
 0x18a   : > { %s8618_s9 = scalar_lea.vmem %s9362_s10, 2048  ;;  %p8626_p7 = scmp.lt.s32.totalorder %s9362_s10, %s9362_s10 }
 0x18b   : > { %p8619_p0 = scmp.ne.s32.totalorder %s9362_s10, %s8618_s9  ;;  %p8627_p10 = scmp.lt.s32.totalorder %s8618_s9, %s8618_s9 }
 0x18d   : > { %p8621_p11 = pnand %p8619_p0, %p11277_p3  ;;  %p8628_p4 = por %p8627_p10, %p8626_p7 }
 0x18f   : > { %p8622_p9 = pneg %p8621_p11 }
 0x191   : > { %p8629_p8 = pnand %p8628_p4, %p8622_p9 }
 0x193   : > { %8632 = shalt.err (!%p8629_p8)
}
 0x194   : > { %7470 = dma.hbm_to_vmem [thread:$0]  (!%p11288_p1), %s11290_s19, 2048, %s9362_s10, [#allocation7], %s11280_s0, %s11280_s0, %s11279_s2  }
 0x195   : > { %s11291_s30 = sshll.u32 %s8765_s6, 12  ;;  %s11292_s17 = sld [smem:[#allocation82_spill]] }
 0x196   : > { %s11293_s23 = sshll.u32 %s9061_s16, 8  ;;  %p11294_p5 = scmp.ne.s32.totalorder %s11266_s13, 0 }
 0x197   : > { %s880_s20 = scalar_lea.vmem [#allocation19], %s11293_s23 }
 0x198   : > { %s887_s29 = sshll.u32 %s880_s20, 4  ;;  %s9417_s29 = int_to_ptr.vmem [resolvable:$true] %s887_s29 }
 0x19b   : > { %s9413_s25 = scalar_lea.hbm %s11292_s17, %s11291_s30  ;;  %s8638_s10 = scalar_lea.hbm %s11292_s17, 8192 }
 0x19c   : > { %s8633_s15 = scalar_lea.hbm %s9413_s25, 4096  ;;  %p8639_p2 = scmp.lt.u32.totalorder %s9413_s25, %s11292_s17 }
 0x19d   : > { %p8634_p3 = scmp.ne.s32.totalorder %s9413_s25, %s8633_s15  ;;  %p8640_p6 = scmp.lt.u32.totalorder %s8638_s10, %s8633_s15 }
 0x19e   : > { %p8642_p0 = scmp.lt.u32.totalorder %s8633_s15, %s9413_s25 }
 0x19f   : > { %p8636_p12 = pnand %p8634_p3, %p11294_p5  ;;  %p8641_p13 = por %p8640_p6, %p8639_p2 }
 0x1a1   : > { %p8637_p1 = pneg %p8636_p12  ;;  %p8643_p11 = por %p8642_p0, %p8641_p13 }
 0x1a3   : > { %p8644_p9 = pnand %p8643_p11, %p8637_p1 }
 0x1a5   : > { %8647 = shalt.err (!%p8644_p9)
}
 0x1a6   : > { %s8648_s16 = scalar_lea.vmem %s9417_s29, 4096  ;;  %s8797_s9 = smov [#allocation19]  }
 0x1a7   : > { %p8649_p7 = scmp.ne.s32.totalorder %s9417_s29, %s8648_s16  ;;  %s8653_s24 = sshll.u32 %s8797_s9, 4  ;;  %s8654_s24 = int_to_ptr.vmem [resolvable:$false] %s8653_s24 }
 0x1a8   : > { %s8655_s3 = scalar_lea.vmem %s8654_s24, 8192  ;;  %p8656_p8 = scmp.lt.s32.totalorder %s9417_s29, %s8654_s24 }
 0x1a9   : > { %p8651_p10 = pnand %p8649_p7, %p11294_p5  ;;  %p8657_p3 = scmp.lt.s32.totalorder %s8655_s3, %s8648_s16 }
 0x1ab   : > { %p8652_p4 = pneg %p8651_p10  ;;  %p8658_p12 = por %p8657_p3, %p8656_p8 }
 0x1ad   : > { %p8659_p2 = pnand %p8658_p12, %p8652_p4 }
 0x1af   : > { %8662 = shalt.err (!%p8659_p2)
}
 0x1b0   : > { %p11295_p1 = scmp.ne.s32.totalorder %s11264_s14, 0  ;;  %p11296_p5 = scmp.ne.s32.totalorder %s11270_s18, 0 }
 0x1b2   : > { %7492 = dma.hbm_to_vmem [thread:$0]  (!%p11295_p1), %s9413_s25, 4096, %s9417_s29, %s9064_s26, %s8793_s27, %s8793_s27, %s8794_s1  }
 0x1b3   : > { %905 = sbr.rel (%p11296_p5) target bundleno = 5893 (0x1705), region = 112 }
 0x1ba   : > { %s11297_s13 = sadd.s32 4294967295, %s8773_s7   ;;  %s11298_s30 = sld [smem:[#allocation39_spill]] }
 0x1bb   : > { %s907_s11 = sand.u32 1, %s11297_s13   ;;  %s909_s4 = sand.u32 1, %s8749_s5  }
 0x1bc   : > { %s9449_s23 = sshll.u32 %s909_s4, 1  ;;  %s908_s14 = scalar_lea.sflag [#allocation5], %s907_s11 }
 0x1c0   : > { %p11299_p6 = scmp.ne.s32.totalorder %s11298_s30, 0 }
 0x1c2   : > { %8708 = dma.done.wait (%p11299_p6), %s908_s14, 32  }
 0x1c3   : > { %8710 = vsyncadd (%p11299_p6), %s908_s14, 4294967264  ;;  %s11300_s26 = sld [smem:[#allocation37_spill]] }
 0x1c9   : > { %p11301_p13 = scmp.ne.s32.totalorder %s11300_s26, 0 }
 0x1cb   : > { %8712 = dma.done.wait (%p11301_p13), [#allocation7], 5120  }
 0x1cc   : > { %8714 = vsyncadd (%p11301_p13), [#allocation7], 4294962176 }
 0x1cd   : > { %8716 = dma.done.wait (%p11301_p13), [#allocation10], 144  }
 0x1ce   : > { %8718 = vsyncadd (%p11301_p13), [#allocation10], 4294967152 }
 0x1cf   : > { %8720 = dma.done.wait (%p11301_p13), [#allocation13], 16  }
 0x1d0   : > { %8722 = vsyncadd (%p11301_p13), [#allocation13], 4294967280  ;;  %s11302_s18 = sld [smem:[#allocation27_spill]]  ;;  %s11303_s27 = sld [smem:[#allocation42_spill]] }
 0x1d6   : > { %s938_s1 = sand.u32 1, %s11302_s18   ;;  %p11304_p0 = scmp.ne.s32.totalorder %s11303_s27, 0 }
 0x1d7   : > { %s7410_s25 = smul.u32 384, %s938_s1 }
 0x1d9   : > { %s9469_s29 = scalar_lea.vmem [#allocation14], %s7410_s25 }
 0x1da   : > { %8724 = dma.done.wait (%p11304_p0), %s908_s14, 17552  }
 0x1db   : > { %8726 = vsyncadd (%p11304_p0), %s908_s14, 4294949744  ;;  %s7411_s15 = smul.u32 6, %s938_s1  ;;  %s6242_s2 = sshll.u32 %s938_s1, 8 }
 0x1dc   : > { %s7412_s0 = smul.u32 192, %s938_s1  ;;  %s9481_s9 = scalar_lea.vmem [#allocation18], %s6242_s2 }
 0x1dd   : > { %s7413_s10 = smul.u32 3, %s938_s1  ;;  %s9475_s12 = scalar_lea.vmem [#allocation15], %s7411_s15 }
 0x1de   : > { %s9477_s21 = scalar_lea.vmem [#allocation16], %s7412_s0  ;;  %s9483_s24 = scalar_lea.vmem [#allocation19], %s6242_s2 }
 0x1df   : > { %s9479_s16 = scalar_lea.vmem [#allocation17], %s7413_s10  ;;  %11305 = sst [smem:[#allocation43_spill]] %s9483_s24 }
 0x1e0   : > { %8728 = dma.done.wait (%p11301_p13), [#allocation7], 2048  }
 0x1e1   : > { %8730 = vsyncadd (%p11301_p13), [#allocation7], 4294965248  ;;  %s11306_s3 = sld [smem:[#allocation32_spill]]  ;;  %s11307_s13 = sld [smem:[#allocation31_spill]] }
 0x1e2   : > { %s11308_s18 = sld [smem:[#allocation66_spill]]  ;;  %s11309_s15 = sld [smem:[#allocation78_spill]] }
 0x1e3   : > { %s11310_s20 = sld [smem:[#allocation79_spill]]  ;;  %s11311_s28 = sld [smem:[#allocation83_spill]] }
 0x1e4   : > { %s11312_s4 = sld [smem:[#allocation81_spill]]  ;;  %s11313_s24 = sld [smem:[#allocation88_spill]] }
 0x1e7   : > { %p1102_p11 = scmp.lt.s32.totalorder %s11306_s3, 1  ;;  %p1107_p9 = scmp.lt.s32.totalorder %s11307_s13, 1 }
 0x1e8   : > { %p6252_p7 = scmp.ne.s32.totalorder %s11307_s13, 0 }
 0x1e9   : > { %s11394_s3 = smov (!%p1102_p11, %s11306_s3), 1  ;;  %v1149_v0 = vld [vmem:[#allocation8 + $0x80] sm:$0xff] (!%p6252_p7)  ;;  %v1150_v1 = vld [vmem:[#allocation8 + $0x88] sm:$0xff] (!%p6252_p7)  ;;  %v1166_v3 = vlaneseq (!%p6252_p7)  ;;  %v1151_v6 = vld [vmem:[#allocation8 + $0x90] sm:$0xff] (!%p6252_p7)  ;;  %s11315_s6 = sld [smem:[#allocation70_spill]] (!%p6252_p7)  ;;  %v8798_v60 = vmov (!%p6252_p7), 0.0|0.0  }
 0x1ea   : > { %s9493_s30 = scalar_select %p1107_p9, %s11307_s13, 1 }
 0x1eb   : > { %s6535_s11 = sshll.u32 %s11394_s3, 6  ;;  %1131 = sbr.rel (%p6252_p7) target bundleno = 1000 (0x3e8), region = 168  ;;  %v1133_v2 = vld [vmem:[#allocation8] sm:$0xff] (!%p6252_p7)  ;;  %v7184_v4 = vpack.c.bf16 (!%p6252_p7), %v1150_v1, %v1149_v0  ;;  %v1134_v5 = vld [vmem:[#allocation8 + $0x8] sm:$0xff] (!%p6252_p7)  ;;  %v1152_v7 = vld [vmem:[#allocation8 + $0x98] sm:$0xff] (!%p6252_p7)  ;;  %v1167_v14 = vshrl.u32 (!%p6252_p7), %v1166_v3, 7  ;;  %7216 = vmatprep.subr.bf16.mxu1 (!%p6252_p7), %v8798_v60 }
 0x1ec   : > { %s9498_s27 = scalar_lea.vmem %s11308_s18, %s6535_s11  ;;  %s6536_s26 = sshll.u32 %s9493_s30, 6  ;;  %v7186_v8 = vpack.c.bf16 (!%p6252_p7), %v1134_v5, %v1133_v2  ;;  %v7188_v9 = vpack.c.bf16 (!%p6252_p7), %v1152_v7, %v1151_v6  ;;  %v1135_v10 = vld [vmem:[#allocation8 + $0x10] sm:$0xff] (!%p6252_p7)  ;;  %v1136_v11 = vld [vmem:[#allocation8 + $0x18] sm:$0xff] (!%p6252_p7)  ;;  %v1153_v12 = vld [vmem:[#allocation8 + $0xa0] sm:$0xff] (!%p6252_p7)  ;;  %vm8799_vm0 = vmmov (!%p6252_p7), 0   ;;  %vm1376_vm1 = vcmask (!%p6252_p7), 130048  }
 0x1ed   : > { %s9504_s2 = scalar_lea.vmem %s11309_s15, %s6536_s26  ;;  %s1114_s8 = scalar_lea.vmem %s11310_s20, %s9493_s30  ;;  %7185 = vmatprep.subr.bf16.mxu0 (!%p6252_p7), %v7184_v4  ;;  %v1154_v13 = vld [vmem:[#allocation8 + $0xa8] sm:$0xff] (!%p6252_p7)  ;;  %v7190_v15 = vpack.c.bf16 (!%p6252_p7), %v1136_v11, %v1135_v10  ;;  %v1137_v17 = vld [vmem:[#allocation8 + $0x20] sm:$0xff] (!%p6252_p7)  ;;  %v1155_v19 = vld [vmem:[#allocation8 + $0xb0] sm:$0xff] (!%p6252_p7)  ;;  %v1172_v21 = vsub.s32 (!%p6252_p7), 1, %v1167_v14  ;;  %v1168_v49 = vsub.s32 (!%p6252_p7), 0, %v1167_v14  ;;  %v8800_v14 = vmov (!%p6252_p7), 0.0  }
 0x1ee   : > { %s6249_s17 = sshll.u32 %s9493_s30, 2  ;;  %s1121_s3 = scalar_lea.vmem %s11311_s28, %s9493_s30  ;;  %7187 = vmatpush3.bf16.msra.mxu0 (!%p6252_p7), %v7186_v8  ;;  %v7192_v16 = vpack.c.bf16 (!%p6252_p7), %v1154_v13, %v1153_v12  ;;  %v1138_v18 = vld [vmem:[#allocation8 + $0x28] sm:$0xff] (!%p6252_p7)  ;;  %v1156_v20 = vld [vmem:[#allocation8 + $0xb8] sm:$0xff] (!%p6252_p7)  ;;  %v1139_v24 = vld [vmem:[#allocation8 + $0x30] sm:$0xff] (!%p6252_p7)  ;;  %6874 = vmatprep.mubr.msk.bf16.mxu1 (!%p6252_p7), %vm8799_vm0, %v8800_v14 }
 0x1ef   : > { %s9518_s14 = scalar_lea.vmem %s11312_s4, %s6249_s17  ;;  %s9523_s1 = scalar_lea.vmem %s11313_s24, %s6535_s11  ;;  %7189 = vmatprep.subr.bf16.mxu0 (!%p6252_p7), %v7188_v9  ;;  %v7194_v22 = vpack.c.bf16 (!%p6252_p7), %v1138_v18, %v1137_v17  ;;  %v7196_v23 = vpack.c.bf16 (!%p6252_p7), %v1156_v20, %v1155_v19  ;;  %v1140_v25 = vld [vmem:[#allocation8 + $0x38] sm:$0xff] (!%p6252_p7)  ;;  %v1157_v26 = vld [vmem:[#allocation8 + $0xc0] sm:$0xff] (!%p6252_p7)  ;;  %v1158_v27 = vld [vmem:[#allocation8 + $0xc8] sm:$0xff] (!%p6252_p7) }
 0x1f0   : > { %s11314_s17 = scalar_lea.vmem (!%p6252_p7), [#allocation4], %s9449_s23  ;;  %v7198_v30 = vpack.c.bf16 (!%p6252_p7), %v1140_v25, %v1139_v24  ;;  %v7200_v31 = vpack.c.bf16 (!%p6252_p7), %v1158_v27, %v1157_v26  ;;  %v1141_v32 = vld [vmem:[#allocation8 + $0x40] sm:$0xff] (!%p6252_p7)  ;;  %v1142_v33 = vld [vmem:[#allocation8 + $0x48] sm:$0xff] (!%p6252_p7)  ;;  %v1159_v35 = vld [vmem:[#allocation8 + $0xd0] sm:$0xff] (!%p6252_p7)  ;;  %s11316_s28 = smov (!%p6252_p7), %s11315_s6 }
 0x1f1   : > { %v1132_v28 = vld [vmem:[%s11314_s17] sm:$0x3] (!%p6252_p7)  ;;  %v7202_v37 = vpack.c.bf16 (!%p6252_p7), %v1142_v33, %v1141_v32  ;;  %v1143_v39 = vld [vmem:[#allocation8 + $0x50] sm:$0xff] (!%p6252_p7)  ;;  %v1161_v41 = vld [vmem:[#allocation8 + $0xe0] sm:$0xff] (!%p6252_p7)  ;;  %s11317_s17 = sld [smem:[#allocation69_spill]] (!%p6252_p7) }
 0x1f2   : > { %7191 = vmatpush3.bf16.msra.mxu0 %v7190_v15  ;;  %v1173_v29 = vrot.slane %v1132_v28, %v1172_v21  ;;  %v1160_v36 = vld [vmem:[#allocation8 + $0xd8] sm:$0xff]  ;;  %v1162_v42 = vld [vmem:[#allocation8 + $0xe8] sm:$0xff]  ;;  %v1145_v45 = vld [vmem:[#allocation8 + $0x60] sm:$0xff]  ;;  %v1169_v54 = vrot.slane %v1132_v28, %v1168_v49 }
 0x1f3   : > { %7193 = vmatprep.subr.bf16.mxu0 %v7192_v16  ;;  %v7204_v38 = vpack.c.bf16 %v1160_v36, %v1159_v35  ;;  %v1144_v40 = vld [vmem:[#allocation8 + $0x58] sm:$0xff]  ;;  %v7208_v44 = vpack.c.bf16 %v1162_v42, %v1161_v41  ;;  %v1146_v46 = vld [vmem:[#allocation8 + $0x68] sm:$0xff]  ;;  %v1163_v47 = vld [vmem:[#allocation8 + $0xf0] sm:$0xff] }
 0x1f4   : > { %v1177_v34 = vpack.c.bf16 %v1173_v29, %v1173_v29  ;;  %v7206_v43 = vpack.c.bf16 %v1144_v40, %v1143_v39  ;;  %v1164_v48 = vld [vmem:[#allocation8 + $0xf8] sm:$0xff]  ;;  %v7210_v50 = vpack.c.bf16 %v1146_v46, %v1145_v45  ;;  %v1147_v52 = vld [vmem:[#allocation8 + $0x70] sm:$0xff]  ;;  %v1176_v56 = vpack.c.bf16 %v1169_v54, %v1169_v54  ;;  %v1259_v58 = vld [vmem:[%s11316_s28 + $0x8] sm:$0xff] }
 0x1f5   : > { %v7212_v51 = vpack.c.bf16 %v1164_v48, %v1163_v47  ;;  %v1148_v53 = vld [vmem:[#allocation8 + $0x78] sm:$0xff]  ;;  %v1260_v61 = vld [vmem:[%s11316_s28 + $0x10] sm:$0xff]  ;;  %v1263_v1 = vld [vmem:[%s11316_s28 + $0x28] sm:$0xff] }
 0x1f6   : > { %7195 = vmatpush3.bf16.msra.mxu0 %v7194_v22  ;;  %1243 = vmatprep.mubr.bf16.mxu0 %v1177_v34  ;;  %v7214_v55 = vpack.c.bf16 %v1148_v53, %v1147_v52  ;;  %v1258_v57 = vld [vmem:[%s11315_s6] sm:$0xff]  ;;  %v1261_v62 = vld [vmem:[%s11316_s28 + $0x18] sm:$0xff]  ;;  %v1264_v3 = vld [vmem:[%s11316_s28 + $0x30] sm:$0xff] }
 0x1f7   : > { %7197 = vmatprep.subr.bf16.mxu0 %v7196_v23  ;;  %v7217_v59 = vpack.c.bf16 %v1259_v58, %v1258_v57  ;;  %v7220_v63 = vpack.c.bf16 %v1261_v62, %v1260_v61  ;;  %v1262_v0 = vld [vmem:[%s11316_s28 + $0x20] sm:$0xff]  ;;  %v1265_v4 = vld [vmem:[%s11316_s28 + $0x38] sm:$0xff]  ;;  %v1267_v7 = vld [vmem:[%s11316_s28 + $0x48] sm:$0xff] }
 0x1f8   : > { %v7223_v2 = vpack.c.bf16 %v1263_v1, %v1262_v0  ;;  %v7226_v5 = vpack.c.bf16 %v1265_v4, %v1264_v3  ;;  %v1266_v6 = vld [vmem:[%s11316_s28 + $0x40] sm:$0xff]  ;;  %v1268_v9 = vld [vmem:[%s11316_s28 + $0x50] sm:$0xff]  ;;  %v1269_v10 = vld [vmem:[%s11316_s28 + $0x58] sm:$0xff] }
 0x1f9   : > { %7218 = vmatpush3.bf16.msra.mxu1 %v7217_v59  ;;  %v7229_v8 = vpack.c.bf16 %v1267_v7, %v1266_v6  ;;  %v7232_v11 = vpack.c.bf16 %v1269_v10, %v1268_v9  ;;  %v1270_v12 = vld [vmem:[%s11316_s28 + $0x60] sm:$0xff]  ;;  %v1271_v13 = vld [vmem:[%s11316_s28 + $0x68] sm:$0xff]  ;;  %v1272_v17 = vld [vmem:[%s11316_s28 + $0x70] sm:$0xff] }
 0x1fa   : > { %7199 = vmatpush3.bf16.msra.mxu0 %v7198_v30  ;;  %7219 = vmatprep.subr.bf16.mxu1 %v8798_v60  ;;  %v7618_v15 = vld [vmem:[#allocation11] sm:$0xff]   ;;  %v7235_v16 = vpack.c.bf16 %v1271_v13, %v1270_v12  ;;  %v1273_v18 = vld [vmem:[%s11316_s28 + $0x78] sm:$0xff]  ;;  %v1351_v22 = vld [vmem:[%s9498_s27 + $0x10] sm:$0xff] }
 0x1fb   : > { %7201 = vmatprep.subr.bf16.mxu0 %v7200_v31  ;;  %v7238_v19 = vpack.c.bf16 %v1273_v18, %v1272_v17  ;;  %v1349_v20 = vld [vmem:[%s9498_s27] sm:$0xff]  ;;  %v1350_v21 = vld [vmem:[%s9498_s27 + $0x8] sm:$0xff]  ;;  %v1352_v24 = vld [vmem:[%s9498_s27 + $0x18] sm:$0xff] }
 0x1fc   : > { %v1359_v23 = vpack.c.bf16 %v1350_v21, %v1349_v20  ;;  %v1360_v25 = vpack.c.bf16 %v1352_v24, %v1351_v22  ;;  %v1178_v27 = vld [vmem:[%s11317_s17] sm:$0x1]  ;;  %v1355_v42 = vld [vmem:[%s9498_s27 + $0x30] sm:$0xff]  ;;  %v6254_v45 = vld [vmem:[#allocation12] ss:$0 sm:$0xff] }
 0x1fd   : > { %7221 = vmatpush3.bf16.msra.mxu1 %v7220_v63  ;;  %v1353_v36 = vld [vmem:[%s9498_s27 + $0x20] sm:$0xff]  ;;  %v1456_v47 = vld [vmem:[#allocation6 + $0x10] sm:$0xff]  ;;  %v1455_v57 = vld [vmem:[#allocation6 + $0x8] sm:$0xff] }
 0x1fe   : > { %7203 = vmatpush3.bf16.msra.mxu0 %v7202_v37  ;;  %7222 = vmatprep.subr.bf16.mxu1 %v8798_v60  ;;  %v1354_v37 = vld [vmem:[%s9498_s27 + $0x28] sm:$0xff]  ;;  %v1457_v53 = vld [vmem:[#allocation6 + $0x18] sm:$0xff]  ;;  %v1275_v62 = vld [vmem:[#allocation9] sm:$0x1] }
 0x1ff   : > { %7205 = vmatprep.subr.bf16.mxu0 %v7204_v38  ;;  %v1361_v40 = vpack.c.bf16 %v1354_v37, %v1353_v36 }
 0x201   : > { %7224 = vmatpush3.bf16.msra.mxu1 %v7223_v2 }
 0x202   : > { %7207 = vmatpush3.bf16.msra.mxu0 %v7206_v43  ;;  %7225 = vmatprep.subr.bf16.mxu1 %v8798_v60  ;;  %v1356_v43 = vld [vmem:[%s9498_s27 + $0x38] sm:$0xff] }
 0x203   : > { %7209 = vmatprep.subr.bf16.mxu0 %v7208_v44  ;;  %v1362_v44 = vpack.c.bf16 %v1356_v43, %v1355_v42 }
 0x205   : > { %7227 = vmatpush3.bf16.msra.mxu1 %v7226_v5  ;;  %v1460_v5 = vld [vmem:[#allocation6 + $0x30] sm:$0xff] }
 0x206   : > { %7211 = vmatpush3.bf16.msra.mxu0 %v7210_v50  ;;  %7228 = vmatprep.subr.bf16.mxu1 %v8798_v60  ;;  %v1454_v50 = vld [vmem:[#allocation6] sm:$0xff] }
 0x207   : > { %7213 = vmatprep.subr.bf16.mxu0 %v7212_v51 }
 0x209   : > { %7230 = vmatpush3.bf16.msra.mxu1 %v7229_v8  ;;  %v1458_v8 = vld [vmem:[#allocation6 + $0x20] sm:$0xff] }
 0x20a   : > { %7215 = vmatpush3.bf16.msra.mxu0 %v7214_v55  ;;  %7231 = vmatprep.subr.bf16.mxu1 %v8798_v60 }
 0x20b   : > { %6878 = vmatprep.subr.bf16.mxu0 %v7618_v15 }
 0x20d   : > { %1244 = vmatmul.mubr.bf16.vlgmr.msra.gmra.mrb[0].mxu0 %v1176_v56  ;;  %7233 = vmatpush3.bf16.msra.mxu1 %v7232_v11  ;;  %v1461_v11 = vld [vmem:[#allocation6 + $0x38] sm:$0xff] }
 0x20e   : > { %7234 = vmatprep.subr.bf16.mxu1 %v8798_v60  ;;  %6879 = vmatpush3.bf16.msra.mxu0 %v7618_v15 }
 0x20f   : > { %6880 = vmatprep.mubr.msk.bf16.mxu0 %vm1376_vm1, %v1359_v23 }
 0x211   : > { %7236 = vmatpush3.bf16.msra.mxu1 %v7235_v16 }
 0x212   : > { %7237 = vmatprep.subr.bf16.mxu1 %v8798_v60 }
 0x215   : > { %7239 = vmatpush3.bf16.msra.mxu1 %v7238_v19  ;;  %6881 = vmatmul.mubr.msk.bf16.vlgmr.msra.gmra.mrb[4].mxu0 %vm1376_vm1, %v1360_v25 }
 0x216   : > { %7400 = vmatprep.subr.bf16.mxu1 %v7618_v15 }
 0x2e0   : > { %v6570_v26 = vpop.f32.mrb[0].mxu0 }
 0x2e1   : > { %v6571_v28 = vpop.f32.mrb[1].mxu0 }
 0x2e2   : > { %v6572_v29 = vadd.f32 %v6571_v28, %v6570_v26  ;;  %v6573_v30 = vpop.f32.mrb[2].mxu0 }
 0x2e3   : > { %v6574_v31 = vpop.f32.mrb[3].mxu0 }
 0x2e4   : > { %v1246_v32 = vadd.f32 %v6572_v29, %v1178_v27 }
 0x2e6   : > { %v6253_v33 = vmul.f32 -1.442695, %v1246_v32 }
 0x2e8   : > { %7619 = vpow2.f32 %v6253_v33  ;;  %v6882_v46 = vpop.f32.mrb[4].mxu0 }
 0x2e9   : > { %v1432_v48 = vadd.f32 %v6882_v46, %v6254_v45  ;;  %v1423_v49 = vpop.f32.mrb[5].mxu0 }
 0x2ea   : > { %v1424_v51 = vadd.f32 %v6254_v45, %v1423_v49  ;;  %v6883_v52 = vpop.f32.mrb[6].mxu0 }
 0x2eb   : > { %v1464_v54 = vadd.f32 %v1456_v47, %v1432_v48  ;;  %v1435_v55 = vadd.f32 %v6883_v52, %v6254_v45  ;;  %v1426_v56 = vpop.f32.mrb[7].mxu0 }
 0x2ec   : > { %v1462_v58 = vadd.f32 %v1454_v50, %v1424_v51  ;;  %v1427_v59 = vadd.f32 %v6254_v45, %v1426_v56 }
 0x2ed   : > { %1472 = vst [vmem:[#allocation2 + $0x10] sm:$0xff] %v1464_v54  ;;  %v1465_v60 = vadd.f32 %v1457_v53, %v1435_v55 }
 0x2ee   : > { %1470 = vst [vmem:[#allocation2] sm:$0xff] %v1462_v58  ;;  %v1463_v61 = vadd.f32 %v1455_v57, %v1427_v59 }
 0x2ef   : > { %1473 = vst [vmem:[#allocation2 + $0x18] sm:$0xff] %v1465_v60 }
 0x2f0   : > { %1471 = vst [vmem:[#allocation2 + $0x8] sm:$0xff] %v1463_v61 }
 0x2f2   : > { %v7620_v34 = vpop.eup %7619 }
 0x2f3   : > { %v1254_v35 = vadd.f32 1.0, %v7620_v34 }
 0x2f5   : > { %7621 = vrcp.f32 %v1254_v35 }
 0x2ff   : > { %v7622_v38 = vpop.eup %7621 }
 0x300   : > { %v1257_v39 = vmul.f32 %v7622_v38, %v1246_v32 }
 0x302   : > { %v1274_v41 = vpack.c.bf16 %v1257_v39, %v1257_v39 }
 0x304   : > { %6875 = vmatmul.mubr.bf16.vlgmr.msra.gmra.mrb[0].mxu1 %v1274_v41 }
 0x305   : > { %7401 = vmatpush3.bf16.msra.mxu1 %v7618_v15  ;;  %6884 = vmatprep.mubr.msk.bf16.mxu1 %vm1376_vm1, %v1361_v40  ;;  %v1459_v15 = vld [vmem:[#allocation6 + $0x28] sm:$0xff] }
 0x30c   : > { %6885 = vmatmul.mubr.msk.bf16.vlgmr.msra.gmra.mrb[4].mxu1 %vm1376_vm1, %v1362_v44 }
 0x3d7   : > { %v1342_v63 = vpop.f32.mrb[0].mxu1 }
 0x3d8   : > { %v1343_v0 = vadd.f32 %v1342_v63, %v1275_v62  ;;  %v6876_v1 = vpop.f32.mrb[1].mxu1 }
 0x3d9   : > { %v1345_v2 = vpop.f32.mrb[2].mxu1 }
 0x3da   : > { %1348 = vst [vmem:[#allocation3] sm:$0x1] %v1343_v0  ;;  %v6877_v3 = vpop.f32.mrb[3].mxu1 }
 0x3df   : > { %v6886_v4 = vpop.f32.mrb[4].mxu1 }
 0x3e0   : > { %v1448_v6 = vadd.f32 %v6886_v4, %v6254_v45  ;;  %v1439_v7 = vpop.f32.mrb[5].mxu1 }
 0x3e1   : > { %v1440_v9 = vadd.f32 %v6254_v45, %v1439_v7  ;;  %v6887_v10 = vpop.f32.mrb[6].mxu1 }
 0x3e2   : > { %v1468_v12 = vadd.f32 %v1460_v5, %v1448_v6  ;;  %v1451_v13 = vadd.f32 %v6887_v10, %v6254_v45  ;;  %v1442_v14 = vpop.f32.mrb[7].mxu1 }
 0x3e3   : > { %v1466_v16 = vadd.f32 %v1458_v8, %v1440_v9  ;;  %v1443_v17 = vadd.f32 %v6254_v45, %v1442_v14 }
 0x3e4   : > { %1476 = vst [vmem:[#allocation2 + $0x30] sm:$0xff] %v1468_v12  ;;  %v1469_v18 = vadd.f32 %v1461_v11, %v1451_v13 }
 0x3e5   : > { %1474 = vst [vmem:[#allocation2 + $0x20] sm:$0xff] %v1466_v16  ;;  %v1467_v19 = vadd.f32 %v1459_v15, %v1443_v17 }
 0x3e6   : > { %1477 = vst [vmem:[#allocation2 + $0x38] sm:$0xff] %v1469_v18 }
 0x3e7   : > { %1475 = vst [vmem:[#allocation2 + $0x28] sm:$0xff] %v1467_v19 }
 0x3e8 PF: > { %v9591_v20 = vld [vmem:[#allocation2] sm:$0xff]  ;;  %v9593_v21 = vld [vmem:[#allocation2 + $0x10] sm:$0xff]  ;;  %v9597_v22 = vld [vmem:[#allocation2 + $0x8] sm:$0xff]  ;;  %v11195_v24 = vmov 0   ;;  %vm2379_vm2 = vcmask 261120   ;;  %vm2533_vm4 = vcmask 523264  }
 0x3e9   : > { %1938 = vadd.xlane.f32.xlu0 %v9591_v20  ;;  %1942 = vadd.xlane.f32.xlu1 %v9593_v21  ;;  %v9599_v23 = vld [vmem:[#allocation2 + $0x18] sm:$0xff]  ;;  %v7805_v26 = vld [vmem:[%s9469_s29] ss:$24 sps:$4 sm:$0xff]   ;;  %v1478_v37 = vld [vmem:[#allocation3] sm:$0x1]  ;;  %vm4101_vm5 = vcmask 785408  }
 0x3ea   : > { %1839 = vmatprep.mubr.bf16.mxu0 %v11195_v24  ;;  %1880 = vmatprep.mubr.bf16.mxu1 %v11195_v24  ;;  %v7803_v25 = vld [vmem:[%s9469_s29 + $0x4] ss:$24 sps:$4 sm:$0xff]   ;;  %v7806_v27 = vld [vmem:[%s9469_s29 + $0x34] ss:$24 sps:$4 sm:$0xff]   ;;  %v7808_v30 = vld [vmem:[%s9469_s29 + $0x30] ss:$24 sps:$4 sm:$0xff]  }
 0x3eb   : > { %1807 = vmatprep.subr.bf16.mxu0 %v7803_v25  ;;  %v7809_v31 = vld [vmem:[%s9469_s29 + $0x64] ss:$24 sps:$4 sm:$0xff]   ;;  %v7811_v34 = vld [vmem:[%s9469_s29 + $0x60] ss:$24 sps:$4 sm:$0xff]   ;;  %v7812_v35 = vld [vmem:[%s9469_s29 + $0x94] ss:$24 sps:$4 sm:$0xff]  }
 0x3ec   : > { %v9608_v28 = vld [vmem:[#allocation2 + $0x20] sm:$0xff]  ;;  %1808 = vmatpush1.bf16.msra.mxu0 %v7805_v26  ;;  %v9616_v32 = vld [vmem:[#allocation2 + $0x30] sm:$0xff]  ;;  %v6260_v39 = vmul.f32 -1.442695, %v1478_v37  ;;  %vm9786_vm3 = vmpackc.low %vm2379_vm2, %vm2379_vm2 }
 0x3ed   : > { %1940 = vadd.xlane.f32.xlu0 %v9597_v22  ;;  %1944 = vadd.xlane.f32.xlu1 %v9599_v23  ;;  %v9618_v33 = vld [vmem:[#allocation2 + $0x38] sm:$0xff]  ;;  %v7817_v40 = vld [vmem:[%s9469_s29 + $0xc0] ss:$24 sps:$4 sm:$0xff]   ;;  %v7830_v51 = vld [vmem:[%s9469_s29 + $0x3c] ss:$24 sps:$4 sm:$0xff]  }
 0x3ee   : > { %v9610_v29 = vld [vmem:[#allocation2 + $0x28] sm:$0xff]  ;;  %1809 = vmatprep.subr.bf16.mxu0 %v7806_v27  ;;  %v7814_v36 = vld [vmem:[%s9469_s29 + $0x90] ss:$24 sps:$4 sm:$0xff]   ;;  %7995 = vpow2.f32 %v6260_v39  ;;  %v7827_v49 = vld [vmem:[%s9469_s29 + $0xc] ss:$24 sps:$4 sm:$0xff]  }
 0x3ef   : > { %v7815_v38 = vld [vmem:[%s9469_s29 + $0xc4] ss:$24 sps:$4 sm:$0xff]   ;;  %v7818_v41 = vld [vmem:[%s9469_s29 + $0xf4] ss:$24 sps:$4 sm:$0xff]   ;;  %v7820_v42 = vld [vmem:[%s9469_s29 + $0xf0] ss:$24 sps:$4 sm:$0xff]   ;;  %1848 = vmatprep.subr.bf16.mxu1 %v7827_v49 }
 0x3f0   : > { %1810 = vmatpush1.bf16.msra.mxu0 %v7808_v30  ;;  %v7821_v43 = vld [vmem:[%s9469_s29 + $0x124] ss:$24 sps:$4 sm:$0xff]   ;;  %v7823_v44 = vld [vmem:[%s9469_s29 + $0x120] ss:$24 sps:$4 sm:$0xff]   ;;  %v7824_v46 = vld [vmem:[%s9469_s29 + $0x154] ss:$24 sps:$4 sm:$0xff]  }
 0x3f1   : > { %1946 = vadd.xlane.f32.xlu0 %v9608_v28  ;;  %1948 = vadd.xlane.f32.xlu1 %v9610_v29  ;;  %v7826_v48 = vld [vmem:[%s9469_s29 + $0x150] ss:$24 sps:$4 sm:$0xff]   ;;  %v7835_v52 = vld [vmem:[%s9469_s29 + $0x14] ss:$24 sps:$4 sm:$0xff]   ;;  %v7841_v59 = vld [vmem:[%s9469_s29 + $0x44] ss:$24 sps:$4 sm:$0xff]  }
 0x3f2   : > { %1811 = vmatprep.subr.bf16.mxu0 %v7809_v31  ;;  %v7829_v50 = vld [vmem:[%s9469_s29 + $0x8] ss:$24 sps:$4 sm:$0xff]   ;;  %v7832_v55 = vld [vmem:[%s9469_s29 + $0x38] ss:$24 sps:$4 sm:$0xff]   ;;  %v7836_v57 = vld [vmem:[%s9469_s29 + $0x6c] ss:$24 sps:$4 sm:$0xff]  }
 0x3f3   : > { %1849 = vmatpush1.bf16.msra.mxu1 %v7829_v50  ;;  %v7833_v56 = vld [vmem:[%s9469_s29 + $0x10] ss:$24 sps:$4 sm:$0xff]   ;;  %v7839_v61 = vld [vmem:[%s9469_s29 + $0x40] ss:$24 sps:$4 sm:$0xff]   ;;  %v7842_v62 = vld [vmem:[%s9469_s29 + $0x9c] ss:$24 sps:$4 sm:$0xff]  }
 0x3f4   : > { %1812 = vmatpush1.bf16.msra.mxu0 %v7811_v34  ;;  %1850 = vmatprep.subr.bf16.mxu1 %v7830_v51  ;;  %v7838_v60 = vld [vmem:[%s9469_s29 + $0x68] ss:$24 sps:$4 sm:$0xff]   ;;  %v7847_v63 = vld [vmem:[%s9469_s29 + $0x74] ss:$24 sps:$4 sm:$0xff]   ;;  %v7844_v0 = vld [vmem:[%s9469_s29 + $0x98] ss:$24 sps:$4 sm:$0xff]  }
 0x3f5   : > { %1950 = vadd.xlane.f32.xlu0 %v9616_v32  ;;  %1952 = vadd.xlane.f32.xlu1 %v9618_v33  ;;  %v7845_v1 = vld [vmem:[%s9469_s29 + $0x70] ss:$24 sps:$4 sm:$0xff]   ;;  %v7848_v2 = vld [vmem:[%s9469_s29 + $0xcc] ss:$24 sps:$4 sm:$0xff]   ;;  %v7851_v5 = vld [vmem:[%s9469_s29 + $0xa0] ss:$24 sps:$4 sm:$0xff]  }
 0x3f6   : > { %1813 = vmatprep.subr.bf16.mxu0 %v7812_v35  ;;  %v7853_v3 = vld [vmem:[%s9469_s29 + $0xa4] ss:$24 sps:$4 sm:$0xff]   ;;  %v7850_v4 = vld [vmem:[%s9469_s29 + $0xc8] ss:$24 sps:$4 sm:$0xff]   ;;  %v7859_v7 = vld [vmem:[%s9469_s29 + $0xd4] ss:$24 sps:$4 sm:$0xff]  }
 0x3f7   : > { %1851 = vmatpush1.bf16.msra.mxu1 %v7832_v55  ;;  %v7854_v6 = vld [vmem:[%s9469_s29 + $0xfc] ss:$24 sps:$4 sm:$0xff]   ;;  %v7856_v8 = vld [vmem:[%s9469_s29 + $0xf8] ss:$24 sps:$4 sm:$0xff]   ;;  %v7860_v10 = vld [vmem:[%s9469_s29 + $0x12c] ss:$24 sps:$4 sm:$0xff]  }
 0x3f8   : > { %1814 = vmatpush1.bf16.msra.mxu0 %v7814_v36  ;;  %v7996_v45 = vpop.eup %7995  ;;  %1852 = vmatprep.subr.bf16.mxu1 %v7836_v57  ;;  %v7857_v9 = vld [vmem:[%s9469_s29 + $0xd0] ss:$24 sps:$4 sm:$0xff]   ;;  %v7865_v11 = vld [vmem:[%s9469_s29 + $0x104] ss:$24 sps:$4 sm:$0xff]   ;;  %v7863_v13 = vld [vmem:[%s9469_s29 + $0x100] ss:$24 sps:$4 sm:$0xff]  }
 0x3f9   : > { %1815 = vmatprep.subr.bf16.mxu0 %v7815_v38  ;;  %v1482_v47 = vadd.f32 1.0, %v7996_v45  ;;  %v7862_v12 = vld [vmem:[%s9469_s29 + $0x128] ss:$24 sps:$4 sm:$0xff]   ;;  %v7866_v14 = vld [vmem:[%s9469_s29 + $0x15c] ss:$24 sps:$4 sm:$0xff]  }
 0x3fa   : > { %v7871_v15 = vld [vmem:[%s9469_s29 + $0x134] ss:$24 sps:$4 sm:$0xff]   ;;  %v7868_v16 = vld [vmem:[%s9469_s29 + $0x158] ss:$24 sps:$4 sm:$0xff]   ;;  %v7874_v19 = vld [vmem:[%s9469_s29 + $0x164] ss:$24 sps:$4 sm:$0xff]  }
 0x3fb   : > { %7997 = vrcp.f32 %v1482_v47  ;;  %1853 = vmatpush1.bf16.msra.mxu1 %v7838_v60  ;;  %v7869_v17 = vld [vmem:[%s9469_s29 + $0x130] ss:$24 sps:$4 sm:$0xff]   ;;  %v7875_v25 = vld [vmem:[%s9477_s21] ss:$12 sps:$4 sm:$0xff]   ;;  %v7881_v57 = vld [vmem:[%s9477_s21 + $0x8] ss:$12 sps:$4 sm:$0xff]  }
 0x3fc   : > { %1816 = vmatpush1.bf16.msra.mxu0 %v7817_v40  ;;  %1854 = vmatprep.subr.bf16.mxu1 %v7842_v62  ;;  %v7877_v18 = vld [vmem:[%s9477_s21 + $0x4] ss:$12 sps:$4 sm:$0xff]   ;;  %v7872_v26 = vld [vmem:[%s9469_s29 + $0x160] ss:$24 sps:$4 sm:$0xff]   ;;  %s8802_s29 = smov 96  }
 0x3fd   : > { %1817 = vmatprep.subr.bf16.mxu0 %v7818_v41  ;;  %v7882_v60 = vld [vmem:[%s9477_s21 + $0x30] ss:$12 sps:$4 sm:$0xff]   ;;  %v7889_v62 = vld [vmem:[%s9477_s21 + $0x38] ss:$12 sps:$4 sm:$0xff]  }
 0x3ff   : > { %1855 = vmatpush1.bf16.msra.mxu1 %v7844_v0  ;;  %v7892_v0 = vld [vmem:[%s9477_s21 + $0x64] ss:$12 sps:$4 sm:$0xff]  }
 0x400   : > { %1818 = vmatpush1.bf16.msra.mxu0 %v7820_v42  ;;  %1856 = vmatprep.subr.bf16.mxu1 %v7848_v2  ;;  %v7890_v2 = vld [vmem:[%s9477_s21 + $0x60] ss:$12 sps:$4 sm:$0xff]  }
 0x401   : > { %1819 = vmatprep.subr.bf16.mxu0 %v7821_v43 }
 0x403   : > { %1857 = vmatpush1.bf16.msra.mxu1 %v7850_v4  ;;  %v7897_v4 = vld [vmem:[%s9477_s21 + $0x68] ss:$12 sps:$4 sm:$0xff]  }
 0x404   : > { %1820 = vmatpush1.bf16.msra.mxu0 %v7823_v44  ;;  %1858 = vmatprep.subr.bf16.mxu1 %v7854_v6  ;;  %v7900_v6 = vld [vmem:[%s9477_s21 + $0x94] ss:$12 sps:$4 sm:$0xff]  }
 0x405   : > { %1821 = vmatprep.subr.bf16.mxu0 %v7824_v46  ;;  %v7998_v53 = vpop.eup %7997 }
 0x406   : > { %v1485_v54 = vmul.f32 %v7998_v53, %v1478_v37 }
 0x407   : > { %1859 = vmatpush1.bf16.msra.mxu1 %v7856_v8  ;;  %v7898_v8 = vld [vmem:[%s9477_s21 + $0x90] ss:$12 sps:$4 sm:$0xff]  }
 0x408   : > { %1822 = vmatpush1.bf16.msra.mxu0 %v7826_v48  ;;  %v1534_v58 = vpack.c.bf16 %v1485_v54, %v1485_v54  ;;  %1860 = vmatprep.subr.bf16.mxu1 %v7860_v10  ;;  %v7905_v10 = vld [vmem:[%s9477_s21 + $0x98] ss:$12 sps:$4 sm:$0xff]  }
 0x409   : > { %1889 = vmatprep.subr.bf16.mxu0 %v7835_v52 }
 0x40b   : > { %1840 = vmatmul.mubr.bf16.vlgmr.msra.gmra.mrb[0].mxu0 %v1534_v58  ;;  %1861 = vmatpush1.bf16.msra.mxu1 %v7862_v12  ;;  %v7906_v12 = vld [vmem:[%s9477_s21 + $0xb0] ss:$12 sps:$4 sm:$0xff]  }
 0x40c   : > { %1890 = vmatpush1.bf16.msra.mxu0 %v7833_v56  ;;  %1921 = vmatprep.mubr.bf16.mxu0 %v11195_v24  ;;  %v7880_v56 = vld [vmem:[%s9477_s21 + $0x1c] ss:$12 sps:$4 sm:$0xff]  }
 0x40d   : > { %1891 = vmatprep.subr.bf16.mxu0 %v7841_v59  ;;  %1862 = vmatprep.subr.bf16.mxu1 %v7866_v14  ;;  %v7878_v59 = vld [vmem:[%s9477_s21 + $0x18] ss:$12 sps:$4 sm:$0xff]  }
 0x40f   : > { %1863 = vmatpush1.bf16.msra.mxu1 %v7868_v16 }
 0x410   : > { %1892 = vmatpush1.bf16.msra.mxu0 %v7839_v61  ;;  %2233 = vmatprep.subr.bf16.mxu1 %v7877_v18  ;;  %v7888_v61 = vld [vmem:[%s9477_s21 + $0x4c] ss:$12 sps:$4 sm:$0xff]  }
 0x411   : > { %1893 = vmatprep.subr.bf16.mxu0 %v7847_v63  ;;  %v7886_v63 = vld [vmem:[%s9477_s21 + $0x48] ss:$12 sps:$4 sm:$0xff]  }
 0x412   : > { %1881 = vmatmul.mubr.bf16.vlgmr.msra.gmra.mrb[0].mxu1 %v1534_v58 }
 0x413   : > { %2234 = vmatpush1.bf16.msra.mxu1 %v7875_v25  ;;  %2265 = vmatprep.mubr.bf16.mxu1 %v11195_v24  ;;  %v1535_v25 = vld [vmem:[%s9475_s12] sm:$0x3f] }
 0x414   : > { %1894 = vmatpush1.bf16.msra.mxu0 %v7845_v1  ;;  %2235 = vmatprep.subr.bf16.mxu1 %v7880_v56  ;;  %v7893_v1 = vld [vmem:[%s9477_s21 + $0x50] ss:$12 sps:$4 sm:$0xff]  }
 0x415   : > { %1895 = vmatprep.subr.bf16.mxu0 %v7853_v3  ;;  %v7896_v3 = vld [vmem:[%s9477_s21 + $0x7c] ss:$12 sps:$4 sm:$0xff]  }
 0x417   : > { %2236 = vmatpush1.bf16.msra.mxu1 %v7878_v59 }
 0x418   : > { %1896 = vmatpush1.bf16.msra.mxu0 %v7851_v5  ;;  %v7894_v5 = vld [vmem:[%s9477_s21 + $0x78] ss:$12 sps:$4 sm:$0xff]  }
 0x419   : > { %1897 = vmatprep.subr.bf16.mxu0 %v7859_v7  ;;  %v7901_v7 = vld [vmem:[%s9477_s21 + $0x80] ss:$12 sps:$4 sm:$0xff]  }
 0x41c   : > { %1898 = vmatpush1.bf16.msra.mxu0 %v7857_v9  ;;  %v7904_v9 = vld [vmem:[%s9477_s21 + $0xac] ss:$12 sps:$4 sm:$0xff]  }
 0x41d   : > { %1899 = vmatprep.subr.bf16.mxu0 %v7865_v11  ;;  %v7902_v11 = vld [vmem:[%s9477_s21 + $0xa8] ss:$12 sps:$4 sm:$0xff]  }
 0x420   : > { %1900 = vmatpush1.bf16.msra.mxu0 %v7863_v13 }
 0x421   : > { %1901 = vmatprep.subr.bf16.mxu0 %v7871_v15 }
 0x424   : > { %1902 = vmatpush1.bf16.msra.mxu0 %v7869_v17  ;;  %v1777_v17 = vlaneseq }
 0x425   : > { %1903 = vmatprep.subr.bf16.mxu0 %v7874_v19 }
 0x426   : > { %v9731_v18 = vshrl.u32 %v1777_v17, 7 }
 0x428   : > { %1904 = vmatpush1.bf16.msra.mxu0 %v7872_v26  ;;  %11318 = vst [vmem:[#allocation44_spill] sm:$0xff] %v9731_v18  ;;  %v9734_v19 = vsub.s32 2, %v9731_v18 }
 0x429   : > { %6888 = vmatprep.subr.bf16.mxu0 %v7881_v57 }
 0x42a   : > { %v1788_v26 = vrot.slane %v1535_v25, %v9734_v19 }
 0x42b   : > { %1922 = vmatmul.mubr.bf16.vlgmr.msra.gmra.mrb[4].mxu0 %v1534_v58 }
 0x42c   : > { %6889 = vmatpush3.bf16.msra.mxu0 %v7881_v57 }
 0x476   : > { %v1939_v27 = vpop.xlane.xlu0 %1938  ;;  %v1943_v30 = vpop.xlane.xlu1 %1942 }
 0x477   : > { %v1955_v31 = vmul.f32 0.0078125, %v1939_v27  ;;  %v1957_v34 = vmul.f32 0.0078125, %v1943_v30 }
 0x479   : > { %v9670_v35 = vsub.f32 %v9591_v20, %v1955_v31  ;;  %v9673_v36 = vsub.f32 %v9593_v21, %v1957_v34 }
 0x47a   : > { %v1941_v37 = vpop.xlane.xlu0 %1940  ;;  %v1945_v38 = vpop.xlane.xlu1 %1944 }
 0x47b   : > { %v1956_v39 = vmul.f32 0.0078125, %v1941_v37  ;;  %v1971_v40 = vmul.f32 %v9670_v35, %v9670_v35  ;;  %v1958_v41 = vmul.f32 0.0078125, %v1945_v38  ;;  %v1973_v42 = vmul.f32 %v9673_v36, %v9673_v36 }
 0x47d   : > { %1979 = vadd.xlane.f32.xlu0 %v1971_v40  ;;  %v9680_v43 = vsub.f32 %v9597_v22, %v1956_v39  ;;  %v9683_v20 = vsub.f32 %v9599_v23, %v1958_v41  ;;  %v9745_v39 = vsub.s32 1, %v9731_v18 }
 0x47e   : > { %v1947_v44 = vpop.xlane.xlu0 %1946  ;;  %v1949_v21 = vpop.xlane.xlu1 %1948 }
 0x47f   : > { %v1959_v45 = vmul.f32 0.0078125, %v1947_v44  ;;  %v1972_v46 = vmul.f32 %v9680_v43, %v9680_v43  ;;  %v1960_v47 = vmul.f32 0.0078125, %v1949_v21  ;;  %v1974_v48 = vmul.f32 %v9683_v20, %v9683_v20  ;;  %11319 = vst [vmem:[#allocation45_spill] sm:$0xff] %v9745_v39 }
 0x481   : > { %1983 = vadd.xlane.f32.xlu0 %v1973_v42  ;;  %1981 = vadd.xlane.f32.xlu1 %v1972_v46  ;;  %v9690_v22 = vsub.f32 %v9608_v28, %v1959_v45  ;;  %v9693_v23 = vsub.f32 %v9610_v29, %v1960_v47  ;;  %v1784_v42 = vrot.slane %v1535_v25, %v9745_v39  ;;  %v9749_v46 = vsub.s32 0, %v9731_v18 }
 0x482   : > { %v1951_v49 = vpop.xlane.xlu0 %1950  ;;  %v1953_v50 = vpop.xlane.xlu1 %1952 }
 0x483   : > { %v1961_v51 = vmul.f32 0.0078125, %v1951_v49  ;;  %v1975_v52 = vmul.f32 %v9690_v22, %v9690_v22  ;;  %v1962_v53 = vmul.f32 0.0078125, %v1953_v50  ;;  %v1976_v54 = vmul.f32 %v9693_v23, %v9693_v23  ;;  %11320 = vst [vmem:[#allocation46_spill] sm:$0xff] %v9749_v46 }
 0x485   : > { %1985 = vadd.xlane.f32.xlu1 %v1974_v48  ;;  %1987 = vadd.xlane.f32.xlu0 %v1975_v52  ;;  %v9700_v28 = vsub.f32 %v9616_v32, %v1961_v51  ;;  %v9703_v29 = vsub.f32 %v9618_v33, %v1962_v53  ;;  %v7884_v32 = vld [vmem:[%s9477_s21 + $0x34] ss:$12 sps:$4 sm:$0xff]  }
 0x486   : > { %v7885_v33 = vld [vmem:[%s9477_s21 + $0x20] ss:$12 sps:$4 sm:$0xff]   ;;  %2237 = vmatprep.subr.bf16.mxu1 %v7884_v32  ;;  %s8803_s21 = smov 64  }
 0x487   : > { %v1977_v55 = vmul.f32 %v9700_v28, %v9700_v28  ;;  %v1978_v58 = vmul.f32 %v9703_v29, %v9703_v29  ;;  %6890 = vmatprep.subr.bf16.mxu0 %v7885_v33  ;;  %2238 = vmatpush1.bf16.msra.mxu1 %v7882_v60 }
 0x488   : > { %6891 = vmatpush3.bf16.msra.mxu0 %v7885_v33  ;;  %2239 = vmatprep.subr.bf16.mxu1 %v7888_v61 }
 0x489   : > { %1989 = vadd.xlane.f32.xlu1 %v1976_v54  ;;  %1991 = vadd.xlane.f32.xlu0 %v1977_v55  ;;  %v1780_v54 = vrot.slane %v1535_v25, %v9749_v46 }
 0x48a   : > { %6892 = vmatprep.subr.bf16.mxu0 %v7889_v62 }
 0x48b   : > { %2240 = vmatpush1.bf16.msra.mxu1 %v7886_v63 }
 0x48c   : > { %6893 = vmatpush3.bf16.msra.mxu0 %v7889_v62  ;;  %2241 = vmatprep.subr.bf16.mxu1 %v7892_v0 }
 0x48d   : > { %1993 = vadd.xlane.f32.xlu1 %v1978_v58  ;;  %6894 = vmatprep.subr.bf16.mxu0 %v7893_v1 }
 0x48f   : > { %2242 = vmatpush1.bf16.msra.mxu1 %v7890_v2 }
 0x490   : > { %6895 = vmatpush3.bf16.msra.mxu0 %v7893_v1  ;;  %2243 = vmatprep.subr.bf16.mxu1 %v7896_v3 }
 0x491   : > { %6896 = vmatprep.subr.bf16.mxu0 %v7897_v4 }
 0x493   : > { %2244 = vmatpush1.bf16.msra.mxu1 %v7894_v5 }
 0x494   : > { %6897 = vmatpush3.bf16.msra.mxu0 %v7897_v4  ;;  %2245 = vmatprep.subr.bf16.mxu1 %v7900_v6 }
 0x495   : > { %6898 = vmatprep.subr.bf16.mxu0 %v7901_v7 }
 0x497   : > { %2246 = vmatpush1.bf16.msra.mxu1 %v7898_v8 }
 0x498   : > { %6899 = vmatpush3.bf16.msra.mxu0 %v7901_v7  ;;  %2247 = vmatprep.subr.bf16.mxu1 %v7904_v9 }
 0x499   : > { %6900 = vmatprep.subr.bf16.mxu0 %v7905_v10 }
 0x49b   : > { %2248 = vmatpush1.bf16.msra.mxu1 %v7902_v11 }
 0x49c   : > { %6901 = vmatpush3.bf16.msra.mxu0 %v7905_v10 }
 0x49d   : > { %6902 = vmatprep.subr.bf16.mxu0 %v7906_v12 }
 0x4a0   : > { %6903 = vmatpush3.bf16.msra.mxu0 %v7906_v12 }
 0x4de   : > { %v1841_v13 = vpop.f32.mrb[0].mxu0 }
 0x4df   : > { %v1843_v14 = vpop.f32.mrb[1].mxu0  ;;  %v1842_v32 = vadd.f32 %v1841_v13, %v1780_v54 }
 0x4e0   : > { %v1845_v15 = vpop.f32.mrb[2].mxu0  ;;  %v1844_v49 = vadd.f32 %v1843_v14, %v1784_v42 }
 0x4e1   : > { %v1846_v16 = vpop.f32.mrb[3].mxu0  ;;  %v2043_v3 = vrot.slane %v1842_v32, %v9749_v46 }
 0x4e2   : > { %v2027_v57 = vadd.f32 1.0, %v1844_v49 }
 0x4e4   : > { %v2031_v63 = vrot.slane %v2027_v57, %v9749_v46 }
 0x4e5   : > { %v1882_v27 = vpop.f32.mrb[0].mxu1 }
 0x4e6   : > { %v9738_v30 = vadd.f32 %v1882_v27, %v1788_v26  ;;  %v9740_v31 = vpop.f32.mrb[1].mxu1 }
 0x4e7   : > { %v1886_v34 = vpop.f32.mrb[2].mxu1 }
 0x4e8   : > { %v1887_v37 = vpop.f32.mrb[3].mxu1 }
 0x4fe   : > { %v9742_v38 = vpop.f32.mrb[4].mxu0 }
 0x50a   : > { %v1980_v40 = vpop.xlane.xlu0 %1979 }
 0x50b   : > { %v1995_v41 = vmul.f32 0.0078125, %v1980_v40 }
 0x50d   : > { %v2003_v44 = vadd.f32 1e-06, %v1995_v41 }
 0x50e   : > { %v1982_v21 = vpop.xlane.xlu1 %1981  ;;  %v1984_v45 = vpop.xlane.xlu0 %1983 }
 0x50f   : > { %7999 = vrsqrt.f32 %v2003_v44  ;;  %v1996_v47 = vmul.f32 0.0078125, %v1982_v21  ;;  %v1997_v48 = vmul.f32 0.0078125, %v1984_v45 }
 0x511   : > { %v2004_v50 = vadd.f32 1e-06, %v1996_v47  ;;  %v2005_v51 = vadd.f32 1e-06, %v1997_v48 }
 0x512   : > { %v1986_v52 = vpop.xlane.xlu1 %1985  ;;  %v1988_v53 = vpop.xlane.xlu0 %1987 }
 0x513   : > { %8001 = vrsqrt.f32 %v2004_v50  ;;  %v1998_v55 = vmul.f32 0.0078125, %v1986_v52  ;;  %v1999_v56 = vmul.f32 0.0078125, %v1988_v53 }
 0x514   : > { %8003 = vrsqrt.f32 %v2005_v51 }
 0x515   : > { %v2006_v58 = vadd.f32 1e-06, %v1998_v55  ;;  %v2007_v59 = vadd.f32 1e-06, %v1999_v56 }
 0x516   : > { %v1990_v33 = vpop.xlane.xlu1 %1989  ;;  %v1992_v60 = vpop.xlane.xlu0 %1991 }
 0x517   : > { %8005 = vrsqrt.f32 %v2006_v58  ;;  %v2000_v61 = vmul.f32 0.0078125, %v1990_v33  ;;  %v2001_v62 = vmul.f32 0.0078125, %v1992_v60 }
 0x518   : > { %8007 = vrsqrt.f32 %v2007_v59 }
 0x519   : > { %v8000_v0 = vpop.eup %7999  ;;  %v2008_v1 = vadd.f32 1e-06, %v2000_v61  ;;  %v2009_v2 = vadd.f32 1e-06, %v2001_v62 }
 0x51a   : > { %v1994_v4 = vpop.xlane.xlu1 %1993  ;;  %v2019_v5 = vmul.f32 %v8000_v0, %v9670_v35 }
 0x51b   : > { %8009 = vrsqrt.f32 %v2008_v1  ;;  %v2002_v6 = vmul.f32 0.0078125, %v1994_v4 }
 0x51c   : > { %8011 = vrsqrt.f32 %v2009_v2  ;;  %v2032_v7 = vmul.f32 %v2031_v63, %v2019_v5 }
 0x51d   : > { %v8002_v8 = vpop.eup %8001  ;;  %v2010_v9 = vadd.f32 1e-06, %v2002_v6 }
 0x51e   : > { %v8004_v10 = vpop.eup %8003  ;;  %v2020_v11 = vmul.f32 %v8002_v8, %v9680_v43  ;;  %v2044_v12 = vadd.f32 %v2043_v3, %v2032_v7 }
 0x51f   : > { %8013 = vrsqrt.f32 %v2010_v9  ;;  %v2021_v13 = vmul.f32 %v8004_v10, %v9673_v36 }
 0x520   : > { %v2033_v14 = vmul.f32 %v2031_v63, %v2020_v11 }
 0x521   : > { %v8006_v15 = vpop.eup %8005  ;;  %v2034_v16 = vmul.f32 %v2031_v63, %v2021_v13 }
 0x522   : > { %v8008_v17 = vpop.eup %8007  ;;  %v2045_v25 = vadd.f32 %v2043_v3, %v2033_v14  ;;  %v2022_v35 = vmul.f32 %v8006_v15, %v9683_v20 }
 0x523   : > { %v2046_v26 = vadd.f32 %v2043_v3, %v2034_v16  ;;  %v2023_v27 = vmul.f32 %v8008_v17, %v9690_v22 }
 0x524   : > { %v2084_v34 = vpack.c.bf16 %v2045_v25, %v2044_v12  ;;  %v2035_v37 = vmul.f32 %v2031_v63, %v2022_v35 }
 0x525   : > { %v8010_v40 = vpop.eup %8009  ;;  %v2036_v41 = vmul.f32 %v2031_v63, %v2023_v27 }
 0x526   : > { %v8012_v42 = vpop.eup %8011  ;;  %2266 = vmatmul.mubr.bf16.vlgmr.msra.gmra.mrb[4].mxu1 %v2084_v34  ;;  %6904 = vmatprep.mubr.bf16.mxu0 %v2084_v34  ;;  %v2047_v43 = vadd.f32 %v2043_v3, %v2035_v37  ;;  %v2024_v36 = vmul.f32 %v8010_v40, %v9693_v23 }
 0x527   : > { %2275 = vmatprep.mubr.bf16.mxu1 %v11195_v24  ;;  %v2048_v44 = vadd.f32 %v2043_v3, %v2036_v41  ;;  %v2025_v21 = vmul.f32 %v8012_v42, %v9700_v28  ;;  %v9765_v28 = vpop.f32.mrb[5].mxu0 }
 0x528   : > { %v2085_v45 = vpack.c.bf16 %v2047_v43, %v2046_v26  ;;  %v2037_v20 = vmul.f32 %v2031_v63, %v2024_v36  ;;  %11321 = vst [vmem:[#allocation47_spill] sm:$0xff] %v9765_v28  ;;  %v1927_v54 = vpop.f32.mrb[6].mxu0 }
 0x529   : > { %v8014_v47 = vpop.eup %8013  ;;  %v2038_v48 = vmul.f32 %v2031_v63, %v2025_v21  ;;  %v1928_v55 = vpop.f32.mrb[7].mxu0 }
 0x52a   : > { %6905 = vmatmul.mubr.bf16.vlgmr.msra.gmra.mrb[8].mxu0 %v2085_v45  ;;  %v2049_v22 = vadd.f32 %v2043_v3, %v2037_v20  ;;  %v2026_v49 = vmul.f32 %v8014_v47, %v9703_v29  ;;  %v2088_v29 = vld [vmem:[%s9479_s16] sm:$0x7]  ;;  %s8804_s16 = smov 32  }
 0x52b   : > { %v2050_v50 = vadd.f32 %v2043_v3, %v2038_v48  ;;  %v9769_v56 = vrot.slane %v2088_v29, %v9749_v46  ;;  %v9772_v57 = vrot.slane %v2088_v29, %v9745_v39  ;;  %v2101_v61 = vrot.slane %v2088_v29, %v9734_v19 }
 0x52c   : > { %v2086_v51 = vpack.c.bf16 %v2049_v22, %v2048_v44  ;;  %v2039_v52 = vmul.f32 %v2031_v63, %v2026_v49 }
 0x52e   : > { %2276 = vmatmul.mubr.bf16.gmra.mrb[8].mxu1 %v2085_v45  ;;  %6908 = vmatprep.mubr.bf16.mxu0 %v2086_v51  ;;  %v2051_v23 = vadd.f32 %v2043_v3, %v2039_v52 }
 0x52f   : > { %2285 = vmatprep.mubr.bf16.mxu1 %v11195_v24 }
 0x530   : > { %v2087_v53 = vpack.c.bf16 %v2051_v23, %v2050_v50 }
 0x532   : > { %6909 = vmatmul.mubr.bf16.gmra.mrb[12].mxu0 %v2087_v53 }
 0x536   : > { %2286 = vmatmul.mubr.bf16.gmra.mrb[12].mxu1 %v2086_v51 }
 0x537   : > { %2295 = vmatprep.mubr.bf16.mxu1 %v11195_v24 }
 0x53e   : > { %2296 = vmatmul.mubr.bf16.gmra.mrb[16].mxu1 %v2087_v53 }
 0x5f9   : > { %v2267_v58 = vpop.f32.mrb[4].mxu1 }
 0x5fa   : > { %v2268_v59 = vadd.f32 %v2267_v58, %v9769_v56  ;;  %v2269_v32 = vpop.f32.mrb[5].mxu1 }
 0x5fb   : > { %v2270_v33 = vadd.f32 %v2269_v32, %v9772_v57  ;;  %v9776_v60 = vpop.f32.mrb[6].mxu1 }
 0x5fc   : > { %v9779_v62 = vmul.f32 0.17677669, %v2268_v59  ;;  %v2273_v63 = vpop.f32.mrb[7].mxu1 }
 0x5fd   : > { %v2274_v0 = vadd.f32 %v2273_v63, %v9772_v57  ;;  %v6906_v1 = vpop.f32.mrb[8].mxu0 }
 0x5fe   : > { %v2340_v2 = vpop.f32.mrb[9].mxu0  ;;  %6928 = vmatprep.mubr.msk.f32.mxu1 %vm2379_vm2, %v9779_v62  ;;  %v2349_v7 = vadd.f32 %v6906_v1, %v2101_v61  ;;  %v2272_v1 = vadd.f32 %v9776_v60, %v9769_v56 }
 0x5ff   : > { %v6907_v4 = vpop.f32.mrb[10].mxu0  ;;  %v7240_v5 = vpack.c.bf16 %v2274_v0, %v2270_v33  ;;  %v9790_v6 = vpack.i.bf16 %v2274_v0, %v2270_v33  ;;  %v2341_v10 = vadd.f32 %v2340_v2, %v2101_v61 }
 0x600   : > { %v2352_v8 = vadd.f32 %v6907_v4, %v2101_v61  ;;  %v2343_v9 = vpop.f32.mrb[11].mxu0  ;;  %v9831_v4 = vmul.f32 0.17677669, %v2272_v1 }
 0x601   : > { %v2344_v11 = vadd.f32 %v2343_v9, %v2101_v61  ;;  %v2277_v12 = vpop.f32.mrb[8].mxu1  ;;  %7242 = vmatprep.subr.msk.bf16.mxu1 %vm9786_vm3, %v7240_v5 }
 0x602   : > { %v2279_v13 = vpop.f32.mrb[9].mxu1  ;;  %7245 = vmatpush3.bf16.xpose.msk.msra.mxu1 %vm9786_vm3, %v7240_v5  ;;  %v7268_v14 = vpack.c.bf16 %v2352_v8, %v2349_v7  ;;  %v9796_v15 = vpack.i.bf16 %v2352_v8, %v2349_v7  ;;  %v2278_v2 = vadd.f32 %v2277_v12, %v9769_v56 }
 0x603   : > { %v2280_v16 = vadd.f32 %v2279_v13, %v9772_v57  ;;  %v2281_v17 = vpop.f32.mrb[10].mxu1  ;;  %v7264_v25 = vpack.c.bf16 %v2344_v11, %v2341_v10  ;;  %v9799_v35 = vpack.i.bf16 %v2344_v11, %v2341_v10 }
 0x604   : > { %v2283_v26 = vpop.f32.mrb[11].mxu1  ;;  %v2282_v5 = vadd.f32 %v2281_v17, %v9769_v56 }
 0x605   : > { %v2284_v27 = vadd.f32 %v2283_v26, %v9772_v57  ;;  %v6910_v34 = vpop.f32.mrb[12].mxu0 }
 0x606   : > { %v2356_v37 = vpop.f32.mrb[13].mxu0  ;;  %v2365_v43 = vadd.f32 %v6910_v34, %v2101_v61  ;;  %v9841_v8 = vmul.f32 0.17677669, %v2282_v5 }
 0x607   : > { %v6911_v40 = vpop.f32.mrb[14].mxu0  ;;  %v7246_v41 = vpack.c.bf16 %v2284_v27, %v2280_v16  ;;  %v9802_v42 = vpack.i.bf16 %v2284_v27, %v2280_v16  ;;  %v2357_v21 = vadd.f32 %v2356_v37, %v2101_v61 }
 0x608   : > { %v2368_v36 = vadd.f32 %v6911_v40, %v2101_v61  ;;  %v2359_v44 = vpop.f32.mrb[15].mxu0 }
 0x609   : > { %v2360_v45 = vadd.f32 %v2359_v44, %v2101_v61  ;;  %v2287_v20 = vpop.f32.mrb[12].mxu1  ;;  %7248 = vmatprep.subr.msk.bf16.mxu1 %vm9786_vm3, %v7246_v41 }
 0x60a   : > { %v2289_v47 = vpop.f32.mrb[13].mxu1  ;;  %7251 = vmatpush3.bf16.xpose.msk.msra.mxu1 %vm9786_vm3, %v7246_v41  ;;  %v7276_v48 = vpack.c.bf16 %v2368_v36, %v2365_v43  ;;  %v9808_v22 = vpack.i.bf16 %v2368_v36, %v2365_v43  ;;  %v2288_v7 = vadd.f32 %v2287_v20, %v9769_v56 }
 0x60b   : > { %v2290_v49 = vadd.f32 %v2289_v47, %v9772_v57  ;;  %v2291_v50 = vpop.f32.mrb[14].mxu1  ;;  %v7272_v51 = vpack.c.bf16 %v2360_v45, %v2357_v21  ;;  %v9811_v52 = vpack.i.bf16 %v2360_v45, %v2357_v21 }
 0x60c   : > { %v2293_v23 = vpop.f32.mrb[15].mxu1  ;;  %v2292_v60 = vadd.f32 %v2291_v50, %v9769_v56  ;;  %v9844_v9 = vmul.f32 0.17677669, %v2288_v7 }
 0x60d   : > { %v2294_v53 = vadd.f32 %v2293_v23, %v9772_v57 }
 0x60e   : > { %v9851_v11 = vmul.f32 0.17677669, %v2292_v60 }
 0x60f   : > { %v7252_v54 = vpack.c.bf16 %v2294_v53, %v2290_v49  ;;  %v9814_v55 = vpack.i.bf16 %v2294_v53, %v2290_v49 }
 0x611   : > { %v2297_v29 = vpop.f32.mrb[16].mxu1  ;;  %7254 = vmatprep.subr.msk.bf16.mxu1 %vm9786_vm3, %v7252_v54 }
 0x612   : > { %v2299_v58 = vpop.f32.mrb[17].mxu1  ;;  %7257 = vmatpush3.bf16.xpose.msk.msra.mxu1 %vm9786_vm3, %v7252_v54  ;;  %v2298_v10 = vadd.f32 %v2297_v29, %v9769_v56 }
 0x613   : > { %v2300_v59 = vadd.f32 %v2299_v58, %v9772_v57  ;;  %v2301_v32 = vpop.f32.mrb[18].mxu1 }
 0x614   : > { %v2303_v33 = vpop.f32.mrb[19].mxu1  ;;  %v2302_v12 = vadd.f32 %v2301_v32, %v9769_v56  ;;  %v9854_v13 = vmul.f32 0.17677669, %v2298_v10 }
 0x615   : > { %v2304_v61 = vadd.f32 %v2303_v33, %v9772_v57  ;;  %v9834_v57 = vmul.f32 0.17677669, %v2278_v2 }
 0x616   : > { %v9860_v16 = vmul.f32 0.17677669, %v2302_v12 }
 0x617   : > { %v7258_v63 = vpack.c.bf16 %v2304_v61, %v2300_v59  ;;  %v9822_v0 = vpack.i.bf16 %v2304_v61, %v2300_v59 }
 0x619   : > { %7260 = vmatprep.subr.msk.bf16.mxu1 %vm9786_vm3, %v7258_v63 }
 0x61a   : > { %7263 = vmatpush3.bf16.xpose.msk.msra.mxu1 %vm9786_vm3, %v7258_v63 }
 0x61b   : > { %7265 = vmatprep.subr.bf16.mxu1 %v7264_v25 }
 0x621   : > { %6929 = vmatmul.mubr.msk.f32.vlgmr.msra.gmra.mrb[20].mxu1 %vm2379_vm2, %v9831_v4 }
 0x622   : > { %6931 = vmatprep.mubr.msk.f32.mxu1 %vm2379_vm2, %v9834_v57  ;;  %7267 = vmatpush3.bf16.msra.mxu1 %v7264_v25 }
 0x623   : > { %7269 = vmatprep.subr.bf16.mxu1 %v7268_v14 }
 0x625   : > { %6932 = vmatmul.mubr.msk.f32.gmra.mrb[22].mxu1 %vm2379_vm2, %v9841_v8 }
 0x626   : > { %6934 = vmatprep.mubr.msk.f32.mxu1 %vm2379_vm2, %v9844_v9  ;;  %7271 = vmatpush3.bf16.msra.mxu1 %v7268_v14 }
 0x627   : > { %7273 = vmatprep.subr.bf16.mxu1 %v7272_v51 }
 0x629   : > { %6935 = vmatmul.mubr.msk.f32.gmra.mrb[24].mxu1 %vm2379_vm2, %v9851_v11 }
 0x62a   : > { %6937 = vmatprep.mubr.msk.f32.mxu1 %vm2379_vm2, %v9854_v13  ;;  %7275 = vmatpush3.bf16.msra.mxu1 %v7272_v51 }
 0x62b   : > { %7277 = vmatprep.subr.bf16.mxu1 %v7276_v48 }
 0x62d   : > { %6938 = vmatmul.mubr.msk.f32.gmra.mrb[26].mxu1 %vm2379_vm2, %v9860_v16 }
 0x62e   : > { %7279 = vmatpush3.bf16.msra.mxu1 %v7276_v48 }
 0x6f4   : > { %v6930_v14 = vpop.f32.mrb[20].mxu1 }
 0x6f5   : > { %v2494_v56 = vpop.f32.mrb[21].mxu1  ;;  %v2537_v17 = vsel %vm2533_vm4, %v6930_v14, -inf }
 0x6f6   : > { %2538 = vmax.xlane.f32.xlu1 %v2537_v17  ;;  %v2534_v25 = vsel %vm2533_vm4, %v2494_v56, -inf }
 0x6f7   : > { %2535 = vmax.xlane.f32.xlu0 %v2534_v25 }
 0x6f8   : > { %v6933_v26 = vpop.f32.mrb[22].mxu1 }
 0x6f9   : > { %v2504_v27 = vpop.f32.mrb[23].mxu1  ;;  %v2543_v34 = vsel %vm2533_vm4, %v6933_v26, -inf }
 0x6fa   : > { %2544 = vmax.xlane.f32.xlu1 %v2543_v34  ;;  %v2540_v37 = vsel %vm2533_vm4, %v2504_v27, -inf }
 0x6fb   : > { %2541 = vmax.xlane.f32.xlu0 %v2540_v37 }
 0x6fc   : > { %v6936_v40 = vpop.f32.mrb[24].mxu1 }
 0x6fd   : > { %v2514_v41 = vpop.f32.mrb[25].mxu1  ;;  %v2549_v43 = vsel %vm2533_vm4, %v6936_v40, -inf }
 0x6fe   : > { %2550 = vmax.xlane.f32.xlu1 %v2549_v43  ;;  %v2546_v36 = vsel %vm2533_vm4, %v2514_v41, -inf }
 0x6ff   : > { %2547 = vmax.xlane.f32.xlu0 %v2546_v36 }
 0x700   : > { %v6939_v44 = vpop.f32.mrb[26].mxu1 }
 0x701   : > { %v2524_v21 = vpop.f32.mrb[27].mxu1  ;;  %v2555_v45 = vsel %vm2533_vm4, %v6939_v44, -inf }
 0x702   : > { %2556 = vmax.xlane.f32.xlu1 %v2555_v45  ;;  %v2552_v20 = vsel %vm2533_vm4, %v2524_v21, -inf }
 0x703   : > { %2553 = vmax.xlane.f32.xlu0 %v2552_v20 }
 0x783   : > { %v2539_v47 = vpop.xlane.xlu1 %2538 }
 0x784   : > { %v2559_v48 = vsub.f32 %v6930_v14, %v2539_v47  ;;  %v2536_v49 = vpop.xlane.xlu0 %2535 }
 0x785   : > { %v2558_v50 = vsub.f32 %v2494_v56, %v2536_v49 }
 0x786   : > { %v2568_v51 = vmul.f32 1.442695, %v2559_v48 }
 0x787   : > { %v2566_v23 = vmul.f32 1.442695, %v2558_v50  ;;  %v2545_v59 = vpop.xlane.xlu1 %2544 }
 0x788   : > { %8015 = vpow2.f32 %v2568_v51  ;;  %v2542_v32 = vpop.xlane.xlu0 %2541  ;;  %v2561_v33 = vsub.f32 %v6933_v26, %v2545_v59 }
 0x789   : > { %8017 = vpow2.f32 %v2566_v23  ;;  %v2560_v61 = vsub.f32 %v2504_v27, %v2542_v32 }
 0x78a   : > { %v2572_v2 = vmul.f32 1.442695, %v2561_v33 }
 0x78b   : > { %v2551_v63 = vpop.xlane.xlu1 %2550  ;;  %v2570_v7 = vmul.f32 1.442695, %v2560_v61 }
 0x78c   : > { %v2548_v1 = vpop.xlane.xlu0 %2547  ;;  %v2563_v5 = vsub.f32 %v6936_v40, %v2551_v63  ;;  %8019 = vpow2.f32 %v2572_v2 }
 0x78d   : > { %v2562_v60 = vsub.f32 %v2514_v41, %v2548_v1  ;;  %8021 = vpow2.f32 %v2570_v7 }
 0x78e   : > { %v2576_v10 = vmul.f32 1.442695, %v2563_v5 }
 0x78f   : > { %v2574_v12 = vmul.f32 1.442695, %v2562_v60  ;;  %v2557_v40 = vpop.xlane.xlu1 %2556 }
 0x790   : > { %8023 = vpow2.f32 %v2576_v10  ;;  %v2565_v41 = vsub.f32 %v6939_v44, %v2557_v40  ;;  %v2554_v43 = vpop.xlane.xlu0 %2553 }
 0x791   : > { %8025 = vpow2.f32 %v2574_v12  ;;  %v2564_v45 = vsub.f32 %v2524_v21, %v2554_v43 }
 0x792   : > { %v9872_v53 = vpop.eup %8015  ;;  %v2580_v36 = vmul.f32 1.442695, %v2565_v41 }
 0x793   : > { %v9874_v54 = vpop.eup %8017  ;;  %v2585_v29 = vsel %vm2533_vm4, %v9872_v53, 0.0  ;;  %v2578_v20 = vmul.f32 1.442695, %v2564_v45 }
 0x794   : > { %2586 = vadd.xlane.f32.xlu1 %v2585_v29  ;;  %v2582_v58 = vsel %vm2533_vm4, %v9874_v54, 0.0  ;;  %8027 = vpow2.f32 %v2580_v36 }
 0x795   : > { %2583 = vadd.xlane.f32.xlu0 %v2582_v58  ;;  %8029 = vpow2.f32 %v2578_v20 }
 0x796   : > { %v9884_v14 = vpop.eup %8019 }
 0x797   : > { %v9886_v56 = vpop.eup %8021  ;;  %v2591_v17 = vsel %vm2533_vm4, %v9884_v14, 0.0 }
 0x798   : > { %v2588_v26 = vsel %vm2533_vm4, %v9886_v56, 0.0 }
 0x79a   : > { %v9890_v25 = vpop.eup %8023 }
 0x79b   : > { %v9894_v27 = vpop.eup %8025  ;;  %v2597_v34 = vsel %vm2533_vm4, %v9890_v25, 0.0 }
 0x79c   : > { %v2594_v37 = vsel %vm2533_vm4, %v9894_v27, 0.0 }
 0x79e   : > { %v9912_v47 = vpop.eup %8027 }
 0x79f   : > { %v2603_v44 = vsel %vm2533_vm4, %v9912_v47, 0.0  ;;  %v9916_v48 = vpop.eup %8029 }
 0x7a0   : > { %v2600_v21 = vsel %vm2533_vm4, %v9916_v48, 0.0 }
 0x7a5   : > { %7629 = vrot.lane.b32.xlu1 %v9802_v42, %s8802_s29 }
 0x7ab   : > { %7624 = vrot.lane.b32.xlu0 %v9790_v6, %s8802_s29 }
 0x7c9   : > { %2592 = vadd.xlane.f32.xlu1 %v2591_v17 }
 0x7ca   : > { %2589 = vadd.xlane.f32.xlu0 %v2588_v26 }
 0x7cd   : > { %2598 = vadd.xlane.f32.xlu1 %v2597_v34 }
 0x7ce   : > { %2595 = vadd.xlane.f32.xlu0 %v2594_v37 }
 0x7de   : > { %7639 = vrot.lane.b32.xlu1 %v9822_v0, %s8802_s29 }
 0x7e4   : > { %7634 = vrot.lane.b32.xlu0 %v9814_v55, %s8802_s29 }
 0x7e8   : > { %2751 = vrot.lane.b32.xlu0 %v9779_v62, %s8802_s29 }
 0x7ec   : > { %2755 = vrot.lane.b32.xlu0 %v9834_v57, %s8802_s29 }
 0x7f0   : > { %2759 = vrot.lane.b32.xlu0 %v9844_v9, %s8802_s29 }
 0x7f4   : > { %2763 = vrot.lane.b32.xlu0 %v9854_v13, %s8802_s29 }
 0x802   : > { %2604 = vadd.xlane.f32.xlu1 %v2603_v44 }
 0x806   : > { %2601 = vadd.xlane.f32.xlu1 %v2600_v21 }
 0x817   : > { %2753 = vrot.lane.b32.xlu1 %v9831_v4, %s8802_s29 }
 0x81b   : > { %2757 = vrot.lane.b32.xlu1 %v9841_v8, %s8802_s29 }
 0x81f   : > { %2761 = vrot.lane.b32.xlu1 %v9851_v11, %s8802_s29 }
 0x821   : > { %v2587_v49 = vpop.xlane.xlu1 %2586 }
 0x822   : > { %8031 = vrcp.f32 %v2587_v49  ;;  %v2584_v50 = vpop.xlane.xlu0 %2583 }
 0x823   : > { %8033 = vrcp.f32 %v2584_v50  ;;  %2765 = vrot.lane.b32.xlu1 %v9860_v16, %s8802_s29 }
 0x825   : > { %v7630_v59 = vpop.permute.xlu1 %7629 }
 0x826   : > { %v7625_v51 = vpop.permute.xlu0 %7624  ;;  %v7632_v61 = vunpack.i.h.bf16 %v7630_v59  ;;  %v7631_v63 = vunpack.i.l.bf16 %v7630_v59 }
 0x827   : > { %v7627_v23 = vunpack.i.h.bf16 %v7625_v51  ;;  %v7626_v29 = vunpack.i.l.bf16 %v7625_v51 }
 0x828   : > { %v7286_v5 = vpack.c.bf16 %v7632_v61, %v7631_v63 }
 0x829   : > { %v7280_v58 = vpack.c.bf16 %v7627_v23, %v7626_v29 }
 0x82b   : > { %7282 = vmatprep.subr.msk.bf16.mxu1 %vm9786_vm3, %v7280_v58 }
 0x82c   : > { %v8032_v32 = vpop.eup %8031 }
 0x82d   : > { %v8034_v33 = vpop.eup %8033  ;;  %v2609_v2 = vmul.f32 %v8032_v32, %v9872_v53 }
 0x82e   : > { %v2607_v1 = vmul.f32 %v8034_v33, %v9874_v54 }
 0x830   : > { %6956 = vmatprep.mubr.msk.f32.mxu1 %vm2533_vm4, %v2607_v1 }
 0x831   : > { %6957 = vmatmul.mubr.msk.f32.vlgmr.msra.gmra.mrb[28].mxu1 %vm2533_vm4, %v2609_v2 }
 0x832   : > { %7285 = vmatpush3.bf16.xpose.msk.msra.mxu1 %vm9786_vm3, %v7280_v58 }
 0x833   : > { %7288 = vmatprep.subr.msk.bf16.mxu1 %vm9786_vm3, %v7286_v5 }
 0x83a   : > { %7291 = vmatpush3.bf16.xpose.msk.msra.mxu1 %vm9786_vm3, %v7286_v5 }
 0x856   : > { %v2593_v7 = vpop.xlane.xlu1 %2592 }
 0x857   : > { %8035 = vrcp.f32 %v2593_v7  ;;  %v2590_v60 = vpop.xlane.xlu0 %2589 }
 0x858   : > { %8037 = vrcp.f32 %v2590_v60 }
 0x85a   : > { %v2599_v54 = vpop.xlane.xlu1 %2598 }
 0x85b   : > { %8039 = vrcp.f32 %v2599_v54  ;;  %v2596_v53 = vpop.xlane.xlu0 %2595 }
 0x85c   : > { %8041 = vrcp.f32 %v2596_v53 }
 0x85e   : > { %v7640_v10 = vpop.permute.xlu1 %7639 }
 0x85f   : > { %v7635_v12 = vpop.permute.xlu0 %7634  ;;  %v7642_v17 = vunpack.i.h.bf16 %v7640_v10  ;;  %v7641_v26 = vunpack.i.l.bf16 %v7640_v10 }
 0x860   : > { %v7637_v34 = vunpack.i.h.bf16 %v7635_v12  ;;  %v7636_v37 = vunpack.i.l.bf16 %v7635_v12 }
 0x861   : > { %v8036_v40 = vpop.eup %8035  ;;  %v7298_v45 = vpack.c.bf16 %v7642_v17, %v7641_v26 }
 0x862   : > { %v8038_v41 = vpop.eup %8037  ;;  %v7292_v43 = vpack.c.bf16 %v7637_v34, %v7636_v37  ;;  %v2613_v20 = vmul.f32 %v8036_v40, %v9884_v14 }
 0x863   : > { %v2611_v36 = vmul.f32 %v8038_v41, %v9886_v56  ;;  %v2752_v51 = vpop.permute.xlu0 %2751 }
 0x864   : > { %7294 = vmatprep.subr.msk.bf16.mxu1 %vm9786_vm3, %v7292_v43 }
 0x865   : > { %v8040_v44 = vpop.eup %8039  ;;  %6959 = vmatprep.mubr.msk.f32.mxu1 %vm2533_vm4, %v2611_v36  ;;  %7297 = vmatpush3.bf16.xpose.msk.msra.mxu1 %vm9786_vm3, %v7292_v43 }
 0x866   : > { %v8042_v21 = vpop.eup %8041  ;;  %6960 = vmatmul.mubr.msk.f32.gmra.mrb[30].mxu1 %vm2533_vm4, %v2613_v20  ;;  %7300 = vmatprep.subr.msk.bf16.mxu1 %vm9786_vm3, %v7298_v45  ;;  %v2617_v49 = vmul.f32 %v8040_v44, %v9890_v25 }
 0x867   : > { %v2615_v56 = vmul.f32 %v8042_v21, %v9894_v27  ;;  %v2756_v25 = vpop.permute.xlu0 %2755 }
 0x869   : > { %6962 = vmatprep.mubr.msk.f32.mxu1 %vm2533_vm4, %v2615_v56 }
 0x86a   : > { %6963 = vmatmul.mubr.msk.f32.gmra.mrb[32].mxu1 %vm2533_vm4, %v2617_v49 }
 0x86b   : > { %v2760_v33 = vpop.permute.xlu0 %2759 }
 0x86d   : > { %7303 = vmatpush3.bf16.xpose.msk.msra.mxu1 %vm9786_vm3, %v7298_v45 }
 0x88f   : > { %v2605_v14 = vpop.xlane.xlu1 %2604 }
 0x890   : > { %8043 = vrcp.f32 %v2605_v14 }
 0x893   : > { %v2602_v50 = vpop.xlane.xlu1 %2601 }
 0x894   : > { %8045 = vrcp.f32 %v2602_v50 }
 0x897   : > { %v2754_v58 = vpop.permute.xlu1 %2753 }
 0x89a   : > { %v8044_v23 = vpop.eup %8043 }
 0x89b   : > { %v2621_v27 = vmul.f32 %v8044_v23, %v9912_v47  ;;  %v2758_v32 = vpop.permute.xlu1 %2757 }
 0x89e   : > { %v8046_v29 = vpop.eup %8045 }
 0x89f   : > { %v2619_v59 = vmul.f32 %v8046_v29, %v9916_v48  ;;  %v2762_v61 = vpop.permute.xlu1 %2761  ;;  %v2764_v48 = vpop.permute.xlu0 %2763 }
 0x8a1   : > { %6965 = vmatprep.mubr.msk.f32.mxu1 %vm2533_vm4, %v2619_v59 }
 0x8a2   : > { %6966 = vmatmul.mubr.msk.f32.gmra.mrb[34].mxu1 %vm2533_vm4, %v2621_v27 }
 0x8a3   : > { %6984 = vmatprep.mubr.msk.f32.mxu1 %vm2379_vm2, %v2752_v51  ;;  %v2766_v47 = vpop.permute.xlu1 %2765 }
 0x8a6   : > { %6985 = vmatmul.mubr.msk.f32.vlgmr.msra.gmra.mrb[36].mxu1 %vm2379_vm2, %v2754_v58 }
 0x8a7   : > { %6987 = vmatprep.mubr.msk.f32.mxu1 %vm2379_vm2, %v2756_v25 }
 0x8aa   : > { %6988 = vmatmul.mubr.msk.f32.gmra.mrb[38].mxu1 %vm2379_vm2, %v2758_v32 }
 0x8ab   : > { %6990 = vmatprep.mubr.msk.f32.mxu1 %vm2379_vm2, %v2760_v33 }
 0x8ae   : > { %6991 = vmatmul.mubr.msk.f32.gmra.mrb[40].mxu1 %vm2379_vm2, %v2762_v61 }
 0x8af   : > { %6993 = vmatprep.mubr.msk.f32.mxu1 %vm2379_vm2, %v2764_v48 }
 0x8b2   : > { %6994 = vmatmul.mubr.msk.f32.gmra.mrb[42].mxu1 %vm2379_vm2, %v2766_v47 }
 0x904   : > { %v9968_v63 = vpop.f32.mrb[28].mxu1 }
 0x905   : > { %v9970_v1 = vpop.f32.mrb[29].mxu1 }
 0x939   : > { %v9972_v2 = vpop.f32.mrb[30].mxu1 }
 0x93a   : > { %v9974_v5 = vpop.f32.mrb[31].mxu1 }
 0x93d   : > { %v9976_v7 = vpop.f32.mrb[32].mxu1 }
 0x93e   : > { %v9978_v60 = vpop.f32.mrb[33].mxu1 }
 0x975   : > { %v9980_v54 = vpop.f32.mrb[34].mxu1 }
 0x976   : > { %v9982_v53 = vpop.f32.mrb[35].mxu1 }
 0x979   : > { %v6986_v10 = vpop.f32.mrb[36].mxu1 }
 0x97a   : > { %v2881_v12 = vpop.f32.mrb[37].mxu1  ;;  %v2923_v17 = vsel %vm2533_vm4, %v6986_v10, -inf }
 0x97b   : > { %2924 = vmax.xlane.f32.xlu1 %v2923_v17  ;;  %v2920_v26 = vsel %vm2533_vm4, %v2881_v12, -inf }
 0x97c   : > { %2921 = vmax.xlane.f32.xlu0 %v2920_v26 }
 0x97d   : > { %v6989_v34 = vpop.f32.mrb[38].mxu1 }
 0x97e   : > { %v2891_v37 = vpop.f32.mrb[39].mxu1  ;;  %v2929_v40 = vsel %vm2533_vm4, %v6989_v34, -inf }
 0x97f   : > { %v2926_v45 = vsel %vm2533_vm4, %v2891_v37, -inf }
 0x980   : > { %2930 = vmax.xlane.f32.xlu0 %v2929_v40 }
 0x981   : > { %v6992_v41 = vpop.f32.mrb[40].mxu1 }
 0x982   : > { %v2901_v43 = vpop.f32.mrb[41].mxu1  ;;  %v2935_v36 = vsel %vm2533_vm4, %v6992_v41, -inf }
 0x983   : > { %2936 = vmax.xlane.f32.xlu1 %v2935_v36  ;;  %v2932_v56 = vsel %vm2533_vm4, %v2901_v43, -inf }
 0x984   : > { %2927 = vmax.xlane.f32.xlu0 %v2926_v45 }
 0x985   : > { %v9989_v20 = vpop.f32.mrb[42].mxu1 }
 0x986   : > { %v9991_v44 = vpop.f32.mrb[43].mxu1  ;;  %v2941_v21 = vsel %vm2533_vm4, %v9989_v20, -inf }
 0x987   : > { %2942 = vmax.xlane.f32.xlu1 %v2941_v21  ;;  %v2938_v49 = vsel %vm2533_vm4, %v9991_v44, -inf }
 0x988   : > { %2933 = vmax.xlane.f32.xlu0 %v2932_v56 }
 0x98c   : > { %2939 = vmax.xlane.f32.xlu0 %v2938_v49 }
 0x998   : > { %7649 = vrot.lane.b32.xlu1 %v9796_v15, %s8802_s29 }
 0x99c   : > { %7654 = vrot.lane.b32.xlu1 %v9811_v52, %s8802_s29 }
 0x9a0   : > { %7659 = vrot.lane.b32.xlu1 %v9808_v22, %s8802_s29 }
 0x9a2   : > { %7644 = vrot.lane.b32.xlu0 %v9799_v35, %s8802_s29 }
 0x9a4   : > { %7669 = vrot.lane.b32.xlu1 %v9802_v42, %s8803_s21 }
 0x9a6   : > { %7664 = vrot.lane.b32.xlu0 %v9790_v6, %s8803_s21 }
 0xa08   : > { %v2925_v14 = vpop.xlane.xlu1 %2924 }
 0xa09   : > { %v2945_v50 = vsub.f32 %v6986_v10, %v2925_v14  ;;  %v2922_v51 = vpop.xlane.xlu0 %2921 }
 0xa0a   : > { %v2944_v23 = vsub.f32 %v2881_v12, %v2922_v51 }
 0xa0b   : > { %v2954_v29 = vmul.f32 1.442695, %v2945_v50 }
 0xa0c   : > { %v2952_v58 = vmul.f32 1.442695, %v2944_v23 }
 0xa0d   : > { %8047 = vpow2.f32 %v2954_v29  ;;  %v2931_v59 = vpop.xlane.xlu0 %2930 }
 0xa0e   : > { %8049 = vpow2.f32 %v2952_v58  ;;  %v2947_v27 = vsub.f32 %v6989_v34, %v2931_v59 }
 0xa10   : > { %v2958_v25 = vmul.f32 1.442695, %v2947_v27  ;;  %v2937_v32 = vpop.xlane.xlu1 %2936 }
 0xa11   : > { %v2949_v33 = vsub.f32 %v6992_v41, %v2937_v32  ;;  %v2928_v61 = vpop.xlane.xlu0 %2927 }
 0xa12   : > { %8051 = vpow2.f32 %v2958_v25  ;;  %v2946_v48 = vsub.f32 %v2891_v37, %v2928_v61 }
 0xa13   : > { %v2962_v47 = vmul.f32 1.442695, %v2949_v33 }
 0xa14   : > { %v2956_v17 = vmul.f32 1.442695, %v2946_v48  ;;  %v2943_v26 = vpop.xlane.xlu1 %2942 }
 0xa15   : > { %v2934_v40 = vpop.xlane.xlu0 %2933 }
 0xa16   : > { %8053 = vpow2.f32 %v2956_v17  ;;  %v2948_v10 = vsub.f32 %v2901_v43, %v2934_v40 }
 0xa17   : > { %v10010_v36 = vpop.eup %8047  ;;  %8055 = vpow2.f32 %v2962_v47 }
 0xa18   : > { %v10012_v12 = vpop.eup %8049  ;;  %v2960_v45 = vmul.f32 1.442695, %v2948_v10  ;;  %v7650_v21 = vpop.permute.xlu1 %7649  ;;  %v2971_v34 = vsel %vm2533_vm4, %v10010_v36, 0.0 }
 0xa19   : > { %2972 = vadd.xlane.f32.xlu1 %v2971_v34  ;;  %v2940_v41 = vpop.xlane.xlu0 %2939  ;;  %v2968_v37 = vsel %vm2533_vm4, %v10012_v12, 0.0  ;;  %v7652_v50 = vunpack.i.h.bf16 %v7650_v21  ;;  %v7651_v51 = vunpack.i.l.bf16 %v7650_v21 }
 0xa1a   : > { %2969 = vadd.xlane.f32.xlu0 %v2968_v37  ;;  %8057 = vpow2.f32 %v2960_v45 }
 0xa1b   : > { %v7308_v61 = vpack.c.bf16 %v7652_v50, %v7651_v51  ;;  %v2951_v50 = vsub.f32 %v9989_v20, %v2943_v26 }
 0xa1c   : > { %v10018_v56 = vpop.eup %8051  ;;  %v7655_v43 = vpop.permute.xlu1 %7654 }
 0xa1d   : > { %v7645_v49 = vpop.permute.xlu0 %7644  ;;  %v2977_v14 = vsel %vm2533_vm4, %v10018_v56, 0.0  ;;  %v7657_v32 = vunpack.i.h.bf16 %v7655_v43  ;;  %v7656_v33 = vunpack.i.l.bf16 %v7655_v43  ;;  %v2966_v51 = vmul.f32 1.442695, %v2951_v50 }
 0xa1e   : > { %v7647_v23 = vunpack.i.h.bf16 %v7645_v49  ;;  %v7646_v29 = vunpack.i.l.bf16 %v7645_v49  ;;  %2978 = vadd.xlane.f32.xlu1 %v2977_v14 }
 0xa1f   : > { %v7312_v45 = vpack.c.bf16 %v7657_v32, %v7656_v33  ;;  %8059 = vpow2.f32 %v2966_v51 }
 0xa20   : > { %v10022_v58 = vpop.eup %8053  ;;  %v7304_v59 = vpack.c.bf16 %v7647_v23, %v7646_v29  ;;  %v7660_v48 = vpop.permute.xlu1 %7659  ;;  %v2950_v23 = vsub.f32 %v9991_v44, %v2940_v41 }
 0xa21   : > { %v2974_v27 = vsel %vm2533_vm4, %v10022_v58, 0.0  ;;  %v10026_v25 = vpop.eup %8055  ;;  %v7662_v40 = vunpack.i.h.bf16 %v7660_v48  ;;  %v7661_v10 = vunpack.i.l.bf16 %v7660_v48  ;;  %v7665_v21 = vpop.permute.xlu0 %7664 }
 0xa22   : > { %2975 = vadd.xlane.f32.xlu0 %v2974_v27  ;;  %7305 = vmatprep.subr.bf16.mxu0 %v7304_v59  ;;  %v2983_v47 = vsel %vm2533_vm4, %v10026_v25, 0.0  ;;  %v7667_v37 = vunpack.i.h.bf16 %v7665_v21  ;;  %v7666_v43 = vunpack.i.l.bf16 %v7665_v21  ;;  %v2964_v29 = vmul.f32 1.442695, %v2950_v23 }
 0xa23   : > { %7307 = vmatpush3.bf16.msra.mxu0 %v7304_v59  ;;  %v7316_v49 = vpack.c.bf16 %v7662_v40, %v7661_v10 }
 0xa24   : > { %7309 = vmatprep.subr.bf16.mxu0 %v7308_v61  ;;  %v10030_v17 = vpop.eup %8057  ;;  %v7320_v14 = vpack.c.bf16 %v7667_v37, %v7666_v43  ;;  %8061 = vpow2.f32 %v2964_v29  ;;  %v7670_v41 = vpop.permute.xlu1 %7669 }
 0xa25   : > { %v2980_v34 = vsel %vm2533_vm4, %v10030_v17, 0.0  ;;  %v7672_v40 = vunpack.i.h.bf16 %v7670_v41  ;;  %v7671_v10 = vunpack.i.l.bf16 %v7670_v41 }
 0xa26   : > { %2984 = vadd.xlane.f32.xlu0 %v2983_v47 }
 0xa27   : > { %7311 = vmatpush3.bf16.msra.mxu0 %v7308_v61  ;;  %v7326_v37 = vpack.c.bf16 %v7672_v40, %v7671_v10 }
 0xa28   : > { %7313 = vmatprep.subr.bf16.mxu0 %v7312_v45 }
 0xa29   : > { %v10048_v59 = vpop.eup %8059 }
 0xa2a   : > { %2981 = vadd.xlane.f32.xlu0 %v2980_v34  ;;  %v2989_v20 = vsel %vm2533_vm4, %v10048_v59, 0.0 }
 0xa2b   : > { %7315 = vmatpush3.bf16.msra.mxu0 %v7312_v45 }
 0xa2c   : > { %7317 = vmatprep.subr.bf16.mxu0 %v7316_v49 }
 0xa2e   : > { %v10054_v44 = vpop.eup %8061 }
 0xa2f   : > { %7679 = vrot.lane.b32.xlu1 %v9822_v0, %s8803_s21  ;;  %7319 = vmatpush3.bf16.msra.mxu0 %v7316_v49  ;;  %v2986_v26 = vsel %vm2533_vm4, %v10054_v44, 0.0 }
 0xa30   : > { %7322 = vmatprep.subr.msk.bf16.mxu0 %vm9786_vm3, %v7320_v14 }
 0xa40   : > { %7674 = vrot.lane.b32.xlu0 %v9814_v55, %s8803_s21 }
 0xa44   : > { %3169 = vrot.lane.b32.xlu0 %v9779_v62, %s8803_s21 }
 0xa48   : > { %3173 = vrot.lane.b32.xlu0 %v9834_v57, %s8803_s21 }
 0xa4c   : > { %3177 = vrot.lane.b32.xlu0 %v9844_v9, %s8803_s21 }
 0xa50   : > { %3181 = vrot.lane.b32.xlu0 %v9854_v13, %s8803_s21 }
 0xa53   : > { %2990 = vadd.xlane.f32.xlu1 %v2989_v20 }
 0xa57   : > { %2987 = vadd.xlane.f32.xlu1 %v2986_v26 }
 0xa68   : > { %3171 = vrot.lane.b32.xlu1 %v9831_v4, %s8803_s21 }
 0xa6c   : > { %3175 = vrot.lane.b32.xlu1 %v9841_v8, %s8803_s21 }
 0xa70   : > { %3179 = vrot.lane.b32.xlu1 %v9851_v11, %s8803_s21 }
 0xa74   : > { %3183 = vrot.lane.b32.xlu1 %v9860_v16, %s8803_s21 }
 0xaa6   : > { %v2973_v27 = vpop.xlane.xlu1 %2972 }
 0xaa7   : > { %8063 = vrcp.f32 %v2973_v27  ;;  %v2970_v32 = vpop.xlane.xlu0 %2969 }
 0xaa8   : > { %8065 = vrcp.f32 %v2970_v32 }
 0xaab   : > { %v2979_v33 = vpop.xlane.xlu1 %2978 }
 0xaac   : > { %8067 = vrcp.f32 %v2979_v33 }
 0xaaf   : > { %v2976_v61 = vpop.xlane.xlu0 %2975 }
 0xab0   : > { %8069 = vrcp.f32 %v2976_v61 }
 0xab1   : > { %v8064_v48 = vpop.eup %8063 }
 0xab2   : > { %v8066_v47 = vpop.eup %8065  ;;  %v2995_v34 = vmul.f32 %v8064_v48, %v10010_v36 }
 0xab3   : > { %v2985_v45 = vpop.xlane.xlu0 %2984  ;;  %v2993_v21 = vmul.f32 %v8066_v47, %v10012_v12 }
 0xab4   : > { %8071 = vrcp.f32 %v2985_v45 }
 0xab5   : > { %7012 = vmatprep.mubr.msk.f32.mxu0 %vm2533_vm4, %v2993_v21 }
 0xab6   : > { %7013 = vmatmul.mubr.msk.f32.vlgmr.msra.gmra.mrb[16].mxu0 %vm2533_vm4, %v2995_v34  ;;  %v8068_v49 = vpop.eup %8067 }
 0xab7   : > { %7325 = vmatpush3.bf16.xpose.msk.msra.mxu0 %vm9786_vm3, %v7320_v14  ;;  %v2982_v43 = vpop.xlane.xlu0 %2981  ;;  %v2999_v29 = vmul.f32 %v8068_v49, %v10018_v56  ;;  %v7680_v14 = vpop.permute.xlu1 %7679 }
 0xab8   : > { %8073 = vrcp.f32 %v2982_v43  ;;  %7328 = vmatprep.subr.msk.bf16.mxu0 %vm9786_vm3, %v7326_v37  ;;  %v7682_v27 = vunpack.i.h.bf16 %v7680_v14 }
 0xaba   : > { %v8070_v50 = vpop.eup %8069 }
 0xabb   : > { %v7675_v51 = vpop.permute.xlu0 %7674  ;;  %v2997_v12 = vmul.f32 %v8070_v50, %v10022_v58  ;;  %v7681_v58 = vunpack.i.l.bf16 %v7680_v14 }
 0xabc   : > { %v7677_v36 = vunpack.i.h.bf16 %v7675_v51  ;;  %v7676_v23 = vunpack.i.l.bf16 %v7675_v51 }
 0xabd   : > { %7015 = vmatprep.mubr.msk.f32.mxu0 %vm2533_vm4, %v2997_v12  ;;  %v7338_v33 = vpack.c.bf16 %v7682_v27, %v7681_v58 }
 0xabe   : > { %v7332_v20 = vpack.c.bf16 %v7677_v36, %v7676_v23  ;;  %7016 = vmatmul.mubr.msk.f32.gmra.mrb[18].mxu0 %vm2533_vm4, %v2999_v29  ;;  %v8072_v26 = vpop.eup %8071 }
 0xabf   : > { %7331 = vmatpush3.bf16.xpose.msk.msra.mxu0 %vm9786_vm3, %v7326_v37  ;;  %v3003_v56 = vmul.f32 %v8072_v26, %v10026_v25 }
 0xac0   : > { %7334 = vmatprep.subr.msk.bf16.mxu0 %vm9786_vm3, %v7332_v20 }
 0xac2   : > { %v8074_v41 = vpop.eup %8073 }
 0xac3   : > { %v3001_v32 = vmul.f32 %v8074_v41, %v10030_v17  ;;  %v3170_v17 = vpop.permute.xlu0 %3169 }
 0xac5   : > { %7018 = vmatprep.mubr.msk.f32.mxu0 %vm2533_vm4, %v3001_v32 }
 0xac6   : > { %7019 = vmatmul.mubr.msk.f32.gmra.mrb[20].mxu0 %vm2533_vm4, %v3003_v56 }
 0xac7   : > { %7337 = vmatpush3.bf16.xpose.msk.msra.mxu0 %vm9786_vm3, %v7332_v20  ;;  %v3174_v21 = vpop.permute.xlu0 %3173 }
 0xac8   : > { %7340 = vmatprep.subr.msk.bf16.mxu0 %vm9786_vm3, %v7338_v33 }
 0xacb   : > { %v3178_v37 = vpop.permute.xlu0 %3177 }
 0xacf   : > { %7343 = vmatpush3.bf16.xpose.msk.msra.mxu0 %vm9786_vm3, %v7338_v33 }
 0xae0   : > { %v2991_v61 = vpop.xlane.xlu1 %2990 }
 0xae1   : > { %8075 = vrcp.f32 %v2991_v61 }
 0xae4   : > { %v2988_v48 = vpop.xlane.xlu1 %2987 }
 0xae5   : > { %8077 = vrcp.f32 %v2988_v48 }
 0xae8   : > { %v3172_v40 = vpop.permute.xlu1 %3171 }
 0xaeb   : > { %v8076_v25 = vpop.eup %8075 }
 0xaec   : > { %v3007_v45 = vmul.f32 %v8076_v25, %v10048_v59  ;;  %v3176_v34 = vpop.permute.xlu1 %3175 }
 0xaef   : > { %v8078_v47 = vpop.eup %8077 }
 0xaf0   : > { %v3005_v10 = vmul.f32 %v8078_v47, %v10054_v44  ;;  %v3180_v43 = vpop.permute.xlu1 %3179  ;;  %v3182_v44 = vpop.permute.xlu0 %3181 }
 0xaf2   : > { %7021 = vmatprep.mubr.msk.f32.mxu0 %vm2533_vm4, %v3005_v10 }
 0xaf3   : > { %7022 = vmatmul.mubr.msk.f32.gmra.mrb[22].mxu0 %vm2533_vm4, %v3007_v45 }
 0xaf4   : > { %7040 = vmatprep.mubr.msk.f32.mxu0 %vm2379_vm2, %v3170_v17  ;;  %v3184_v59 = vpop.permute.xlu1 %3183 }
 0xaf7   : > { %7041 = vmatmul.mubr.msk.f32.vlgmr.msra.gmra.mrb[24].mxu0 %vm2379_vm2, %v3172_v40 }
 0xaf8   : > { %7043 = vmatprep.mubr.msk.f32.mxu0 %vm2379_vm2, %v3174_v21 }
 0xafb   : > { %7044 = vmatmul.mubr.msk.f32.gmra.mrb[26].mxu0 %vm2379_vm2, %v3176_v34 }
 0xafc   : > { %7046 = vmatprep.mubr.msk.f32.mxu0 %vm2379_vm2, %v3178_v37 }
 0xaff   : > { %7047 = vmatmul.mubr.msk.f32.gmra.mrb[28].mxu0 %vm2379_vm2, %v3180_v43 }
 0xb00   : > { %7049 = vmatprep.mubr.msk.f32.mxu0 %vm2379_vm2, %v3182_v44 }
 0xb03   : > { %7050 = vmatmul.mubr.msk.f32.gmra.mrb[30].mxu0 %vm2379_vm2, %v3184_v59 }
 0xb89   : > { %v10104_v49 = vpop.f32.mrb[16].mxu0 }
 0xb8a   : > { %v10106_v50 = vpop.f32.mrb[17].mxu0 }
 0xb91   : > { %v10110_v12 = vpop.f32.mrb[18].mxu0 }
 0xb92   : > { %v10112_v36 = vpop.f32.mrb[19].mxu0 }
 0xb99   : > { %v10116_v29 = vpop.f32.mrb[20].mxu0 }
 0xb9a   : > { %v10118_v20 = vpop.f32.mrb[21].mxu0 }
 0xbc6   : > { %v10122_v26 = vpop.f32.mrb[22].mxu0 }
 0xbc7   : > { %v10124_v41 = vpop.f32.mrb[23].mxu0 }
 0xbca   : > { %v7042_v58 = vpop.f32.mrb[24].mxu0 }
 0xbcb   : > { %v3299_v32 = vpop.f32.mrb[25].mxu0  ;;  %v3341_v56 = vsel %vm2533_vm4, %v7042_v58, -inf }
 0xbcc   : > { %3342 = vmax.xlane.f32.xlu1 %v3341_v56  ;;  %v3338_v33 = vsel %vm2533_vm4, %v3299_v32, -inf }
 0xbcd   : > { %3339 = vmax.xlane.f32.xlu0 %v3338_v33 }
 0xbce   : > { %v7045_v61 = vpop.f32.mrb[26].mxu0 }
 0xbcf   : > { %v3309_v48 = vpop.f32.mrb[27].mxu0  ;;  %v3347_v17 = vsel %vm2533_vm4, %v7045_v61, -inf }
 0xbd0   : > { %v3344_v10 = vsel %vm2533_vm4, %v3309_v48, -inf }
 0xbd1   : > { %3348 = vmax.xlane.f32.xlu0 %v3347_v17 }
 0xbd2   : > { %v7048_v25 = vpop.f32.mrb[28].mxu0 }
 0xbd3   : > { %v3319_v47 = vpop.f32.mrb[29].mxu0  ;;  %v3353_v40 = vsel %vm2533_vm4, %v7048_v25, -inf }
 0xbd4   : > { %3354 = vmax.xlane.f32.xlu1 %v3353_v40  ;;  %v3350_v37 = vsel %vm2533_vm4, %v3319_v47, -inf }
 0xbd5   : > { %3345 = vmax.xlane.f32.xlu0 %v3344_v10 }
 0xbd6   : > { %v10133_v45 = vpop.f32.mrb[30].mxu0 }
 0xbd7   : > { %v10135_v21 = vpop.f32.mrb[31].mxu0  ;;  %v3359_v34 = vsel %vm2533_vm4, %v10133_v45, -inf }
 0xbd8   : > { %3360 = vmax.xlane.f32.xlu1 %v3359_v34  ;;  %v3356_v43 = vsel %vm2533_vm4, %v10135_v21, -inf }
 0xbd9   : > { %3351 = vmax.xlane.f32.xlu0 %v3350_v37 }
 0xbdd   : > { %3357 = vmax.xlane.f32.xlu0 %v3356_v43 }
 0xbe9   : > { %7689 = vrot.lane.b32.xlu1 %v9796_v15, %s8803_s21 }
 0xbed   : > { %7694 = vrot.lane.b32.xlu1 %v9811_v52, %s8803_s21 }
 0xbf1   : > { %7699 = vrot.lane.b32.xlu1 %v9808_v22, %s8803_s21 }
 0xbf3   : > { %7684 = vrot.lane.b32.xlu0 %v9799_v35, %s8803_s21 }
 0xbf5   : > { %7709 = vrot.lane.b32.xlu1 %v9802_v42, %s8804_s16 }
 0xbf7   : > { %7704 = vrot.lane.b32.xlu0 %v9790_v6, %s8804_s16 }
 0xc59   : > { %v3343_v44 = vpop.xlane.xlu1 %3342 }
 0xc5a   : > { %v3363_v59 = vsub.f32 %v7042_v58, %v3343_v44  ;;  %v3340_v56 = vpop.xlane.xlu0 %3339 }
 0xc5b   : > { %v3362_v33 = vsub.f32 %v3299_v32, %v3340_v56 }
 0xc5c   : > { %v3372_v17 = vmul.f32 1.442695, %v3363_v59 }
 0xc5d   : > { %v3370_v40 = vmul.f32 1.442695, %v3362_v33 }
 0xc5e   : > { %8079 = vpow2.f32 %v3372_v17  ;;  %v3349_v10 = vpop.xlane.xlu0 %3348 }
 0xc5f   : > { %8081 = vpow2.f32 %v3370_v40  ;;  %v3365_v34 = vsub.f32 %v7045_v61, %v3349_v10 }
 0xc61   : > { %v3376_v37 = vmul.f32 1.442695, %v3365_v34  ;;  %v3355_v43 = vpop.xlane.xlu1 %3354 }
 0xc62   : > { %v3367_v27 = vsub.f32 %v7048_v25, %v3355_v43  ;;  %v3346_v14 = vpop.xlane.xlu0 %3345 }
 0xc63   : > { %8083 = vpow2.f32 %v3376_v37  ;;  %v3364_v23 = vsub.f32 %v3309_v48, %v3346_v14 }
 0xc64   : > { %v3380_v42 = vmul.f32 1.442695, %v3367_v27 }
 0xc65   : > { %v3374_v51 = vmul.f32 1.442695, %v3364_v23  ;;  %v3361_v24 = vpop.xlane.xlu1 %3360 }
 0xc66   : > { %v3352_v6 = vpop.xlane.xlu0 %3351 }
 0xc67   : > { %8085 = vpow2.f32 %v3374_v51  ;;  %v3366_v58 = vsub.f32 %v3319_v47, %v3352_v6 }
 0xc68   : > { %v10154_v44 = vpop.eup %8079  ;;  %8087 = vpow2.f32 %v3380_v42 }
 0xc69   : > { %v10156_v32 = vpop.eup %8081  ;;  %v3378_v59 = vmul.f32 1.442695, %v3366_v58  ;;  %v7690_v56 = vpop.permute.xlu1 %7689  ;;  %v3389_v61 = vsel %vm2533_vm4, %v10154_v44, 0.0 }
 0xc6a   : > { %3390 = vadd.xlane.f32.xlu1 %v3389_v61  ;;  %v3358_v25 = vpop.xlane.xlu0 %3357  ;;  %v3386_v14 = vsel %vm2533_vm4, %v10156_v32, 0.0  ;;  %v7692_v47 = vunpack.i.h.bf16 %v7690_v56  ;;  %v7691_v33 = vunpack.i.l.bf16 %v7690_v56 }
 0xc6b   : > { %3387 = vadd.xlane.f32.xlu0 %v3386_v14  ;;  %8089 = vpow2.f32 %v3378_v59 }
 0xc6c   : > { %v7348_v42 = vpack.c.bf16 %v7692_v47, %v7691_v33 }
 0xc6d   : > { %v10162_v23 = vpop.eup %8083  ;;  %v7695_v51 = vpop.permute.xlu1 %7694 }
 0xc6e   : > { %v7685_v27 = vpop.permute.xlu0 %7684  ;;  %v3395_v48 = vsel %vm2533_vm4, %v10162_v23, 0.0  ;;  %v7697_v6 = vunpack.i.h.bf16 %v7695_v51  ;;  %v7696_v58 = vunpack.i.l.bf16 %v7695_v51 }
 0xc6f   : > { %v7687_v17 = vunpack.i.h.bf16 %v7685_v27  ;;  %v7686_v40 = vunpack.i.l.bf16 %v7685_v27  ;;  %3396 = vadd.xlane.f32.xlu1 %v3395_v48 }
 0xc70   : > { %v7352_v14 = vpack.c.bf16 %v7697_v6, %v7696_v58  ;;  %v3368_v6 = vsub.f32 %v10135_v21, %v3358_v25 }
 0xc71   : > { %v10166_v10 = vpop.eup %8085  ;;  %v7344_v34 = vpack.c.bf16 %v7687_v17, %v7686_v40  ;;  %v7700_v59 = vpop.permute.xlu1 %7699 }
 0xc72   : > { %v3392_v37 = vsel %vm2533_vm4, %v10166_v10, 0.0  ;;  %v10170_v43 = vpop.eup %8087  ;;  %v7702_v27 = vunpack.i.h.bf16 %v7700_v59  ;;  %v7701_v48 = vunpack.i.l.bf16 %v7700_v59  ;;  %v7705_v17 = vpop.permute.xlu0 %7704 }
 0xc73   : > { %3393 = vadd.xlane.f32.xlu0 %v3392_v37  ;;  %7345 = vmatprep.subr.bf16.mxu1 %v7344_v34  ;;  %v3401_v56 = vsel %vm2533_vm4, %v10170_v43, 0.0  ;;  %v7707_v33 = vunpack.i.h.bf16 %v7705_v17  ;;  %v7706_v40 = vunpack.i.l.bf16 %v7705_v17  ;;  %v3369_v37 = vsub.f32 %v10133_v45, %v3361_v24 }
 0xc74   : > { %7347 = vmatpush3.bf16.msra.mxu1 %v7344_v34  ;;  %v7356_v47 = vpack.c.bf16 %v7702_v27, %v7701_v48 }
 0xc75   : > { %7349 = vmatprep.subr.bf16.mxu1 %v7348_v42  ;;  %v10174_v61 = vpop.eup %8089  ;;  %v7360_v34 = vpack.c.bf16 %v7707_v33, %v7706_v40 }
 0xc76   : > { %v3398_v51 = vsel %vm2533_vm4, %v10174_v61, 0.0 }
 0xc77   : > { %3402 = vadd.xlane.f32.xlu0 %v3401_v56 }
 0xc78   : > { %7351 = vmatpush3.bf16.msra.mxu1 %v7348_v42  ;;  %v3384_v42 = vmul.f32 1.442695, %v3369_v37 }
 0xc79   : > { %7353 = vmatprep.subr.bf16.mxu1 %v7352_v14 }
 0xc7a   : > { %8091 = vpow2.f32 %v3384_v42 }
 0xc7b   : > { %3399 = vadd.xlane.f32.xlu0 %v3398_v51 }
 0xc7c   : > { %7355 = vmatpush3.bf16.msra.mxu1 %v7352_v14 }
 0xc7d   : > { %7357 = vmatprep.subr.bf16.mxu1 %v7356_v47 }
 0xc80   : > { %7719 = vrot.lane.b32.xlu1 %v9822_v0, %s8804_s16  ;;  %7359 = vmatpush3.bf16.msra.mxu1 %v7356_v47  ;;  %v3382_v0 = vmul.f32 1.442695, %v3368_v6 }
 0xc81   : > { %7362 = vmatprep.subr.msk.bf16.mxu1 %vm9786_vm3, %v7360_v34 }
 0xc82   : > { %8093 = vpow2.f32 %v3382_v0 }
 0xc84   : > { %3581 = vrot.lane.b32.xlu1 %v9831_v4, %s8804_s16 }
 0xc91   : > { %7714 = vrot.lane.b32.xlu0 %v9814_v55, %s8804_s16  ;;  %v10196_v55 = vpop.eup %8091 }
 0xc92   : > { %v3407_v24 = vsel %vm2533_vm4, %v10196_v55, 0.0 }
 0xc95   : > { %3579 = vrot.lane.b32.xlu0 %v9779_v62, %s8804_s16  ;;  %v10200_v62 = vpop.eup %8093 }
 0xc96   : > { %v3404_v4 = vsel %vm2533_vm4, %v10200_v62, 0.0 }
 0xc99   : > { %3583 = vrot.lane.b32.xlu0 %v9834_v57, %s8804_s16  ;;  %v7710_v57 = vpop.permute.xlu1 %7709 }
 0xc9a   : > { %v7712_v59 = vunpack.i.h.bf16 %v7710_v57  ;;  %v7711_v56 = vunpack.i.l.bf16 %v7710_v57 }
 0xc9d   : > { %3587 = vrot.lane.b32.xlu0 %v9844_v9, %s8804_s16 }
 0xca1   : > { %3591 = vrot.lane.b32.xlu0 %v9854_v13, %s8804_s16 }
 0xca8   : > { %3408 = vadd.xlane.f32.xlu1 %v3407_v24 }
 0xcac   : > { %3405 = vadd.xlane.f32.xlu1 %v3404_v4 }
 0xcbd   : > { %3585 = vrot.lane.b32.xlu1 %v9841_v8, %s8804_s16 }
 0xcc1   : > { %3589 = vrot.lane.b32.xlu1 %v9851_v11, %s8804_s16 }
 0xcc5   : > { %3593 = vrot.lane.b32.xlu1 %v9860_v16, %s8804_s16  ;;  %v7366_v16 = vpack.c.bf16 %v7712_v59, %v7711_v56  ;;  %v11324_v56 = vmov 0  }
 0xcf7   : > { %v3391_v9 = vpop.xlane.xlu1 %3390 }
 0xcf8   : > { %8095 = vrcp.f32 %v3391_v9  ;;  %v3388_v13 = vpop.xlane.xlu0 %3387 }
 0xcf9   : > { %8097 = vrcp.f32 %v3388_v13 }
 0xcfc   : > { %v3397_v45 = vpop.xlane.xlu1 %3396 }
 0xcfd   : > { %8099 = vrcp.f32 %v3397_v45 }
 0xd00   : > { %v3394_v21 = vpop.xlane.xlu0 %3393 }
 0xd01   : > { %8101 = vrcp.f32 %v3394_v21 }
 0xd02   : > { %v8096_v25 = vpop.eup %8095 }
 0xd03   : > { %v8098_v58 = vpop.eup %8097  ;;  %v3413_v11 = vmul.f32 %v8096_v25, %v10154_v44 }
 0xd04   : > { %v3403_v8 = vpop.xlane.xlu0 %3402  ;;  %v3411_v14 = vmul.f32 %v8098_v58, %v10156_v32 }
 0xd05   : > { %8103 = vrcp.f32 %v3403_v8 }
 0xd06   : > { %7068 = vmatprep.mubr.msk.f32.mxu1 %vm2533_vm4, %v3411_v14 }
 0xd07   : > { %7069 = vmatmul.mubr.msk.f32.vlgmr.msra.gmra.mrb[44].mxu1 %vm2533_vm4, %v3413_v11  ;;  %v8100_v48 = vpop.eup %8099 }
 0xd08   : > { %7365 = vmatpush3.bf16.xpose.msk.msra.mxu1 %vm9786_vm3, %v7360_v34  ;;  %v3400_v27 = vpop.xlane.xlu0 %3399  ;;  %v3417_v33 = vmul.f32 %v8100_v48, %v10162_v23  ;;  %v7720_v34 = vpop.permute.xlu1 %7719 }
 0xd09   : > { %8105 = vrcp.f32 %v3400_v27  ;;  %7368 = vmatprep.subr.msk.bf16.mxu1 %vm9786_vm3, %v7366_v16  ;;  %v7722_v6 = vunpack.i.h.bf16 %v7720_v34 }
 0xd0b   : > { %v8102_v17 = vpop.eup %8101 }
 0xd0c   : > { %v7715_v51 = vpop.permute.xlu0 %7714  ;;  %v3415_v32 = vmul.f32 %v8102_v17, %v10166_v10  ;;  %v7721_v10 = vunpack.i.l.bf16 %v7720_v34  ;;  %v3582_v4 = vpop.permute.xlu1 %3581 }
 0xd0d   : > { %v7717_v44 = vunpack.i.h.bf16 %v7715_v51  ;;  %v7716_v47 = vunpack.i.l.bf16 %v7715_v51 }
 0xd0e   : > { %7071 = vmatprep.mubr.msk.f32.mxu1 %vm2533_vm4, %v3415_v32  ;;  %v7378_v24 = vpack.c.bf16 %v7722_v6, %v7721_v10 }
 0xd0f   : > { %v7372_v40 = vpack.c.bf16 %v7717_v44, %v7716_v47  ;;  %7072 = vmatmul.mubr.msk.f32.gmra.mrb[46].mxu1 %vm2533_vm4, %v3417_v33  ;;  %v8104_v37 = vpop.eup %8103 }
 0xd10   : > { %7371 = vmatpush3.bf16.xpose.msk.msra.mxu1 %vm9786_vm3, %v7366_v16  ;;  %v3421_v23 = vmul.f32 %v8104_v37, %v10170_v43  ;;  %v3580_v43 = vpop.permute.xlu0 %3579 }
 0xd11   : > { %7374 = vmatprep.subr.msk.bf16.mxu1 %vm9786_vm3, %v7372_v40 }
 0xd13   : > { %v8106_v42 = vpop.eup %8105 }
 0xd14   : > { %v3419_v0 = vmul.f32 %v8106_v42, %v10174_v61  ;;  %v3584_v25 = vpop.permute.xlu0 %3583 }
 0xd16   : > { %7074 = vmatprep.mubr.msk.f32.mxu1 %vm2533_vm4, %v3419_v0 }
 0xd17   : > { %7075 = vmatmul.mubr.msk.f32.gmra.mrb[48].mxu1 %vm2533_vm4, %v3421_v23 }
 0xd18   : > { %7377 = vmatpush3.bf16.xpose.msk.msra.mxu1 %vm9786_vm3, %v7372_v40  ;;  %v3588_v58 = vpop.permute.xlu0 %3587 }
 0xd19   : > { %7380 = vmatprep.subr.msk.bf16.mxu1 %vm9786_vm3, %v7378_v24 }
 0xd20   : > { %7383 = vmatpush3.bf16.xpose.msk.msra.mxu1 %vm9786_vm3, %v7378_v24 }
 0xd35   : > { %v3409_v57 = vpop.xlane.xlu1 %3408 }
 0xd36   : > { %8107 = vrcp.f32 %v3409_v57 }
 0xd39   : > { %v3406_v61 = vpop.xlane.xlu1 %3405 }
 0xd3a   : > { %8109 = vrcp.f32 %v3406_v61 }
 0xd3d   : > { %v3586_v3 = vpop.permute.xlu1 %3585 }
 0xd40   : > { %v8108_v9 = vpop.eup %8107 }
 0xd41   : > { %v3425_v21 = vmul.f32 %v8108_v9, %v10196_v55  ;;  %v3590_v59 = vpop.permute.xlu1 %3589 }
 0xd44   : > { %v8110_v13 = vpop.eup %8109 }
 0xd45   : > { %v3423_v45 = vmul.f32 %v8110_v13, %v10200_v62  ;;  %v3592_v62 = vpop.permute.xlu0 %3591  ;;  %v3594_v55 = vpop.permute.xlu1 %3593 }
 0xd47   : > { %7077 = vmatprep.mubr.msk.f32.mxu1 %vm2533_vm4, %v3423_v45 }
 0xd48   : > { %7078 = vmatmul.mubr.msk.f32.gmra.mrb[50].mxu1 %vm2533_vm4, %v3425_v21 }
 0xd49   : > { %7096 = vmatprep.mubr.msk.f32.mxu1 %vm2379_vm2, %v3580_v43 }
 0xd4c   : > { %7097 = vmatmul.mubr.msk.f32.vlgmr.msra.gmra.mrb[52].mxu1 %vm2379_vm2, %v3582_v4 }
 0xd4d   : > { %7099 = vmatprep.mubr.msk.f32.mxu1 %vm2379_vm2, %v3584_v25 }
 0xd50   : > { %7100 = vmatmul.mubr.msk.f32.gmra.mrb[54].mxu1 %vm2379_vm2, %v3586_v3 }
 0xd51   : > { %7102 = vmatprep.mubr.msk.f32.mxu1 %vm2379_vm2, %v3588_v58 }
 0xd54   : > { %7103 = vmatmul.mubr.msk.f32.gmra.mrb[56].mxu1 %vm2379_vm2, %v3590_v59 }
 0xd55   : > { %7105 = vmatprep.mubr.msk.f32.mxu1 %vm2379_vm2, %v3592_v62 }
 0xd58   : > { %7106 = vmatmul.mubr.msk.f32.gmra.mrb[58].mxu1 %vm2379_vm2, %v3594_v55 }
 0xd59   : > { %4633 = vmatprep.mubr.bf16.mxu1 %v11324_v56 }
 0xdda   : > { %v10249_v8 = vpop.f32.mrb[44].mxu1 }
 0xddb   : > { %v10251_v14 = vpop.f32.mrb[45].mxu1 }
 0xddc   : > { %v7753_v11 = vpack.i.bf16 %v10249_v8, %v10251_v14 }
 0xde2   : > { %v10255_v16 = vpop.f32.mrb[46].mxu1 }
 0xde3   : > { %v10257_v27 = vpop.f32.mrb[47].mxu1 }
 0xde4   : > { %v7758_v48 = vpack.i.bf16 %v10255_v16, %v10257_v27 }
 0xdea   : > { %v10261_v17 = vpop.f32.mrb[48].mxu1 }
 0xdeb   : > { %v10263_v51 = vpop.f32.mrb[49].mxu1 }
 0xdec   : > { %v7783_v32 = vpack.i.bf16 %v10261_v17, %v10263_v51 }
 0xe1b   : > { %v10267_v44 = vpop.f32.mrb[50].mxu1 }
 0xe1c   : > { %v10269_v47 = vpop.f32.mrb[51].mxu1 }
 0xe1d   : > { %v7788_v33 = vpack.i.bf16 %v10267_v44, %v10269_v47 }
 0xe1f   : > { %v7098_v40 = vpop.f32.mrb[52].mxu1 }
 0xe20   : > { %v3709_v34 = vpop.f32.mrb[53].mxu1  ;;  %v3751_v37 = vsel %vm2533_vm4, %v7098_v40, -inf }
 0xe21   : > { %3752 = vmax.xlane.f32.xlu1 %v3751_v37  ;;  %v3748_v42 = vsel %vm2533_vm4, %v3709_v34, -inf }
 0xe22   : > { %3749 = vmax.xlane.f32.xlu0 %v3748_v42 }
 0xe23   : > { %v7101_v6 = vpop.f32.mrb[54].mxu1 }
 0xe24   : > { %v3719_v10 = vpop.f32.mrb[55].mxu1  ;;  %v3757_v57 = vsel %vm2533_vm4, %v7101_v6, -inf }
 0xe25   : > { %v3754_v0 = vsel %vm2533_vm4, %v3719_v10, -inf }
 0xe26   : > { %3755 = vmax.xlane.f32.xlu0 %v3754_v0 }
 0xe27   : > { %v7104_v23 = vpop.f32.mrb[56].mxu1 }
 0xe28   : > { %v3729_v24 = vpop.f32.mrb[57].mxu1  ;;  %v3763_v4 = vsel %vm2533_vm4, %v7104_v23, -inf }
 0xe29   : > { %3764 = vmax.xlane.f32.xlu1 %v3763_v4  ;;  %v3760_v13 = vsel %vm2533_vm4, %v3729_v24, -inf }
 0xe2a   : > { %3758 = vmax.xlane.f32.xlu0 %v3757_v57 }
 0xe2b   : > { %v7107_v61 = vpop.f32.mrb[58].mxu1 }
 0xe2c   : > { %v3739_v43 = vpop.f32.mrb[59].mxu1  ;;  %v3769_v9 = vsel %vm2533_vm4, %v7107_v61, -inf }
 0xe2d   : > { %3770 = vmax.xlane.f32.xlu1 %v3769_v9  ;;  %v3766_v45 = vsel %vm2533_vm4, %v3739_v43, -inf }
 0xe2e   : > { %3761 = vmax.xlane.f32.xlu0 %v3760_v13 }
 0xe32   : > { %3767 = vmax.xlane.f32.xlu0 %v3766_v45 }
 0xe3e   : > { %7729 = vrot.lane.b32.xlu1 %v9796_v15, %s8804_s16 }
 0xe48   : > { %7724 = vrot.lane.b32.xlu0 %v9799_v35, %s8804_s16 }
 0xeae   : > { %v3753_v21 = vpop.xlane.xlu1 %3752 }
 0xeaf   : > { %v3773_v25 = vsub.f32 %v7098_v40, %v3753_v21  ;;  %v3750_v3 = vpop.xlane.xlu0 %3749 }
 0xeb0   : > { %v3772_v58 = vsub.f32 %v3709_v34, %v3750_v3 }
 0xeb1   : > { %v3782_v59 = vmul.f32 1.442695, %v3773_v25 }
 0xeb2   : > { %v3780_v62 = vmul.f32 1.442695, %v3772_v58 }
 0xeb3   : > { %8111 = vpow2.f32 %v3782_v59  ;;  %v3756_v55 = vpop.xlane.xlu0 %3755 }
 0xeb4   : > { %8113 = vpow2.f32 %v3780_v62  ;;  %v3774_v37 = vsub.f32 %v3719_v10, %v3756_v55 }
 0xeb6   : > { %v3784_v42 = vmul.f32 1.442695, %v3774_v37  ;;  %v3765_v0 = vpop.xlane.xlu1 %3764 }
 0xeb7   : > { %v3777_v4 = vsub.f32 %v7104_v23, %v3765_v0  ;;  %v3759_v57 = vpop.xlane.xlu0 %3758 }
 0xeb8   : > { %8115 = vpow2.f32 %v3784_v42  ;;  %v3775_v9 = vsub.f32 %v7101_v6, %v3759_v57 }
 0xeb9   : > { %v3790_v15 = vmul.f32 1.442695, %v3777_v4 }
 0xeba   : > { %v3786_v13 = vmul.f32 1.442695, %v3775_v9  ;;  %v3771_v45 = vpop.xlane.xlu1 %3770 }
 0xebb   : > { %8117 = vpow2.f32 %v3790_v15  ;;  %v3779_v35 = vsub.f32 %v7107_v61, %v3771_v45  ;;  %v3762_v40 = vpop.xlane.xlu0 %3761 }
 0xebc   : > { %8119 = vpow2.f32 %v3786_v13  ;;  %v3776_v34 = vsub.f32 %v3729_v24, %v3762_v40 }
 0xebd   : > { %v10285_v21 = vpop.eup %8111  ;;  %v3794_v3 = vmul.f32 1.442695, %v3779_v35 }
 0xebe   : > { %v8114_v25 = vpop.eup %8113  ;;  %v3788_v58 = vmul.f32 1.442695, %v3776_v34  ;;  %v3799_v10 = vsel %vm2533_vm4, %v10285_v21, 0.0  ;;  %v7730_v61 = vpop.permute.xlu1 %7729 }
 0xebf   : > { %3800 = vadd.xlane.f32.xlu1 %v3799_v10  ;;  %v3768_v23 = vpop.xlane.xlu0 %3767  ;;  %v3796_v6 = vsel %vm2533_vm4, %v8114_v25, 0.0  ;;  %v7732_v57 = vunpack.i.h.bf16 %v7730_v61  ;;  %v7731_v9 = vunpack.i.l.bf16 %v7730_v61 }
 0xec0   : > { %8121 = vpow2.f32 %v3788_v58  ;;  %v3778_v59 = vsub.f32 %v3739_v43, %v3768_v23  ;;  %3797 = vadd.xlane.f32.xlu0 %v3796_v6  ;;  %v11325_v6 = vpack.i.bf16 %v10104_v49, %v10106_v50 }
 0xec1   : > { %8123 = vpow2.f32 %v3794_v3  ;;  %v7388_v35 = vpack.c.bf16 %v7732_v57, %v7731_v9 }
 0xec2   : > { %v10290_v62 = vpop.eup %8115  ;;  %v3792_v24 = vmul.f32 1.442695, %v3778_v59  ;;  %v11326_v59 = vpack.i.bf16 %v10110_v12, %v10112_v36 }
 0xec3   : > { %v7725_v55 = vpop.permute.xlu0 %7724  ;;  %v3802_v37 = vsel %vm2533_vm4, %v10290_v62, 0.0 }
 0xec4   : > { %v7727_v42 = vunpack.i.h.bf16 %v7725_v55  ;;  %v7726_v0 = vunpack.i.l.bf16 %v7725_v55  ;;  %3803 = vadd.xlane.f32.xlu0 %v3802_v37  ;;  %8125 = vpow2.f32 %v3792_v24 }
 0xec5   : > { %v10294_v4 = vpop.eup %8117 }
 0xec6   : > { %v10296_v15 = vpop.eup %8119  ;;  %v7384_v43 = vpack.c.bf16 %v7727_v42, %v7726_v0  ;;  %v3811_v13 = vsel %vm2533_vm4, %v10294_v4, 0.0 }
 0xec7   : > { %v3805_v45 = vsel %vm2533_vm4, %v10296_v15, 0.0 }
 0xec8   : > { %3806 = vadd.xlane.f32.xlu1 %v3805_v45  ;;  %3812 = vadd.xlane.f32.xlu0 %v3811_v13 }
 0xec9   : > { %7385 = vmatprep.subr.bf16.mxu0 %v7384_v43 }
 0xeca   : > { %v8122_v40 = vpop.eup %8121  ;;  %7387 = vmatpush3.bf16.msra.mxu0 %v7384_v43 }
 0xecb   : > { %7389 = vmatprep.subr.bf16.mxu0 %v7388_v35  ;;  %v3808_v34 = vsel %vm2533_vm4, %v8122_v40, 0.0  ;;  %v10303_v3 = vpop.eup %8123 }
 0xecc   : > { %3809 = vadd.xlane.f32.xlu1 %v3808_v34  ;;  %v3817_v58 = vsel %vm2533_vm4, %v10303_v3, 0.0 }
 0xece   : > { %7391 = vmatpush3.bf16.msra.mxu0 %v7388_v35  ;;  %v8126_v10 = vpop.eup %8125 }
 0xecf   : > { %v3814_v23 = vsel %vm2533_vm4, %v8126_v10, 0.0 }
 0xed0   : > { %3818 = vadd.xlane.f32.xlu1 %v3817_v58 }
 0xed4   : > { %3815 = vadd.xlane.f32.xlu1 %v3814_v23 }
 0xede   : > { %7734 = vrot.lane.b32.xlu0 %v9811_v52, %s8804_s16 }
 0xee2   : > { %7744 = vrot.lane.b32.xlu0 %v11325_v6, %s8804_s16 }
 0xee5   : > { %7739 = vrot.lane.b32.xlu1 %v9808_v22, %s8804_s16 }
 0xee6   : > { %7754 = vrot.lane.b32.xlu0 %v7753_v11, %s8803_s21 }
 0xee9   : > { %7749 = vrot.lane.b32.xlu1 %v11326_v59, %s8804_s16  ;;  %v7908_v59 = vld [vmem:[%s9504_s2 + $0x8] sm:$0xff]  }
 0xeed   : > { %7759 = vrot.lane.b32.xlu1 %v7758_v48, %s8803_s21 }
 0xf4c   : > { %v3801_v49 = vpop.xlane.xlu1 %3800 }
 0xf4d   : > { %v3798_v52 = vpop.xlane.xlu0 %3797 }
 0xf4e   : > { %8127 = vrcp.f32 %v3798_v52  ;;  %v7909_v52 = vld [vmem:[%s9504_s2 + $0x10] sm:$0xff]  }
 0xf4f   : > { %8129 = vrcp.f32 %v3801_v49  ;;  %v7913_v49 = vld [vmem:[%s9504_s2 + $0x30] sm:$0xff]  }
 0xf51   : > { %v3804_v50 = vpop.xlane.xlu0 %3803 }
 0xf52   : > { %8131 = vrcp.f32 %v3804_v50  ;;  %v7914_v50 = vld [vmem:[%s9504_s2 + $0x38] sm:$0xff]  }
 0xf55   : > { %v3807_v22 = vpop.xlane.xlu1 %3806  ;;  %v3813_v61 = vpop.xlane.xlu0 %3812 }
 0xf56   : > { %8133 = vrcp.f32 %v3807_v22 }
 0xf58   : > { %v8128_v24 = vpop.eup %8127 }
 0xf59   : > { %v3810_v55 = vpop.xlane.xlu1 %3809  ;;  %v7735_v8 = vpop.permute.xlu0 %7734  ;;  %v3821_v14 = vmul.f32 %v8128_v24, %v8114_v25 }
 0xf5a   : > { %v7737_v11 = vunpack.i.h.bf16 %v7735_v8  ;;  %v7736_v37 = vunpack.i.l.bf16 %v7735_v8  ;;  %8135 = vrcp.f32 %v3810_v55  ;;  %v8130_v25 = vpop.eup %8129 }
 0xf5b   : > { %7124 = vmatprep.mubr.msk.f32.mxu0 %vm2533_vm4, %v3821_v14  ;;  %8137 = vrcp.f32 %v3813_v61  ;;  %v3823_v9 = vmul.f32 %v8130_v25, %v10285_v21 }
 0xf5c   : > { %v7392_v12 = vpack.c.bf16 %v7737_v11, %v7736_v37  ;;  %v8132_v57 = vpop.eup %8131  ;;  %v11327_v11 = vpack.i.bf16 %v10116_v29, %v10118_v20 }
 0xf5d   : > { %v3819_v36 = vpop.xlane.xlu1 %3818  ;;  %v3825_v13 = vmul.f32 %v8132_v57, %v10290_v62  ;;  %v7745_v29 = vpop.permute.xlu0 %7744 }
 0xf5e   : > { %7393 = vmatprep.subr.bf16.mxu0 %v7392_v12  ;;  %v7747_v51 = vunpack.i.h.bf16 %v7745_v29 }
 0xf5f   : > { %7395 = vmatpush3.bf16.msra.mxu0 %v7392_v12 }
 0xf60   : > { %v8134_v43 = vpop.eup %8133  ;;  %v4086_v25 = vsel %vm2379_vm2, %v9968_v63, %v7747_v51 }
 0xf61   : > { %v3816_v16 = vpop.xlane.xlu1 %3815  ;;  %v3827_v35 = vmul.f32 %v8134_v43, %v10296_v15  ;;  %v7755_v17 = vpop.permute.xlu0 %7754 }
 0xf62   : > { %8139 = vrcp.f32 %v3816_v16  ;;  %v11328_v16 = vpack.i.bf16 %v10122_v26, %v10124_v41  ;;  %v7756_v26 = vunpack.i.l.bf16 %v7755_v17 }
 0xf63   : > { %8141 = vrcp.f32 %v3819_v36 }
 0xf64   : > { %v8136_v45 = vpop.eup %8135 }
 0xf65   : > { %v7740_v27 = vpop.permute.xlu1 %7739  ;;  %v8138_v34 = vpop.eup %8137  ;;  %v3829_v58 = vmul.f32 %v8136_v45, %v8122_v40  ;;  %v7907_v40 = vld [vmem:[%s9504_s2] sm:$0xff]  }
 0xf66   : > { %v7742_v48 = vunpack.i.h.bf16 %v7740_v27  ;;  %v7741_v42 = vunpack.i.l.bf16 %v7740_v27  ;;  %v3831_v21 = vmul.f32 %v8138_v34, %v10294_v4  ;;  %v7910_v4 = vld [vmem:[%s9504_s2 + $0x18] sm:$0xff]  }
 0xf68   : > { %v7396_v0 = vpack.c.bf16 %v7742_v48, %v7741_v42 }
 0xf69   : > { %v7750_v20 = vpop.permute.xlu1 %7749 }
 0xf6a   : > { %7397 = vmatprep.subr.bf16.mxu0 %v7396_v0  ;;  %v7752_v47 = vunpack.i.h.bf16 %v7750_v20 }
 0xf6b   : > { %7399 = vmatpush3.bf16.msra.mxu0 %v7396_v0  ;;  %v7757_v0 = vunpack.i.h.bf16 %v7755_v17 }
 0xf6c   : > { %v8140_v23 = vpop.eup %8139  ;;  %7136 = vmatprep.subr.bf16.mxu0 %v7907_v40 }
 0xf6d   : > { %v8142_v62 = vpop.eup %8141  ;;  %v3833_v6 = vmul.f32 %v8140_v23, %v8126_v10  ;;  %v7911_v10 = vld [vmem:[%s9504_s2 + $0x20] sm:$0xff]   ;;  %v7760_v41 = vpop.permute.xlu1 %7759  ;;  %v4094_v45 = vsel %vm2533_vm4, %v4086_v25, %v7757_v0 }
 0xf6e   : > { %7125 = vmatmul.mubr.msk.f32.vlgmr.msra.gmra.mrb[32].mxu0 %vm2533_vm4, %v3823_v9  ;;  %v3835_v15 = vmul.f32 %v8142_v62, %v10303_v3  ;;  %v7912_v3 = vld [vmem:[%s9504_s2 + $0x28] sm:$0xff]   ;;  %v7761_v34 = vunpack.i.l.bf16 %v7760_v41 }
 0xf6f   : > { %7127 = vmatprep.mubr.msk.f32.mxu0 %vm2533_vm4, %v3825_v13  ;;  %7137 = vmatpush3.bf16.msra.mxu0 %v7907_v40 }
 0xf70   : > { %7138 = vmatprep.subr.bf16.mxu0 %v7908_v59 }
 0xf72   : > { %7128 = vmatmul.mubr.msk.f32.gmra.mrb[34].mxu0 %vm2533_vm4, %v3827_v35  ;;  %v7762_v35 = vunpack.i.h.bf16 %v7760_v41 }
 0xf73   : > { %7130 = vmatprep.mubr.msk.f32.mxu0 %vm2533_vm4, %v3829_v58  ;;  %7139 = vmatpush3.bf16.msra.mxu0 %v7908_v59 }
 0xf74   : > { %7140 = vmatprep.subr.bf16.mxu0 %v7909_v52 }
 0xf76   : > { %7131 = vmatmul.mubr.msk.f32.gmra.mrb[36].mxu0 %vm2533_vm4, %v3831_v21 }
 0xf77   : > { %7133 = vmatprep.mubr.msk.f32.mxu0 %vm2533_vm4, %v3833_v6  ;;  %7141 = vmatpush3.bf16.msra.mxu0 %v7909_v52 }
 0xf78   : > { %7142 = vmatprep.subr.bf16.mxu0 %v7910_v4 }
 0xf7a   : > { %7134 = vmatmul.mubr.msk.f32.gmra.mrb[38].mxu0 %vm2533_vm4, %v3835_v15 }
 0xf7b   : > { %7143 = vmatpush3.bf16.msra.mxu0 %v7910_v4 }
 0xf7c   : > { %7144 = vmatprep.subr.bf16.mxu0 %v7911_v10 }
 0xf7f   : > { %7145 = vmatpush3.bf16.msra.mxu0 %v7911_v10 }
 0xf80   : > { %7146 = vmatprep.subr.bf16.mxu0 %v7912_v3 }
 0xf83   : > { %7147 = vmatpush3.bf16.msra.mxu0 %v7912_v3 }
 0xf84   : > { %7148 = vmatprep.subr.bf16.mxu0 %v7913_v49 }
 0xf87   : > { %7149 = vmatpush3.bf16.msra.mxu0 %v7913_v49 }
 0xf88   : > { %7150 = vmatprep.subr.bf16.mxu0 %v7914_v50 }
 0xf8b   : > { %7151 = vmatpush3.bf16.msra.mxu0 %v7914_v50 }
0x1041   : > { %v7126_v22 = vpop.f32.mrb[32].mxu0 }
0x1042   : > { %v3950_v61 = vpop.f32.mrb[33].mxu0 }
0x1043   : > { %v7763_v24 = vpack.i.bf16 %v7126_v22, %v3950_v61 }
0x1045   : > { %7764 = vrot.lane.b32.xlu0 %v7763_v24, %s8802_s29  ;;  %v7129_v55 = vpop.f32.mrb[34].mxu0 }
0x1046   : > { %v3960_v8 = vpop.f32.mrb[35].mxu0 }
0x1047   : > { %v7768_v14 = vpack.i.bf16 %v7129_v55, %v3960_v8 }
0x1049   : > { %7774 = vrot.lane.b32.xlu0 %v11327_v11, %s8804_s16  ;;  %7769 = vrot.lane.b32.xlu1 %v7768_v14, %s8802_s29  ;;  %v7132_v37 = vpop.f32.mrb[36].mxu0 }
0x104a   : > { %v3970_v12 = vpop.f32.mrb[37].mxu0 }
0x104b   : > { %v7793_v36 = vpack.i.bf16 %v7132_v37, %v3970_v12 }
0x104d   : > { %7784 = vrot.lane.b32.xlu0 %v7783_v32, %s8803_s21  ;;  %7779 = vrot.lane.b32.xlu1 %v11328_v16, %s8804_s16  ;;  %v7135_v27 = vpop.f32.mrb[38].mxu0  ;;  %v7746_v32 = vunpack.i.l.bf16 %v7745_v29 }
0x104e   : > { %v3980_v48 = vpop.f32.mrb[39].mxu0 }
0x104f   : > { %v7798_v42 = vpack.i.bf16 %v7135_v27, %v3980_v48  ;;  %v4085_v57 = vsel %vm2379_vm2, %v9970_v1, %v7746_v32  ;;  %v4088_v1 = vsel %vm2379_vm2, %v9972_v2, %v7752_v47  ;;  %v4253_v47 = vrot.slane %v9738_v30, %v9749_v46  ;;  %v8225_v30 = vld [vmem:[#allocation2 + $0x10] sm:$0xff] }
0x1050   : > { %v4093_v13 = vsel %vm2533_vm4, %v4085_v57, %v7756_v26  ;;  %v4096_v52 = vsel %vm2533_vm4, %v4088_v1, %v7762_v35 }
0x1051   : > { %7789 = vrot.lane.b32.xlu1 %v7788_v33, %s8803_s21  ;;  %7794 = vrot.lane.b32.xlu0 %v7793_v36, %s8802_s29  ;;  %v7751_v33 = vunpack.i.l.bf16 %v7750_v20 }
0x1053   : > { %v4087_v6 = vsel %vm2379_vm2, %v9974_v5, %v7751_v33 }
0x1054   : > { %v4095_v59 = vsel %vm2533_vm4, %v4087_v6, %v7761_v34  ;;  %v8224_v6 = vld [vmem:[#allocation2 + $0x8] sm:$0xff] }
0x1055   : > { %7799 = vrot.lane.b32.xlu1 %v7798_v42, %s8802_s29 }
0x10b7   : > { %v7765_v44 = vpop.permute.xlu0 %7764 }
0x10b8   : > { %v7767_v9 = vunpack.i.h.bf16 %v7765_v44  ;;  %v7766_v43 = vunpack.i.l.bf16 %v7765_v44 }
0x10ba   : > { %v4102_v58 = vsel %vm4101_vm5, %v4093_v13, %v7766_v43  ;;  %v4103_v23 = vsel %vm4101_vm5, %v4094_v45, %v7767_v9 }
0x10bb   : > { %v7775_v63 = vpop.permute.xlu0 %7774  ;;  %v7770_v21 = vpop.permute.xlu1 %7769  ;;  %v4126_v62 = vpack.c.bf16 %v4103_v23, %v4102_v58 }
0x10bc   : > { %v7772_v15 = vunpack.i.h.bf16 %v7770_v21  ;;  %v7771_v40 = vunpack.i.l.bf16 %v7770_v21  ;;  %v7777_v3 = vunpack.i.h.bf16 %v7775_v63  ;;  %v7776_v49 = vunpack.i.l.bf16 %v7775_v63 }
0x10bd   : > { %7152 = vmatprep.mubr.bf16.mxu0 %v4126_v62  ;;  %v8223_v62 = vld [vmem:[#allocation2] sm:$0xff] }
0x10be   : > { %v4105_v4 = vsel %vm4101_vm5, %v4096_v52, %v7772_v15  ;;  %v4104_v10 = vsel %vm4101_vm5, %v4095_v59, %v7771_v40  ;;  %v4090_v5 = vsel %vm2379_vm2, %v9976_v7, %v7777_v3  ;;  %v4089_v55 = vsel %vm2379_vm2, %v9978_v60, %v7776_v49  ;;  %v8226_v49 = vld [vmem:[#allocation2 + $0x18] sm:$0xff] }
0x10bf   : > { %v4127_v50 = vpack.c.bf16 %v4105_v4, %v4104_v10  ;;  %v7785_v22 = vpop.permute.xlu0 %7784  ;;  %v7780_v61 = vpop.permute.xlu1 %7779 }
0x10c0   : > { %v7787_v2 = vunpack.i.h.bf16 %v7785_v22  ;;  %v7786_v24 = vunpack.i.l.bf16 %v7785_v22  ;;  %v7782_v11 = vunpack.i.h.bf16 %v7780_v61  ;;  %v7781_v37 = vunpack.i.l.bf16 %v7780_v61 }
0x10c1   : > { %7153 = vmatmul.mubr.bf16.vlgmr.msra.gmra.mrb[40].mxu0 %v4127_v50 }
0x10c2   : > { %v4097_v16 = vsel %vm2533_vm4, %v4089_v55, %v7786_v24  ;;  %v4098_v27 = vsel %vm2533_vm4, %v4090_v5, %v7787_v2  ;;  %v4092_v60 = vsel %vm2379_vm2, %v9980_v54, %v7782_v11  ;;  %v4091_v51 = vsel %vm2379_vm2, %v9982_v53, %v7781_v37  ;;  %v6429_v54 = vld [vmem:[%s1114_s8] ss:$0 sm:$0xff]  ;;  %v8228_v37 = vld [vmem:[#allocation2 + $0x28] sm:$0xff]  ;;  %s11338_s8 = sld [smem:[#allocation43_spill]] }
0x10c3   : > { %v7790_v8 = vpop.permute.xlu1 %7789  ;;  %v7795_v14 = vpop.permute.xlu0 %7794 }
0x10c4   : > { %v7797_v12 = vunpack.i.h.bf16 %v7795_v14  ;;  %v7796_v36 = vunpack.i.l.bf16 %v7795_v14  ;;  %v7792_v48 = vunpack.i.h.bf16 %v7790_v8  ;;  %v7791_v42 = vunpack.i.l.bf16 %v7790_v8  ;;  %v8227_v14 = vld [vmem:[#allocation2 + $0x20] sm:$0xff] }
0x10c6   : > { %v4106_v29 = vsel %vm4101_vm5, %v4097_v16, %v7796_v36  ;;  %v4107_v7 = vsel %vm4101_vm5, %v4098_v27, %v7797_v12  ;;  %v4099_v26 = vsel %vm2533_vm4, %v4091_v51, %v7791_v42  ;;  %v4100_v41 = vsel %vm2533_vm4, %v4092_v60, %v7792_v48  ;;  %v8229_v36 = vld [vmem:[#allocation2 + $0x30] sm:$0xff]  ;;  %v8230_v27 = vld [vmem:[#allocation2 + $0x38] sm:$0xff] }
0x10c7   : > { %v7800_v20 = vpop.permute.xlu1 %7799  ;;  %v4128_v17 = vpack.c.bf16 %v4107_v7, %v4106_v29  ;;  %v7915_v42 = vld [vmem:[%s9481_s9] ss:$16 sps:$4 sm:$0xff]   ;;  %v7917_v29 = vld [vmem:[%s9481_s9 + $0x4] ss:$16 sps:$4 sm:$0xff]   ;;  %v7918_v7 = vld [vmem:[%s9481_s9 + $0x8] ss:$16 sps:$4 sm:$0xff]  }
0x10c8   : > { %v7802_v32 = vunpack.i.h.bf16 %v7800_v20  ;;  %v7801_v0 = vunpack.i.l.bf16 %v7800_v20  ;;  %v7920_v20 = vld [vmem:[%s9481_s9 + $0xc] ss:$16 sps:$4 sm:$0xff]   ;;  %4601 = vmatprep.subr.bf16.mxu1 %v7917_v29  ;;  %v7921_v51 = vld [vmem:[%s9481_s9 + $0x20] ss:$16 sps:$4 sm:$0xff]  }
0x10c9   : > { %7156 = vmatprep.mubr.bf16.mxu0 %v4128_v17  ;;  %v7923_v17 = vld [vmem:[%s9481_s9 + $0x24] ss:$16 sps:$4 sm:$0xff]   ;;  %v7926_v60 = vld [vmem:[%s9481_s9 + $0x2c] ss:$16 sps:$4 sm:$0xff]   ;;  %4674 = vmatprep.subr.bf16.mxu0 %v7920_v20  ;;  %v7942_v20 = vld [vmem:[%s9481_s9 + $0x88] ss:$16 sps:$4 sm:$0xff]  }
0x10ca   : > { %v4108_v25 = vsel %vm4101_vm5, %v4099_v26, %v7801_v0  ;;  %v4109_v57 = vsel %vm4101_vm5, %v4100_v41, %v7802_v32  ;;  %4602 = vmatpush1.bf16.msra.mxu1 %v7915_v42  ;;  %4675 = vmatpush1.bf16.msra.mxu0 %v7918_v7  ;;  %v7924_v32 = vld [vmem:[%s9481_s9 + $0x28] ss:$16 sps:$4 sm:$0xff]   ;;  %v7941_v42 = vld [vmem:[%s9481_s9 + $0x84] ss:$16 sps:$4 sm:$0xff]   ;;  %v7944_v29 = vld [vmem:[%s9481_s9 + $0x8c] ss:$16 sps:$4 sm:$0xff]  }
0x10cb   : > { %v4129_v44 = vpack.c.bf16 %v4109_v57, %v4108_v25  ;;  %4603 = vmatprep.subr.bf16.mxu1 %v7923_v17  ;;  %4676 = vmatprep.subr.bf16.mxu0 %v7926_v60  ;;  %v7939_v7 = vld [vmem:[%s9481_s9 + $0x80] ss:$16 sps:$4 sm:$0xff]   ;;  %v7947_v17 = vld [vmem:[%s9481_s9 + $0xa4] ss:$16 sps:$4 sm:$0xff]   ;;  %v7950_v60 = vld [vmem:[%s9481_s9 + $0xac] ss:$16 sps:$4 sm:$0xff]  }
0x10cd   : > { %7157 = vmatmul.mubr.bf16.gmra.mrb[44].mxu0 %v4129_v44 }
0x10ce   : > { %4706 = vmatprep.mubr.bf16.mxu0 %v11324_v56  ;;  %4604 = vmatpush1.bf16.msra.mxu1 %v7921_v51  ;;  %v7945_v51 = vld [vmem:[%s9481_s9 + $0xa0] ss:$16 sps:$4 sm:$0xff]  }
0x10cf   : > { %4677 = vmatpush1.bf16.msra.mxu0 %v7924_v32  ;;  %v7948_v32 = vld [vmem:[%s9481_s9 + $0xa8] ss:$16 sps:$4 sm:$0xff]  }
0x1194   : > { %v7154_v53 = vpop.f32.mrb[40].mxu0 }
0x1195   : > { %v4228_v33 = vadd.f32 %v7154_v53, %v6429_v54  ;;  %v4219_v9 = vpop.f32.mrb[41].mxu0 }
0x1196   : > { %v4220_v43 = vadd.f32 %v6429_v54, %v4219_v9  ;;  %v7155_v13 = vpop.f32.mrb[42].mxu0 }
0x1197   : > { %v4256_v45 = vmul.f32 %v4253_v47, %v4228_v33  ;;  %v4231_v35 = vadd.f32 %v7155_v13, %v6429_v54  ;;  %v4222_v34 = vpop.f32.mrb[43].mxu0 }
0x1198   : > { %v4254_v58 = vmul.f32 %v4253_v47, %v4220_v43  ;;  %v4223_v23 = vadd.f32 %v6429_v54, %v4222_v34 }
0x1199   : > { %v4257_v63 = vmul.f32 %v4253_v47, %v4231_v35  ;;  %v10415_v40 = vadd.f32 %v8225_v30, %v4256_v45 }
0x119a   : > { %v4255_v21 = vmul.f32 %v4253_v47, %v4223_v23  ;;  %v10409_v1 = vadd.f32 %v8223_v62, %v4254_v58 }
0x119b   : > { %11332 = vst [vmem:[#allocation50_spill] sm:$0xff] %v10415_v40  ;;  %v10418_v50 = vadd.f32 %v8226_v49, %v4257_v63 }
0x119c   : > { %11330 = vst [vmem:[#allocation48_spill] sm:$0xff] %v10409_v1  ;;  %4270 = vadd.xlane.f32.xlu0 %v10409_v1  ;;  %v10412_v15 = vadd.f32 %v8224_v6, %v4255_v21 }
0x119d   : > { %11333 = vst [vmem:[#allocation51_spill] sm:$0xff] %v10418_v50 }
0x119e   : > { %11331 = vst [vmem:[#allocation49_spill] sm:$0xff] %v10412_v15  ;;  %4272 = vadd.xlane.f32.xlu1 %v10412_v15 }
0x11a0   : > { %v7158_v59 = vpop.f32.mrb[44].mxu0  ;;  %4274 = vadd.xlane.f32.xlu0 %v10415_v40 }
0x11a1   : > { %v4244_v52 = vadd.f32 %v7158_v59, %v6429_v54  ;;  %v4235_v4 = vpop.f32.mrb[45].mxu0 }
0x11a2   : > { %v4236_v10 = vadd.f32 %v6429_v54, %v4235_v4  ;;  %v7159_v3 = vpop.f32.mrb[46].mxu0 }
0x11a3   : > { %v4260_v22 = vmul.f32 %v4253_v47, %v4244_v52  ;;  %v4247_v61 = vadd.f32 %v7159_v3, %v6429_v54  ;;  %v4238_v2 = vpop.f32.mrb[47].mxu0 }
0x11a4   : > { %v4258_v24 = vmul.f32 %v4253_v47, %v4236_v10  ;;  %v4239_v5 = vadd.f32 %v6429_v54, %v4238_v2  ;;  %4276 = vadd.xlane.f32.xlu0 %v10418_v50  ;;  %v7929_v2 = vld [vmem:[%s9481_s9 + $0x44] ss:$16 sps:$4 sm:$0xff]  }
0x11a5   : > { %v4261_v55 = vmul.f32 %v4253_v47, %v4247_v61  ;;  %v10427_v16 = vadd.f32 %v8229_v36, %v4260_v22  ;;  %4605 = vmatprep.subr.bf16.mxu1 %v7929_v2  ;;  %v7933_v36 = vld [vmem:[%s9481_s9 + $0x60] ss:$16 sps:$4 sm:$0xff]  }
0x11a6   : > { %v4259_v8 = vmul.f32 %v4253_v47, %v4239_v5  ;;  %v10421_v11 = vadd.f32 %v8227_v14, %v4258_v24  ;;  %v7932_v24 = vld [vmem:[%s9481_s9 + $0x4c] ss:$16 sps:$4 sm:$0xff]   ;;  %v7935_v14 = vld [vmem:[%s9481_s9 + $0x64] ss:$16 sps:$4 sm:$0xff]  }
0x11a7   : > { %11336 = vst [vmem:[#allocation54_spill] sm:$0xff] %v10427_v16  ;;  %v10430_v48 = vadd.f32 %v8230_v27, %v4261_v55  ;;  %v7927_v55 = vld [vmem:[%s9481_s9 + $0x40] ss:$16 sps:$4 sm:$0xff]   ;;  %4678 = vmatprep.subr.bf16.mxu0 %v7932_v24  ;;  %v7936_v27 = vld [vmem:[%s9481_s9 + $0x68] ss:$16 sps:$4 sm:$0xff]  }
0x11a8   : > { %11334 = vst [vmem:[#allocation52_spill] sm:$0xff] %v10421_v11  ;;  %4278 = vadd.xlane.f32.xlu0 %v10421_v11  ;;  %v10424_v12 = vadd.f32 %v8228_v37, %v4259_v8  ;;  %v7930_v8 = vld [vmem:[%s9481_s9 + $0x48] ss:$16 sps:$4 sm:$0xff]   ;;  %4606 = vmatpush1.bf16.msra.mxu1 %v7927_v55  ;;  %v7938_v37 = vld [vmem:[%s9481_s9 + $0x6c] ss:$16 sps:$4 sm:$0xff]  }
0x11a9   : > { %11337 = vst [vmem:[#allocation55_spill] sm:$0xff] %v10430_v48  ;;  %4679 = vmatpush1.bf16.msra.mxu0 %v7930_v8  ;;  %4607 = vmatprep.subr.bf16.mxu1 %v7935_v14 }
0x11aa   : > { %11335 = vst [vmem:[#allocation53_spill] sm:$0xff] %v10424_v12  ;;  %4280 = vadd.xlane.f32.xlu1 %v10424_v12  ;;  %4680 = vmatprep.subr.bf16.mxu0 %v7938_v37 }
0x11ac   : > { %4282 = vadd.xlane.f32.xlu0 %v10427_v16  ;;  %4608 = vmatpush1.bf16.msra.mxu1 %v7933_v36 }
0x11ad   : > { %4681 = vmatpush1.bf16.msra.mxu0 %v7936_v27  ;;  %4609 = vmatprep.subr.bf16.mxu1 %v7941_v42 }
0x11ae   : > { %4284 = vadd.xlane.f32.xlu1 %v10430_v48  ;;  %4682 = vmatprep.subr.bf16.mxu0 %v7944_v29 }
0x11b0   : > { %4610 = vmatpush1.bf16.msra.mxu1 %v7939_v7 }
0x11b1   : > { %4683 = vmatpush1.bf16.msra.mxu0 %v7942_v20  ;;  %4611 = vmatprep.subr.bf16.mxu1 %v7947_v17 }
0x11b2   : > { %4684 = vmatprep.subr.bf16.mxu0 %v7950_v60 }
0x11b4   : > { %4612 = vmatpush1.bf16.msra.mxu1 %v7945_v51 }
0x11b5   : > { %4685 = vmatpush1.bf16.msra.mxu0 %v7948_v32 }
0x1229   : > { %v4271_v0 = vpop.xlane.xlu0 %4270 }
0x122a   : > { %v4286_v26 = vmul.f32 0.0078125, %v4271_v0  ;;  %v7953_v0 = vld [vmem:[%s9481_s9 + $0xc4] ss:$16 sps:$4 sm:$0xff]  }
0x122b   : > { %v4273_v41 = vpop.xlane.xlu1 %4272  ;;  %4613 = vmatprep.subr.bf16.mxu1 %v7953_v0 }
0x122c   : > { %v10442_v25 = vsub.f32 %v10409_v1, %v4286_v26  ;;  %v4287_v57 = vmul.f32 0.0078125, %v4273_v41  ;;  %v7956_v26 = vld [vmem:[%s9481_s9 + $0xcc] ss:$16 sps:$4 sm:$0xff]   ;;  %v7951_v41 = vld [vmem:[%s9481_s9 + $0xc0] ss:$16 sps:$4 sm:$0xff]  }
0x122d   : > { %v4275_v44 = vpop.xlane.xlu0 %4274  ;;  %4686 = vmatprep.subr.bf16.mxu0 %v7956_v26  ;;  %4614 = vmatpush1.bf16.msra.mxu1 %v7951_v41 }
0x122e   : > { %v10445_v54 = vsub.f32 %v10412_v15, %v4287_v57  ;;  %v4288_v53 = vmul.f32 0.0078125, %v4275_v44  ;;  %v4302_v47 = vmul.f32 %v10442_v25, %v10442_v25  ;;  %v7954_v57 = vld [vmem:[%s9481_s9 + $0xc8] ss:$16 sps:$4 sm:$0xff]   ;;  %v7959_v44 = vld [vmem:[%s9481_s9 + $0xe4] ss:$16 sps:$4 sm:$0xff]  }
0x122f   : > { %4687 = vmatpush1.bf16.msra.mxu0 %v7954_v57  ;;  %4615 = vmatprep.subr.bf16.mxu1 %v7959_v44 }
0x1230   : > { %v10450_v33 = vsub.f32 %v10415_v40, %v4288_v53  ;;  %4310 = vadd.xlane.f32.xlu0 %v4302_v47  ;;  %v4303_v9 = vmul.f32 %v10445_v54, %v10445_v54  ;;  %v7962_v53 = vld [vmem:[%s9481_s9 + $0xec] ss:$16 sps:$4 sm:$0xff]   ;;  %v7957_v47 = vld [vmem:[%s9481_s9 + $0xe0] ss:$16 sps:$4 sm:$0xff]  }
0x1231   : > { %v4277_v43 = vpop.xlane.xlu0 %4276  ;;  %4688 = vmatprep.subr.bf16.mxu0 %v7962_v53  ;;  %4616 = vmatpush1.bf16.msra.mxu1 %v7957_v47 }
0x1232   : > { %v4289_v13 = vmul.f32 0.0078125, %v4277_v43  ;;  %4312 = vadd.xlane.f32.xlu1 %v4303_v9  ;;  %v4304_v45 = vmul.f32 %v10450_v33, %v10450_v33  ;;  %v7960_v9 = vld [vmem:[%s9481_s9 + $0xe8] ss:$16 sps:$4 sm:$0xff]   ;;  %v1795_v43 = vsub.s32 4, %v9731_v18 }
0x1233   : > { %4689 = vmatpush1.bf16.msra.mxu0 %v7960_v9 }
0x1234   : > { %v10457_v35 = vsub.f32 %v10418_v50, %v4289_v13  ;;  %4314 = vadd.xlane.f32.xlu0 %v4304_v45 }
0x1235   : > { %v4279_v34 = vpop.xlane.xlu0 %4278 }
0x1236   : > { %v4290_v58 = vmul.f32 0.0078125, %v4279_v34  ;;  %v4305_v23 = vmul.f32 %v10457_v35, %v10457_v35 }
0x1237   : > { %v4281_v63 = vpop.xlane.xlu1 %4280 }
0x1238   : > { %v10462_v21 = vsub.f32 %v10421_v11, %v4290_v58  ;;  %v4291_v62 = vmul.f32 0.0078125, %v4281_v63  ;;  %4316 = vadd.xlane.f32.xlu1 %v4305_v23  ;;  %v8231_v63 = vld [vmem:[%s9475_s12] sm:$0x3f] }
0x1239   : > { %v4283_v6 = vpop.xlane.xlu0 %4282 }
0x123a   : > { %v10465_v30 = vsub.f32 %v10424_v12, %v4291_v62  ;;  %v4292_v59 = vmul.f32 0.0078125, %v4283_v6  ;;  %v4306_v52 = vmul.f32 %v10462_v21, %v10462_v21  ;;  %v1796_v62 = vrot.slane %v8231_v63, %v1795_v43 }
0x123b   : > { %v4285_v4 = vpop.xlane.xlu1 %4284 }
0x123c   : > { %v10470_v10 = vsub.f32 %v10427_v16, %v4292_v59  ;;  %v4293_v3 = vmul.f32 0.0078125, %v4285_v4  ;;  %4318 = vadd.xlane.f32.xlu0 %v4306_v52  ;;  %v4307_v49 = vmul.f32 %v10465_v30, %v10465_v30  ;;  %v1791_v4 = vsub.s32 3, %v9731_v18 }
0x123e   : > { %v10475_v22 = vsub.f32 %v10430_v48, %v4293_v3  ;;  %4320 = vadd.xlane.f32.xlu1 %v4307_v49  ;;  %v4308_v61 = vmul.f32 %v10470_v10, %v10470_v10  ;;  %v1924_v49 = vadd.f32 %v9742_v38, %v1796_v62  ;;  %v1792_v24 = vrot.slane %v8231_v63, %v1791_v4 }
0x1240   : > { %4322 = vadd.xlane.f32.xlu0 %v4308_v61  ;;  %v4309_v5 = vmul.f32 %v10475_v22, %v10475_v22  ;;  %v4358_v55 = vadd.f32 1.0, %v1924_v49  ;;  %v1885_v37 = vadd.f32 %v9740_v31, %v1792_v24 }
0x1242   : > { %4324 = vadd.xlane.f32.xlu1 %v4309_v5  ;;  %v4362_v7 = vrot.slane %v4358_v55, %v9749_v46  ;;  %v4374_v32 = vrot.slane %v1885_v37, %v9749_v46 }
0x12bd   : > { %v4311_v13 = vpop.xlane.xlu0 %4310 }
0x12be   : > { %v4326_v45 = vmul.f32 0.0078125, %v4311_v13 }
0x12bf   : > { %v4313_v34 = vpop.xlane.xlu1 %4312 }
0x12c0   : > { %v4334_v58 = vadd.f32 1e-06, %v4326_v45  ;;  %v4327_v23 = vmul.f32 0.0078125, %v4313_v34 }
0x12c1   : > { %v4315_v6 = vpop.xlane.xlu0 %4314 }
0x12c2   : > { %8143 = vrsqrt.f32 %v4334_v58  ;;  %v4335_v59 = vadd.f32 1e-06, %v4327_v23  ;;  %v4328_v52 = vmul.f32 0.0078125, %v4315_v6 }
0x12c4   : > { %8145 = vrsqrt.f32 %v4335_v59  ;;  %v4336_v3 = vadd.f32 1e-06, %v4328_v52 }
0x12c5   : > { %v4317_v61 = vpop.xlane.xlu1 %4316 }
0x12c6   : > { %8147 = vrsqrt.f32 %v4336_v3  ;;  %v4329_v2 = vmul.f32 0.0078125, %v4317_v61 }
0x12c8   : > { %v4337_v5 = vadd.f32 1e-06, %v4329_v2 }
0x12c9   : > { %v4319_v8 = vpop.xlane.xlu0 %4318 }
0x12ca   : > { %8149 = vrsqrt.f32 %v4337_v5  ;;  %v4330_v14 = vmul.f32 0.0078125, %v4319_v8 }
0x12cb   : > { %v4321_v36 = vpop.xlane.xlu1 %4320 }
0x12cc   : > { %v8144_v27 = vpop.eup %8143  ;;  %v4338_v42 = vadd.f32 1e-06, %v4330_v14  ;;  %v4331_v29 = vmul.f32 0.0078125, %v4321_v36  ;;  %v7964_v36 = vld [vmem:[%s11338_s8 + $0xc0] sm:$0xff]  }
0x12cd   : > { %v4350_v38 = vmul.f32 %v8144_v27, %v10442_v25  ;;  %v4323_v20 = vpop.xlane.xlu0 %4322  ;;  %6790 = vmatprep.subr.bf16.mxu0 %v7964_v36  ;;  %v7965_v27 = vld [vmem:[%s11338_s8] sm:$0xff]  }
0x12ce   : > { %v8146_v17 = vpop.eup %8145  ;;  %8151 = vrsqrt.f32 %v4338_v42  ;;  %v4339_v60 = vadd.f32 1e-06, %v4331_v29  ;;  %v4332_v51 = vmul.f32 0.0078125, %v4323_v20  ;;  %v7966_v42 = vld [vmem:[%s11338_s8 + $0x80] sm:$0xff]   ;;  %v7967_v29 = vld [vmem:[%s11338_s8 + $0x48] sm:$0xff]   ;;  %v7971_v20 = vld [vmem:[%s11338_s8 + $0x50] sm:$0xff]  }
0x12cf   : > { %v4363_v0 = vmul.f32 %v4362_v7, %v4350_v38  ;;  %v4351_v26 = vmul.f32 %v8146_v17, %v10445_v54  ;;  %v4325_v41 = vpop.xlane.xlu1 %4324  ;;  %v7969_v38 = vld [vmem:[%s11338_s8 + $0x8] sm:$0xff]   ;;  %v7972_v17 = vld [vmem:[%s11338_s8 + $0xd0] sm:$0xff]  }
0x12d0   : > { %v8148_v31 = vpop.eup %8147  ;;  %8153 = vrsqrt.f32 %v4339_v60  ;;  %v4340_v57 = vadd.f32 1e-06, %v4332_v51  ;;  %v4333_v44 = vmul.f32 0.0078125, %v4325_v41  ;;  %v7973_v60 = vld [vmem:[%s11338_s8 + $0x10] sm:$0xff]   ;;  %v7978_v41 = vld [vmem:[%s11338_s8 + $0x98] sm:$0xff]  }
0x12d1   : > { %v4364_v53 = vmul.f32 %v4362_v7, %v4351_v26  ;;  %v4375_v47 = vadd.f32 %v4374_v32, %v4363_v0  ;;  %v4352_v9 = vmul.f32 %v8148_v31, %v10450_v33  ;;  %v7974_v51 = vld [vmem:[%s11338_s8 + $0x90] sm:$0xff]   ;;  %v7976_v0 = vld [vmem:[%s11338_s8 + $0xd8] sm:$0xff]   ;;  %v7979_v31 = vld [vmem:[%s11338_s8 + $0x60] sm:$0xff]  }
0x12d2   : > { %8155 = vrsqrt.f32 %v4340_v57  ;;  %v4341_v25 = vadd.f32 1e-06, %v4333_v44  ;;  %v7977_v26 = vld [vmem:[%s11338_s8 + $0x18] sm:$0xff]   ;;  %v7980_v57 = vld [vmem:[%s11338_s8 + $0xe0] sm:$0xff]  }
0x12d3   : > { %v4376_v43 = vadd.f32 %v4374_v32, %v4364_v53  ;;  %v4365_v13 = vmul.f32 %v4362_v7, %v4352_v9  ;;  %v7981_v44 = vld [vmem:[%s11338_s8 + $0x20] sm:$0xff]   ;;  %v7984_v9 = vld [vmem:[%s11338_s8 + $0xe8] sm:$0xff]  }
0x12d4   : > { %v8150_v45 = vpop.eup %8149  ;;  %8157 = vrsqrt.f32 %v4341_v25  ;;  %v7982_v53 = vld [vmem:[%s11338_s8 + $0xa0] sm:$0xff]   ;;  %v7985_v25 = vld [vmem:[%s11338_s8 + $0x28] sm:$0xff]  }
0x12d5   : > { %v4415_v34 = vpack.c.bf16 %v4376_v43, %v4375_v47  ;;  %v4353_v58 = vmul.f32 %v8150_v45, %v10457_v35  ;;  %v4377_v23 = vadd.f32 %v4374_v32, %v4365_v13  ;;  %v7983_v47 = vld [vmem:[%s11338_s8 + $0x68] sm:$0xff]   ;;  %v7987_v13 = vld [vmem:[%s11338_s8 + $0x70] sm:$0xff]  }
0x12d6   : > { %v7986_v43 = vld [vmem:[%s11338_s8 + $0xa8] sm:$0xff]   ;;  %v7988_v45 = vld [vmem:[%s11338_s8 + $0xf0] sm:$0xff]  }
0x12d7   : > { %4634 = vmatmul.mubr.bf16.vlgmr.msra.gmra.mrb[60].mxu1 %v4415_v34  ;;  %4707 = vmatmul.mubr.bf16.vlgmr.msra.gmra.mrb[48].mxu0 %v4415_v34  ;;  %v4366_v54 = vmul.f32 %v4362_v7, %v4353_v58  ;;  %v7989_v34 = vld [vmem:[%s11338_s8 + $0x30] sm:$0xff]  }
0x12d8   : > { %v8152_v63 = vpop.eup %8151  ;;  %4643 = vmatprep.mubr.bf16.mxu1 %v11324_v56  ;;  %4716 = vmatprep.mubr.bf16.mxu0 %v11324_v56  ;;  %v7990_v58 = vld [vmem:[%s11338_s8 + $0xb0] sm:$0xff]  }
0x12d9   : > { %v4378_v62 = vadd.f32 %v4374_v32, %v4366_v54  ;;  %v4354_v33 = vmul.f32 %v8152_v63, %v10462_v21  ;;  %6791 = vmatpush3.bf16.msra.mxu0 %v7966_v42  ;;  %v7992_v54 = vld [vmem:[%s11338_s8 + $0xf8] sm:$0xff]  }
0x12da   : > { %v8154_v6 = vpop.eup %8153  ;;  %v7993_v63 = vld [vmem:[%s11338_s8 + $0x38] sm:$0xff]  }
0x12db   : > { %v4416_v59 = vpack.c.bf16 %v4378_v62, %v4377_v23  ;;  %v4355_v52 = vmul.f32 %v8154_v6, %v10465_v30  ;;  %v4367_v3 = vmul.f32 %v4362_v7, %v4354_v33  ;;  %v7991_v23 = vld [vmem:[%s11338_s8 + $0x78] sm:$0xff]   ;;  %v4419_v33 = vld [vmem:[%s9518_s14] sm:$0xf] }
0x12dc   : > { %v8156_v49 = vpop.eup %8155  ;;  %v7994_v62 = vld [vmem:[%s11338_s8 + $0xb8] sm:$0xff]   ;;  %v10562_v6 = vrot.slane %v4419_v33, %v9734_v19 }
0x12dd   : > { %v4368_v61 = vmul.f32 %v4362_v7, %v4355_v52  ;;  %v4379_v35 = vadd.f32 %v4374_v32, %v4367_v3  ;;  %v4356_v2 = vmul.f32 %v8156_v49, %v10470_v10  ;;  %v10568_v52 = vrot.slane %v4419_v33, %v9745_v39 }
0x12de   : > { %v8158_v24 = vpop.eup %8157  ;;  %v10572_v3 = vrot.slane %v4419_v33, %v1791_v4 }
0x12df   : > { %4644 = vmatmul.mubr.bf16.gmra.mrb[64].mxu1 %v4416_v59  ;;  %4717 = vmatmul.mubr.bf16.gmra.mrb[52].mxu0 %v4416_v59  ;;  %v4380_v5 = vadd.f32 %v4374_v32, %v4368_v61  ;;  %v4357_v55 = vmul.f32 %v8158_v24, %v10475_v22  ;;  %v4369_v8 = vmul.f32 %v4362_v7, %v4356_v2  ;;  %v7963_v22 = vld [vmem:[%s11338_s8 + $0x40] sm:$0xff]  }
0x12e0   : > { %4653 = vmatprep.mubr.bf16.mxu1 %v11324_v56  ;;  %4726 = vmatprep.mubr.bf16.mxu0 %v11324_v56  ;;  %v10565_v59 = vrot.slane %v4419_v33, %v9749_v46 }
0x12e1   : > { %v4417_v21 = vpack.c.bf16 %v4380_v5, %v4379_v35  ;;  %v4370_v30 = vmul.f32 %v4362_v7, %v4357_v55  ;;  %v4381_v14 = vadd.f32 %v4374_v32, %v4369_v8  ;;  %6750 = vmatprep.subr.bf16.mxu1 %v7963_v22  ;;  %v7968_v7 = vld [vmem:[%s11338_s8 + $0xc8] sm:$0xff]  }
0x12e2   : > { %6751 = vmatpush3.bf16.msra.mxu1 %v7965_v27  ;;  %6792 = vmatprep.subr.bf16.mxu0 %v7968_v7 }
0x12e3   : > { %v4382_v37 = vadd.f32 %v4374_v32, %v4370_v30  ;;  %6752 = vmatprep.subr.bf16.mxu1 %v7967_v29  ;;  %v7975_v32 = vld [vmem:[%s11338_s8 + $0x58] sm:$0xff]  }
0x12e5   : > { %v4418_v10 = vpack.c.bf16 %v4382_v37, %v4381_v14 }
0x12e6   : > { %6753 = vmatpush3.bf16.msra.mxu1 %v7969_v38 }
0x12e7   : > { %4654 = vmatmul.mubr.bf16.gmra.mrb[68].mxu1 %v4417_v21  ;;  %4727 = vmatmul.mubr.bf16.gmra.mrb[56].mxu0 %v4417_v21 }
0x12e8   : > { %4663 = vmatprep.mubr.bf16.mxu1 %v11324_v56  ;;  %4736 = vmatprep.mubr.bf16.mxu0 %v11324_v56  ;;  %v7970_v56 = vld [vmem:[%s11338_s8 + $0x88] sm:$0xff]  }
0x12e9   : > { %6793 = vmatpush3.bf16.msra.mxu0 %v7970_v56  ;;  %6754 = vmatprep.subr.bf16.mxu1 %v7971_v20 }
0x12ea   : > { %6794 = vmatprep.subr.bf16.mxu0 %v7972_v17  ;;  %6755 = vmatpush3.bf16.msra.mxu1 %v7973_v60 }
0x12eb   : > { %6756 = vmatprep.subr.bf16.mxu1 %v7975_v32 }
0x12ed   : > { %6795 = vmatpush3.bf16.msra.mxu0 %v7974_v51 }
0x12ee   : > { %6796 = vmatprep.subr.bf16.mxu0 %v7976_v0  ;;  %6757 = vmatpush3.bf16.msra.mxu1 %v7977_v26 }
0x12ef   : > { %4664 = vmatmul.mubr.bf16.gmra.mrb[72].mxu1 %v4418_v10  ;;  %4737 = vmatmul.mubr.bf16.gmra.mrb[60].mxu0 %v4418_v10 }
0x12f0   : > { %6758 = vmatprep.subr.bf16.mxu1 %v7979_v31 }
0x12f1   : > { %6797 = vmatpush3.bf16.msra.mxu0 %v7978_v41 }
0x12f2   : > { %6798 = vmatprep.subr.bf16.mxu0 %v7980_v57  ;;  %6759 = vmatpush3.bf16.msra.mxu1 %v7981_v44 }
0x12f3   : > { %6760 = vmatprep.subr.bf16.mxu1 %v7983_v47 }
0x12f5   : > { %6799 = vmatpush3.bf16.msra.mxu0 %v7982_v53 }
0x12f6   : > { %6800 = vmatprep.subr.bf16.mxu0 %v7984_v9  ;;  %6761 = vmatpush3.bf16.msra.mxu1 %v7985_v25 }
0x12f7   : > { %6762 = vmatprep.subr.bf16.mxu1 %v7987_v13 }
0x12f9   : > { %6801 = vmatpush3.bf16.msra.mxu0 %v7986_v43 }
0x12fa   : > { %6802 = vmatprep.subr.bf16.mxu0 %v7988_v45  ;;  %6763 = vmatpush3.bf16.msra.mxu1 %v7989_v34 }
0x12fb   : > { %6764 = vmatprep.subr.bf16.mxu1 %v7991_v23 }
0x12fd   : > { %6803 = vmatpush3.bf16.msra.mxu0 %v7990_v58 }
0x12fe   : > { %6804 = vmatprep.subr.bf16.mxu0 %v7992_v54  ;;  %6765 = vmatpush3.bf16.msra.mxu1 %v7993_v63 }
0x1301   : > { %6805 = vmatpush3.bf16.msra.mxu0 %v7994_v62 }
0x13aa   : > { %v4635_v49 = vpop.f32.mrb[60].mxu1  ;;  %v4708_v61 = vpop.f32.mrb[48].mxu0 }
0x13ab   : > { %v4636_v35 = vadd.f32 %v4635_v49, %v10565_v59  ;;  %v4709_v2 = vadd.f32 %v4708_v61, %v10562_v6  ;;  %v4637_v24 = vpop.f32.mrb[61].mxu1  ;;  %v4710_v5 = vpop.f32.mrb[49].mxu0 }
0x13ac   : > { %v10577_v19 = vadd.f32 %v4637_v24, %v10568_v52  ;;  %v10580_v55 = vadd.f32 %v4710_v5, %v10572_v3  ;;  %v4639_v8 = vpop.f32.mrb[62].mxu1  ;;  %v4712_v21 = vpop.f32.mrb[50].mxu0 }
0x13ad   : > { %v4779_v30 = vmul.f32 0.044715, %v4636_v35  ;;  %v4781_v14 = vmul.f32 0.044715, %v4709_v2  ;;  %v4640_v10 = vadd.f32 %v4639_v8, %v10565_v59  ;;  %v4713_v22 = vadd.f32 %v4712_v21, %v10562_v6  ;;  %v4641_v36 = vpop.f32.mrb[63].mxu1  ;;  %v4714_v27 = vpop.f32.mrb[51].mxu0 }
0x13ae   : > { %v4780_v4 = vmul.f32 0.044715, %v10577_v19  ;;  %v4782_v37 = vmul.f32 0.044715, %v10580_v55  ;;  %v10587_v7 = vadd.f32 %v4641_v36, %v10568_v52  ;;  %v10590_v38 = vadd.f32 %v4714_v27, %v10572_v3 }
0x13af   : > { %v4811_v42 = vmul.f32 %v4779_v30, %v4636_v35  ;;  %v4813_v29 = vmul.f32 %v4781_v14, %v4709_v2  ;;  %v4783_v56 = vmul.f32 0.044715, %v4640_v10  ;;  %v4785_v60 = vmul.f32 0.044715, %v4713_v22 }
0x13b0   : > { %v4812_v51 = vmul.f32 %v4780_v4, %v10577_v19  ;;  %v4814_v31 = vmul.f32 %v4782_v37, %v10580_v55  ;;  %v4784_v44 = vmul.f32 0.044715, %v10587_v7  ;;  %v10601_v58 = vmul.f32 0.5, %v4636_v35 }
0x13b1   : > { %v4843_v20 = vmul.f32 %v4811_v42, %v4636_v35  ;;  %v4845_v17 = vmul.f32 %v4813_v29, %v4709_v2  ;;  %v4815_v32 = vmul.f32 %v4783_v56, %v4640_v10  ;;  %v4817_v57 = vmul.f32 %v4785_v60, %v4713_v22 }
0x13b2   : > { %v4645_v0 = vpop.f32.mrb[64].mxu1  ;;  %v4718_v26 = vpop.f32.mrb[52].mxu0  ;;  %v10603_v23 = vmul.f32 0.5, %v4709_v2  ;;  %v4786_v63 = vmul.f32 0.044715, %v10590_v38  ;;  %v10606_v61 = vmul.f32 0.5, %v4640_v10  ;;  %v10616_v14 = vmul.f32 %v4812_v51, %v10577_v19 }
0x13b3   : > { %v4875_v41 = vadd.f32 %v4843_v20, %v4636_v35  ;;  %v4647_v53 = vpop.f32.mrb[65].mxu1  ;;  %v4720_v47 = vpop.f32.mrb[53].mxu0  ;;  %v4877_v9 = vadd.f32 %v4845_v17, %v4709_v2  ;;  %v4847_v25 = vmul.f32 %v4815_v32, %v4640_v10  ;;  %v10596_v43 = vadd.f32 %v4645_v0, %v10565_v59 }
0x13b4   : > { %v10599_v13 = vadd.f32 %v4718_v26, %v10562_v6  ;;  %v4649_v45 = vpop.f32.mrb[66].mxu1  ;;  %v4722_v34 = vpop.f32.mrb[54].mxu0  ;;  %v4849_v54 = vmul.f32 %v4817_v57, %v4713_v22  ;;  %v10609_v8 = vmul.f32 0.5, %v4713_v22  ;;  %v10613_v35 = vadd.f32 %v4647_v53, %v10568_v52 }
0x13b5   : > { %v4651_v62 = vpop.f32.mrb[67].mxu1  ;;  %v4724_v33 = vpop.f32.mrb[55].mxu0  ;;  %v4907_v49 = vmul.f32 0.7978846, %v4875_v41  ;;  %v4879_v24 = vadd.f32 %v4847_v25, %v4640_v10  ;;  %v4787_v5 = vmul.f32 0.044715, %v10596_v43  ;;  %v10619_v4 = vmul.f32 %v4814_v31, %v10580_v55 }
0x13b6   : > { %11339 = vst [vmem:[#allocation56_spill] sm:$0xff] %v10599_v13  ;;  %v4881_v21 = vadd.f32 %v4849_v54, %v4713_v22  ;;  %v4789_v30 = vmul.f32 0.044715, %v10599_v13  ;;  %v4909_v2 = vmul.f32 0.7978846, %v4877_v9  ;;  %v4816_v37 = vmul.f32 %v4784_v44, %v10587_v7 }
0x13b7   : > { %v4818_v10 = vmul.f32 %v4786_v63, %v10590_v38  ;;  %v4788_v36 = vmul.f32 0.044715, %v10613_v35  ;;  %v10625_v22 = vadd.f32 %v4720_v47, %v10572_v3  ;;  %v10628_v27 = vadd.f32 %v4649_v45, %v10565_v59 }
0x13b8   : > { %8159 = vtanh.f32 %v4907_v49  ;;  %v4911_v42 = vmul.f32 0.7978846, %v4879_v24  ;;  %v4819_v29 = vmul.f32 %v4787_v5, %v10596_v43  ;;  %v10632_v56 = vadd.f32 %v4722_v34, %v10562_v6 }
0x13b9   : > { %11340 = vst [vmem:[#allocation57_spill] sm:$0xff] %v10628_v27  ;;  %v4913_v60 = vmul.f32 0.7978846, %v4881_v21  ;;  %v4821_v51 = vmul.f32 %v4789_v30, %v10599_v13  ;;  %v4820_v32 = vmul.f32 %v4788_v36, %v10613_v35  ;;  %v4790_v0 = vmul.f32 0.044715, %v10625_v22 }
0x13ba   : > { %11341 = vst [vmem:[#allocation58_spill] sm:$0xff] %v10632_v56  ;;  %v4655_v20 = vpop.f32.mrb[68].mxu1  ;;  %v4728_v17 = vpop.f32.mrb[56].mxu0  ;;  %v4791_v31 = vmul.f32 0.044715, %v10628_v27  ;;  %v10639_v57 = vadd.f32 %v4651_v62, %v10568_v52  ;;  %v10642_v44 = vadd.f32 %v4724_v33, %v10572_v3  ;;  %8161 = vtanh.f32 %v4909_v2 }
0x13bb   : > { %v4657_v26 = vpop.f32.mrb[69].mxu1  ;;  %v4730_v41 = vpop.f32.mrb[57].mxu0  ;;  %v10645_v53 = vadd.f32 %v4655_v20, %v10565_v59  ;;  %v10648_v25 = vmul.f32 %v4816_v37, %v10587_v7  ;;  %v4793_v45 = vmul.f32 0.044715, %v10632_v56  ;;  %v10652_v34 = vadd.f32 %v4728_v17, %v10562_v6 }
0x13bc   : > { %v4659_v47 = vpop.f32.mrb[70].mxu1  ;;  %v4732_v9 = vpop.f32.mrb[58].mxu0  ;;  %8163 = vtanh.f32 %v4911_v42  ;;  %v10655_v62 = vmul.f32 %v4818_v10, %v10590_v38  ;;  %v4822_v33 = vmul.f32 %v4790_v0, %v10625_v22  ;;  %v4792_v49 = vmul.f32 0.044715, %v10639_v57 }
0x13bd   : > { %v4661_v54 = vpop.f32.mrb[71].mxu1  ;;  %v4734_v63 = vpop.f32.mrb[59].mxu0  ;;  %v10660_v24 = vmul.f32 %v4819_v29, %v10596_v43  ;;  %v4794_v5 = vmul.f32 0.044715, %v10642_v44  ;;  %v4795_v21 = vmul.f32 0.044715, %v10645_v53  ;;  %v10665_v30 = vadd.f32 %v4657_v26, %v10568_v52 }
0x13be   : > { %8165 = vtanh.f32 %v4913_v60  ;;  %v10668_v2 = vmul.f32 %v4821_v51, %v10599_v13  ;;  %v10671_v37 = vmul.f32 %v4820_v32, %v10613_v35  ;;  %v4823_v10 = vmul.f32 %v4791_v31, %v10628_v27 }
0x13bf   : > { %v4825_v36 = vmul.f32 %v4793_v45, %v10632_v56  ;;  %v4797_v42 = vmul.f32 0.044715, %v10652_v34  ;;  %v10677_v29 = vadd.f32 %v4730_v41, %v10572_v3  ;;  %v10680_v20 = vadd.f32 %v4659_v47, %v10565_v59 }
0x13c0   : > { %11342 = vst [vmem:[#allocation59_spill] sm:$0xff] %v10668_v2  ;;  %v10683_v17 = vmul.f32 %v4822_v33, %v10625_v22  ;;  %v4824_v60 = vmul.f32 %v4792_v49, %v10639_v57  ;;  %v4796_v51 = vmul.f32 0.044715, %v10665_v30  ;;  %v10688_v32 = vadd.f32 %v4732_v9, %v10562_v6 }
0x13c1   : > { %v4826_v31 = vmul.f32 %v4794_v5, %v10642_v44  ;;  %v4827_v41 = vmul.f32 %v4795_v21, %v10645_v53  ;;  %v4798_v45 = vmul.f32 0.044715, %v10677_v29  ;;  %v4799_v47 = vmul.f32 0.044715, %v10680_v20 }
0x13c2   : > { %v4665_v0 = vpop.f32.mrb[72].mxu1  ;;  %v4738_v26 = vpop.f32.mrb[60].mxu0  ;;  %v4801_v49 = vmul.f32 0.044715, %v10688_v32  ;;  %v10698_v16 = vadd.f32 %v4661_v54, %v10568_v52  ;;  %v10701_v9 = vadd.f32 %v4734_v63, %v10572_v3  ;;  %v10707_v11 = vmul.f32 %v4823_v10, %v10628_v27 }
0x13c3   : > { %v4667_v39 = vpop.f32.mrb[73].mxu1  ;;  %v4740_v33 = vpop.f32.mrb[61].mxu0  ;;  %v10704_v5 = vadd.f32 %v4665_v0, %v10565_v59  ;;  %v10710_v50 = vmul.f32 %v4825_v36, %v10632_v56  ;;  %v4829_v40 = vmul.f32 %v4797_v42, %v10652_v34  ;;  %v10714_v15 = vadd.f32 %v4738_v26, %v10562_v6 }
0x13c4   : > { %v10694_v48 = vpop.eup %8159  ;;  %v4669_v21 = vpop.f32.mrb[74].mxu1  ;;  %11343 = vst [vmem:[#allocation60_spill] sm:$0xff] %v10707_v11  ;;  %v10717_v63 = vmul.f32 %v4824_v60, %v10639_v57  ;;  %v4800_v0 = vmul.f32 0.044715, %v10698_v16  ;;  %v4802_v46 = vmul.f32 0.044715, %v10701_v9  ;;  %v10723_v36 = vmul.f32 %v4826_v31, %v10642_v44 }
0x13c5   : > { %v4742_v12 = vpop.f32.mrb[62].mxu0  ;;  %11344 = vst [vmem:[#allocation61_spill] sm:$0xff] %v10710_v50  ;;  %11345 = vst [vmem:[#allocation62_spill] sm:$0xff] %v10714_v15  ;;  %v4671_v54 = vpop.f32.mrb[75].mxu1  ;;  %v4803_v10 = vmul.f32 0.044715, %v10704_v5  ;;  %v4828_v42 = vmul.f32 %v4796_v51, %v10665_v30  ;;  %v10728_v18 = vadd.f32 %v4667_v39, %v10568_v52  ;;  %v10731_v60 = vmul.f32 %v4827_v41, %v10645_v53 }
0x13c6   : > { %v4744_v1 = vpop.f32.mrb[63].mxu0  ;;  %v8162_v28 = vpop.eup %8161  ;;  %v4805_v26 = vmul.f32 0.044715, %v10714_v15  ;;  %v4830_v56 = vmul.f32 %v4798_v45, %v10677_v29  ;;  %v4831_v2 = vmul.f32 %v4799_v47, %v10680_v20  ;;  %v4833_v13 = vmul.f32 %v4801_v49, %v10688_v32 }
0x13c7   : > { %v8164_v50 = vpop.eup %8163  ;;  %11346 = vst [vmem:[#allocation63_spill] sm:$0xff] %v10731_v60  ;;  %v4832_v31 = vmul.f32 %v4800_v0, %v10698_v16  ;;  %v4804_v11 = vmul.f32 0.044715, %v10728_v18  ;;  %v10739_v51 = vadd.f32 %v4740_v33, %v10572_v3  ;;  %v10742_v39 = vadd.f32 %v4669_v21, %v10565_v59 }
0x13c8   : > { %v8166_v27 = vpop.eup %8165  ;;  %v10745_v41 = vmul.f32 %v4829_v40, %v10652_v34  ;;  %v4834_v45 = vmul.f32 %v4802_v46, %v10701_v9  ;;  %v4835_v47 = vmul.f32 %v4803_v10, %v10704_v5  ;;  %v10750_v49 = vadd.f32 %v4742_v12, %v10562_v6 }
0x13c9   : > { %v10753_v0 = vmul.f32 %v4828_v42, %v10665_v30  ;;  %v4837_v33 = vmul.f32 %v4805_v26, %v10714_v15  ;;  %v4836_v60 = vmul.f32 %v4804_v11, %v10728_v18  ;;  %v4806_v59 = vmul.f32 0.044715, %v10739_v51 }
0x13ca   : > { %v4807_v21 = vmul.f32 0.044715, %v10742_v39  ;;  %v4809_v40 = vmul.f32 0.044715, %v10750_v49  ;;  %v10761_v46 = vadd.f32 %v4671_v54, %v10568_v52  ;;  %v10764_v10 = vadd.f32 %v4744_v1, %v10572_v3 }
0x13cb   : > { %v10767_v12 = vmul.f32 %v4830_v56, %v10677_v29  ;;  %v10770_v6 = vmul.f32 %v4831_v2, %v10680_v20  ;;  %v10773_v11 = vmul.f32 %v4833_v13, %v10688_v32  ;;  %v10776_v42 = vmul.f32 %v4832_v31, %v10698_v16 }
0x13cc   : > { %v10779_v26 = vmul.f32 %v4834_v45, %v10701_v9  ;;  %v10782_v52 = vmul.f32 %v4835_v47, %v10704_v5  ;;  %v4838_v1 = vmul.f32 %v4806_v59, %v10739_v51  ;;  %v4876_v3 = vadd.f32 %v10616_v14, %v10577_v19 }
0x13cd   : > { %v10788_v56 = vmul.f32 %v4837_v33, %v10714_v15  ;;  %v10791_v13 = vmul.f32 %v4836_v60, %v10728_v18  ;;  %v10794_v2 = vmul.f32 0.5, %v10577_v19  ;;  %v4880_v54 = vadd.f32 %v10648_v25, %v10587_v7 }
0x13ce   : > { %v4839_v31 = vmul.f32 %v4807_v21, %v10742_v39  ;;  %v4841_v45 = vmul.f32 %v4809_v40, %v10750_v49  ;;  %v10801_v47 = vmul.f32 0.5, %v10587_v7  ;;  %v4908_v14 = vmul.f32 0.7978846, %v4876_v3 }
0x13cf   : > { %11347 = vst [vmem:[#allocation64_spill] sm:$0xff] %v10788_v56  ;;  %v4808_v33 = vmul.f32 0.044715, %v10761_v46  ;;  %v4912_v59 = vmul.f32 0.7978846, %v4880_v54  ;;  %v4878_v60 = vadd.f32 %v10619_v4, %v10580_v55  ;;  %v4882_v19 = vadd.f32 %v10655_v62, %v10590_v38 }
0x13d0   : > { %v10809_v56 = vmul.f32 %v4838_v1, %v10739_v51  ;;  %v4810_v25 = vmul.f32 0.044715, %v10764_v10  ;;  %8167 = vtanh.f32 %v4908_v14  ;;  %v4971_v21 = vadd.f32 1.0, %v10694_v48 }
0x13d1   : > { %8169 = vtanh.f32 %v4912_v59  ;;  %v4910_v7 = vmul.f32 0.7978846, %v4878_v60  ;;  %v4914_v40 = vmul.f32 0.7978846, %v4882_v19  ;;  %v4975_v3 = vadd.f32 1.0, %v8164_v50 }
0x13d2   : > { %v10814_v54 = vmul.f32 %v4839_v31, %v10742_v39  ;;  %v10817_v4 = vmul.f32 0.5, %v10580_v55  ;;  %v4973_v15 = vadd.f32 1.0, %v8162_v28  ;;  %v4977_v62 = vadd.f32 1.0, %v8166_v27 }
0x13d3   : > { %8171 = vtanh.f32 %v4910_v7  ;;  %v10820_v1 = vmul.f32 %v4971_v21, %v10601_v58  ;;  %v10823_v14 = vmul.f32 %v4975_v3, %v10606_v61  ;;  %v4884_v48 = vadd.f32 %v10671_v37, %v10613_v35  ;;  %v11349_v21 = vld [vmem:[#allocation60_spill] sm:$0xff]  ;;  %v11351_v3 = vld [vmem:[#allocation59_spill] sm:$0xff] }
0x13d4   : > { %8173 = vtanh.f32 %v4914_v40  ;;  %v10828_v50 = vmul.f32 %v4973_v15, %v10603_v23  ;;  %v10831_v31 = vmul.f32 %v4977_v62, %v10609_v8  ;;  %v4888_v28 = vadd.f32 %v10717_v63, %v10639_v57  ;;  %v11350_v40 = vld [vmem:[#allocation56_spill] sm:$0xff] }
0x13d5   : > { %v4840_v55 = vmul.f32 %v4808_v33, %v10761_v46  ;;  %v4842_v58 = vmul.f32 %v4810_v25, %v10764_v10  ;;  %v5099_v61 = vpack.c.bf16 %v10823_v14, %v10820_v1  ;;  %v4916_v27 = vmul.f32 0.7978846, %v4884_v48  ;;  %v11348_v25 = vld [vmem:[#allocation57_spill] sm:$0xff]  ;;  %v11352_v14 = vld [vmem:[#allocation58_spill] sm:$0xff] }
0x13d6   : > { %v5101_v37 = vpack.c.bf16 %v10831_v31, %v10828_v50  ;;  %v4920_v59 = vmul.f32 0.7978846, %v4888_v28  ;;  %v4886_v15 = vadd.f32 %v10683_v17, %v10625_v22  ;;  %v4890_v23 = vadd.f32 %v10723_v36, %v10642_v44  ;;  %v11353_v48 = vld [vmem:[#allocation61_spill] sm:$0xff] }
0x13d7   : > { %v10846_v8 = vmul.f32 %v4841_v45, %v10750_v49  ;;  %v4754_v63 = vmul.f32 0.5, %v10590_v38  ;;  %8175 = vtanh.f32 %v4916_v27  ;;  %v4883_v33 = vadd.f32 %v10660_v24, %v10596_v43 }
0x13d8   : > { %8177 = vtanh.f32 %v4920_v59  ;;  %v4918_v60 = vmul.f32 0.7978846, %v4886_v15  ;;  %v4922_v19 = vmul.f32 0.7978846, %v4890_v23  ;;  %v4887_v7 = vadd.f32 %v11349_v21, %v11348_v25 }
0x13d9   : > { %v10854_v17 = vmul.f32 %v4840_v55, %v10761_v46  ;;  %v10857_v36 = vmul.f32 %v4842_v58, %v10764_v10  ;;  %v4915_v45 = vmul.f32 0.7978846, %v4883_v33  ;;  %v4885_v38 = vadd.f32 %v11351_v3, %v11350_v40 }
0x13da   : > { %v8168_v62 = vpop.eup %8167  ;;  %v4756_v1 = vmul.f32 0.5, %v10613_v35  ;;  %8179 = vtanh.f32 %v4918_v60  ;;  %v4919_v24 = vmul.f32 0.7978846, %v4887_v7  ;;  %v4889_v28 = vadd.f32 %v11353_v48, %v11352_v14 }
0x13db   : > { %v8170_v27 = vpop.eup %8169  ;;  %v4972_v59 = vadd.f32 1.0, %v8168_v62  ;;  %v4760_v55 = vmul.f32 0.5, %v10639_v57  ;;  %8181 = vtanh.f32 %v4922_v19  ;;  %v4917_v15 = vmul.f32 0.7978846, %v4885_v38 }
0x13dc   : > { %v4976_v58 = vadd.f32 1.0, %v8170_v27  ;;  %8183 = vtanh.f32 %v4915_v45  ;;  %v4921_v23 = vmul.f32 0.7978846, %v4889_v28  ;;  %v4892_v33 = vadd.f32 %v10753_v0, %v10665_v30 }
0x13dd   : > { %v8172_v21 = vpop.eup %8171  ;;  %v5004_v35 = vmul.f32 %v4972_v59, %v10794_v2  ;;  %v4758_v60 = vmul.f32 0.5, %v10625_v22  ;;  %8185 = vtanh.f32 %v4919_v24  ;;  %v4896_v7 = vadd.f32 %v10776_v42, %v10698_v16 }
0x13de   : > { %v8174_v3 = vpop.eup %8173  ;;  %v5008_v57 = vmul.f32 %v4976_v58, %v10801_v47  ;;  %v4974_v19 = vadd.f32 1.0, %v8172_v21  ;;  %8187 = vtanh.f32 %v4917_v15  ;;  %v4924_v38 = vmul.f32 0.7978846, %v4892_v33 }
0x13df   : > { %v4978_v45 = vadd.f32 1.0, %v8174_v3  ;;  %v4762_v62 = vmul.f32 0.5, %v10642_v44  ;;  %8189 = vtanh.f32 %v4921_v23  ;;  %v4928_v0 = vmul.f32 0.7978846, %v4896_v7 }
0x13e0   : > { %v5100_v48 = vpack.c.bf16 %v5008_v57, %v5004_v35  ;;  %v4755_v2 = vmul.f32 0.5, %v10596_v43  ;;  %8191 = vtanh.f32 %v4924_v38  ;;  %v4894_v22 = vadd.f32 %v10767_v12, %v10677_v29  ;;  %v11354_v43 = vld [vmem:[#allocation63_spill] sm:$0xff] }
0x13e1   : > { %v8176_v24 = vpop.eup %8175  ;;  %v5006_v42 = vmul.f32 %v4974_v19, %v10817_v4  ;;  %v5010_v28 = vmul.f32 %v4978_v45, %v4754_v63  ;;  %8193 = vtanh.f32 %v4928_v0  ;;  %v4898_v47 = vadd.f32 %v10779_v26, %v10701_v9 }
0x13e2   : > { %v8178_v27 = vpop.eup %8177  ;;  %5346 = vmatprep.mubr.bf16.mxu1 %v5100_v48  ;;  %v4980_v44 = vadd.f32 1.0, %v8176_v24  ;;  %v4759_v59 = vmul.f32 0.5, %v11348_v25  ;;  %v4926_v15 = vmul.f32 0.7978846, %v4894_v22  ;;  %v4891_v58 = vadd.f32 %v11354_v43, %v10645_v53 }
0x13e3   : > { %v5102_v23 = vpack.c.bf16 %v5010_v28, %v5006_v42  ;;  %5347 = vmatmul.mubr.bf16.vlgmr.msra.gmra.mrb[76].mxu1 %v5099_v61  ;;  %v4984_v12 = vadd.f32 1.0, %v8178_v27  ;;  %v4930_v33 = vmul.f32 0.7978846, %v4898_v47  ;;  %v4895_v4 = vadd.f32 %v10770_v6, %v10680_v20 }
0x13e4   : > { %v8180_v63 = vpop.eup %8179  ;;  %v5012_v21 = vmul.f32 %v4980_v44, %v4756_v1  ;;  %v4757_v26 = vmul.f32 0.5, %v11350_v40  ;;  %8195 = vtanh.f32 %v4926_v15  ;;  %v4923_v35 = vmul.f32 0.7978846, %v4891_v58 }
0x13e5   : > { %v8182_v7 = vpop.eup %8181  ;;  %5411 = vmatprep.mubr.bf16.mxu0 %v5102_v23  ;;  %v5016_v25 = vmul.f32 %v4984_v12, %v4760_v55  ;;  %v4982_v3 = vadd.f32 1.0, %v8180_v63  ;;  %8197 = vtanh.f32 %v4930_v33  ;;  %v4927_v57 = vmul.f32 0.7978846, %v4895_v4 }
0x13e6   : > { %v8184_v19 = vpop.eup %8183  ;;  %5412 = vmatmul.mubr.bf16.vlgmr.msra.gmra.mrb[64].mxu0 %v5101_v37  ;;  %v4986_v61 = vadd.f32 1.0, %v8182_v7  ;;  %v4761_v6 = vmul.f32 0.5, %v11352_v14  ;;  %8199 = vtanh.f32 %v4923_v35  ;;  %v4893_v40 = vadd.f32 %v10745_v41, %v10652_v34 }
0x13e7   : > { %v8186_v1 = vpop.eup %8185  ;;  %v5104_v38 = vpack.c.bf16 %v5016_v25, %v5012_v21  ;;  %v5014_v45 = vmul.f32 %v4982_v3, %v4758_v60  ;;  %v4979_v0 = vadd.f32 1.0, %v8184_v19  ;;  %8201 = vtanh.f32 %v4927_v57 }
0x13e8   : > { %v8188_v55 = vpop.eup %8187  ;;  %v5018_v48 = vmul.f32 %v4986_v61, %v4762_v62  ;;  %v4983_v22 = vadd.f32 1.0, %v8186_v1  ;;  %v4897_v24 = vadd.f32 %v10773_v11, %v10688_v32  ;;  %v4925_v50 = vmul.f32 0.7978846, %v4893_v40 }
0x13e9   : > { %v8190_v31 = vpop.eup %8189  ;;  %5354 = vmatprep.mubr.bf16.mxu1 %v5104_v38  ;;  %v5011_v37 = vmul.f32 %v4979_v0, %v4755_v2  ;;  %v4981_v14 = vadd.f32 1.0, %v8188_v55  ;;  %v4764_v42 = vmul.f32 0.5, %v10665_v30  ;;  %v4768_v41 = vmul.f32 0.5, %v10698_v16 }
0x13ea   : > { %v8192_v28 = vpop.eup %8191  ;;  %v5106_v47 = vpack.c.bf16 %v5018_v48, %v5014_v45  ;;  %v5015_v60 = vmul.f32 %v4983_v22, %v4759_v59  ;;  %v4985_v27 = vadd.f32 1.0, %v8190_v31  ;;  %v4929_v44 = vmul.f32 0.7978846, %v4897_v24  ;;  %v11355_v24 = vld [vmem:[#allocation62_spill] sm:$0xff] }
0x13eb   : > { %v8194_v15 = vpop.eup %8193  ;;  %v5013_v62 = vmul.f32 %v4981_v14, %v4757_v26  ;;  %v4988_v43 = vadd.f32 1.0, %v8192_v28  ;;  %8203 = vtanh.f32 %v4925_v50  ;;  %v4900_v11 = vadd.f32 %v10791_v13, %v10728_v18  ;;  %v11356_v50 = vld [vmem:[#allocation64_spill] sm:$0xff] }
0x13ec   : > { %5419 = vmatprep.mubr.bf16.mxu0 %v5106_v47  ;;  %v5103_v58 = vpack.c.bf16 %v5015_v60, %v5011_v37  ;;  %v5017_v2 = vmul.f32 %v4985_v27, %v4761_v6  ;;  %v4992_v23 = vadd.f32 1.0, %v8194_v15  ;;  %8205 = vtanh.f32 %v4929_v44 }
0x13ed   : > { %v4766_v30 = vmul.f32 0.5, %v10677_v29  ;;  %v4770_v16 = vmul.f32 0.5, %v10701_v9  ;;  %v4904_v59 = vadd.f32 %v10854_v17, %v10761_v46  ;;  %v4932_v12 = vmul.f32 0.7978846, %v4900_v11 }
0x13ee   : > { %v8196_v33 = vpop.eup %8195  ;;  %5355 = vmatmul.mubr.bf16.gmra.mrb[80].mxu1 %v5103_v58  ;;  %v5105_v4 = vpack.c.bf16 %v5017_v2, %v5013_v62  ;;  %v5020_v63 = vmul.f32 %v4988_v43, %v4764_v42  ;;  %v5024_v21 = vmul.f32 %v4992_v23, %v4768_v41  ;;  %v4902_v13 = vadd.f32 %v10809_v56, %v10739_v51 }
0x13ef   : > { %v8198_v26 = vpop.eup %8197  ;;  %v4990_v35 = vadd.f32 1.0, %v8196_v33  ;;  %v4936_v7 = vmul.f32 0.7978846, %v4904_v59  ;;  %8207 = vtanh.f32 %v4932_v12  ;;  %v4906_v29 = vadd.f32 %v10857_v36, %v10764_v10 }
0x13f0   : > { %v8200_v9 = vpop.eup %8199  ;;  %5420 = vmatmul.mubr.bf16.gmra.mrb[68].mxu0 %v5105_v4  ;;  %v5108_v25 = vpack.c.bf16 %v5024_v21, %v5020_v63  ;;  %v4994_v17 = vadd.f32 1.0, %v8198_v26  ;;  %v4763_v3 = vmul.f32 0.5, %v10645_v53  ;;  %v4934_v57 = vmul.f32 0.7978846, %v4902_v13 }
0x13f1   : > { %v8202_v19 = vpop.eup %8201  ;;  %v4767_v61 = vmul.f32 0.5, %v10680_v20  ;;  %v4987_v6 = vadd.f32 1.0, %v8200_v9  ;;  %8209 = vtanh.f32 %v4936_v7  ;;  %v4938_v56 = vmul.f32 0.7978846, %v4906_v29 }
0x13f2   : > { %5362 = vmatprep.mubr.bf16.mxu1 %v5108_v25  ;;  %v5022_v40 = vmul.f32 %v4990_v35, %v4766_v30  ;;  %v5026_v1 = vmul.f32 %v4994_v17, %v4770_v16  ;;  %v4991_v38 = vadd.f32 1.0, %v8202_v19  ;;  %8211 = vtanh.f32 %v4934_v57 }
0x13f3   : > { %8213 = vtanh.f32 %v4938_v56  ;;  %v4899_v36 = vadd.f32 %v10782_v52, %v10704_v5  ;;  %v4903_v45 = vadd.f32 %v10814_v54, %v10742_v39  ;;  %v5019_v0 = vmul.f32 %v4987_v6, %v4763_v3 }
0x13f4   : > { %v5110_v53 = vpack.c.bf16 %v5026_v1, %v5022_v40  ;;  %v5023_v55 = vmul.f32 %v4991_v38, %v4767_v61  ;;  %v4901_v31 = vadd.f32 %v11356_v50, %v11355_v24  ;;  %v4905_v37 = vadd.f32 %v10846_v8, %v10750_v49  ;;  %v8232_v1 = vld [vmem:[%s9475_s12] sm:$0x3f]  ;;  %s11369_s12 = sld [smem:[#allocation31_spill]] }
0x13f5   : > { %v8204_v48 = vpop.eup %8203  ;;  %v4931_v20 = vmul.f32 0.7978846, %v4899_v36  ;;  %v4935_v22 = vmul.f32 0.7978846, %v4903_v45  ;;  %v4765_v52 = vmul.f32 0.5, %v10652_v34  ;;  %v4769_v41 = vmul.f32 0.5, %v10688_v32 }
0x13f6   : > { %v8206_v14 = vpop.eup %8205  ;;  %5427 = vmatprep.mubr.bf16.mxu0 %v5110_v53  ;;  %v5107_v42 = vpack.c.bf16 %v5023_v55, %v5019_v0  ;;  %v4989_v54 = vadd.f32 1.0, %v8204_v48  ;;  %v4933_v47 = vmul.f32 0.7978846, %v4901_v31  ;;  %v4937_v60 = vmul.f32 0.7978846, %v4905_v37  ;;  %v11359_v55 = vld [vmem:[#allocation47_spill] sm:$0xff] }
0x13f7   : > { %v4993_v28 = vadd.f32 1.0, %v8206_v14  ;;  %8215 = vtanh.f32 %v4931_v20  ;;  %v4772_v34 = vmul.f32 0.5, %v10728_v18  ;;  %v4776_v32 = vmul.f32 0.5, %v10761_v46  ;;  %v10932_v45 = vld [vmem:[%s1121_s3] ss:$0 sm:$0xff] }
0x13f8   : > { %5363 = vmatmul.mubr.bf16.gmra.mrb[84].mxu1 %v5107_v42  ;;  %8217 = vtanh.f32 %v4935_v22  ;;  %v5021_v44 = vmul.f32 %v4989_v54, %v4765_v52  ;;  %v4774_v23 = vmul.f32 0.5, %v10739_v51  ;;  %v4778_v12 = vmul.f32 0.5, %v10764_v10 }
0x13f9   : > { %v8208_v27 = vpop.eup %8207  ;;  %v5025_v15 = vmul.f32 %v4993_v28, %v4769_v41  ;;  %8219 = vtanh.f32 %v4933_v47  ;;  %v4771_v7 = vmul.f32 0.5, %v10704_v5  ;;  %v4775_v29 = vmul.f32 0.5, %v10742_v39  ;;  %v11357_v39 = vld [vmem:[#allocation44_spill] sm:$0xff]  ;;  %v11360_v41 = vld [vmem:[#allocation46_spill] sm:$0xff] }
0x13fa   : > { %v4996_v62 = vadd.f32 1.0, %v8208_v27  ;;  %8221 = vtanh.f32 %v4937_v60  ;;  %v4773_v10 = vmul.f32 0.5, %v11355_v24  ;;  %v4777_v57 = vmul.f32 0.5, %v10750_v49  ;;  %p6503_p10 = scmp.ne.s32.totalorder %s11369_s12, 1 }
0x13fb   : > { %v8210_v8 = vpop.eup %8209  ;;  %v5109_v43 = vpack.c.bf16 %v5025_v15, %v5021_v44  ;;  %v1799_v40 = vsub.s32 5, %v11357_v39  ;;  %v11361_v44 = vld [vmem:[#allocation48_spill] sm:$0xff]  ;;  %s11370_s6 = sld [smem:[#allocation86_spill]] (!%p6503_p10)  ;;  %s11372_s16 = sld [smem:[#allocation85_spill]] (!%p6503_p10) }
0x13fc   : > { %v8212_v11 = vpop.eup %8211  ;;  %v5000_v58 = vadd.f32 1.0, %v8210_v8  ;;  %v5028_v16 = vmul.f32 %v4996_v62, %v4772_v34  ;;  %s11375_s19 = sld [smem:[#allocation87_spill]] (!%p6503_p10) }
0x13fd   : > { %v8214_v2 = vpop.eup %8213  ;;  %5428 = vmatmul.mubr.bf16.gmra.mrb[72].mxu0 %v5109_v43  ;;  %v4998_v30 = vadd.f32 1.0, %v8212_v11  ;;  %v1800_v38 = vrot.slane %v8232_v1, %v1799_v40  ;;  %v11362_v11 = vld [vmem:[#allocation49_spill] sm:$0xff] }
0x13fe   : > { %v5032_v59 = vmul.f32 %v5000_v58, %v4776_v32  ;;  %v5002_v33 = vadd.f32 1.0, %v8214_v2 }
0x13ff   : > { %v5030_v63 = vmul.f32 %v4998_v30, %v4774_v23  ;;  %v1926_v48 = vadd.f32 %v11359_v55, %v1800_v38 }
0x1400   : > { %v5112_v4 = vpack.c.bf16 %v5032_v59, %v5028_v16  ;;  %v5034_v21 = vmul.f32 %v5002_v33, %v4778_v12 }
0x1401   : > { %v8216_v13 = vpop.eup %8215  ;;  %v10938_v54 = vrot.slane %v1926_v48, %v11360_v41  ;;  %v11366_v48 = vld [vmem:[#allocation53_spill] sm:$0xff]  ;;  %s11371_s22 = smov (!%p6503_p10), %s11370_s6 }
0x1402   : > { %v8218_v26 = vpop.eup %8217  ;;  %5370 = vmatprep.mubr.bf16.mxu1 %v5112_v4  ;;  %v5114_v18 = vpack.c.bf16 %v5034_v21, %v5030_v63  ;;  %v4995_v35 = vadd.f32 1.0, %v8216_v13 }
0x1403   : > { %v8220_v46 = vpop.eup %8219  ;;  %v4999_v51 = vadd.f32 1.0, %v8218_v26 }
0x1404   : > { %v8222_v9 = vpop.eup %8221  ;;  %5435 = vmatprep.mubr.bf16.mxu0 %v5114_v18  ;;  %v4997_v25 = vadd.f32 1.0, %v8220_v46  ;;  %v5027_v17 = vmul.f32 %v4995_v35, %v4771_v7  ;;  %v11363_v35 = vld [vmem:[#allocation50_spill] sm:$0xff] }
0x1405   : > { %v5031_v3 = vmul.f32 %v4999_v51, %v4775_v29  ;;  %v5001_v19 = vadd.f32 1.0, %v8222_v9  ;;  %v11364_v9 = vld [vmem:[#allocation51_spill] sm:$0xff] }
0x1406   : > { %v5029_v6 = vmul.f32 %v4997_v25, %v4773_v10 }
0x1407   : > { %v5111_v61 = vpack.c.bf16 %v5031_v3, %v5027_v17  ;;  %v5033_v56 = vmul.f32 %v5001_v19, %v4777_v57 }
0x1409   : > { %5371 = vmatmul.mubr.bf16.gmra.mrb[88].mxu1 %v5111_v61  ;;  %v5113_v5 = vpack.c.bf16 %v5033_v56, %v5029_v6 }
0x140b   : > { %5436 = vmatmul.mubr.bf16.gmra.mrb[76].mxu0 %v5113_v5 }
0x14b6   : > { %v6766_v36 = vpop.f32.mrb[76].mxu1 }
0x14b7   : > { %v6767_v53 = vpop.f32.mrb[77].mxu1 }
0x14b8   : > { %v6768_v49 = vadd.f32 %v6767_v53, %v6766_v36  ;;  %v6769_v0 = vpop.f32.mrb[78].mxu1 }
0x14b9   : > { %v6806_v20 = vpop.f32.mrb[64].mxu0  ;;  %v6770_v22 = vpop.f32.mrb[79].mxu1 }
0x14ba   : > { %v5349_v24 = vadd.f32 %v6768_v49, %v10932_v45  ;;  %v6807_v50 = vpop.f32.mrb[65].mxu0  ;;  %v6771_v31 = vadd.f32 %v6770_v22, %v6769_v0  ;;  %v11365_v49 = vld [vmem:[#allocation52_spill] sm:$0xff] }
0x14bb   : > { %v6808_v37 = vadd.f32 %v6807_v50, %v6806_v20  ;;  %v6809_v14 = vpop.f32.mrb[66].mxu0 }
0x14bc   : > { %v5352_v42 = vadd.f32 %v6771_v31, %v10932_v45  ;;  %v6810_v52 = vpop.f32.mrb[67].mxu0 }
0x14bd   : > { %v5414_v28 = vadd.f32 %v6808_v37, %v5349_v24  ;;  %v6811_v47 = vadd.f32 %v6810_v52, %v6809_v14 }
0x14bf   : > { %v5448_v60 = vmul.f32 %v10938_v54, %v5414_v28  ;;  %v5417_v27 = vadd.f32 %v6811_v47, %v5352_v42 }
0x14c1   : > { %v5456_v15 = vadd.f32 %v5448_v60, %v11361_v44  ;;  %v5449_v62 = vmul.f32 %v10938_v54, %v5417_v27  ;;  %v6772_v8 = vpop.f32.mrb[80].mxu1 }
0x14c2   : > { %v6773_v43 = vpop.f32.mrb[81].mxu1 }
0x14c3   : > { %5464 = vst [vmem:[#allocation2] sm:$0xff] %v5456_v15  ;;  %v5457_v34 = vadd.f32 %v5449_v62, %v11362_v11  ;;  %v6812_v32 = vpop.f32.mrb[68].mxu0  ;;  %v6774_v58 = vadd.f32 %v6773_v43, %v6772_v8  ;;  %v6775_v2 = vpop.f32.mrb[82].mxu1  ;;  %v11367_v43 = vld [vmem:[#allocation54_spill] sm:$0xff] }
0x14c4   : > { %v6813_v23 = vpop.f32.mrb[69].mxu0  ;;  %v6776_v30 = vpop.f32.mrb[83].mxu1 }
0x14c5   : > { %5465 = vst [vmem:[#allocation2 + $0x8] sm:$0xff] %v5457_v34  ;;  %v5357_v16 = vadd.f32 %v6774_v58, %v10932_v45  ;;  %v6814_v59 = vadd.f32 %v6813_v23, %v6812_v32  ;;  %v6815_v12 = vpop.f32.mrb[70].mxu0  ;;  %v6777_v33 = vadd.f32 %v6776_v30, %v6775_v2  ;;  %v11368_v32 = vld [vmem:[#allocation55_spill] sm:$0xff] }
0x14c6   : > { %v6816_v4 = vpop.f32.mrb[71].mxu0 }
0x14c7   : > { %v5422_v63 = vadd.f32 %v6814_v59, %v5357_v16  ;;  %v5360_v21 = vadd.f32 %v6777_v33, %v10932_v45  ;;  %v6817_v13 = vadd.f32 %v6816_v4, %v6815_v12  ;;  %v8233_v16 = vld [vmem:[#allocation20 + $0x4] ss:$8 sps:$4 sm:$0xff] (!%p6503_p10)   ;;  %v8235_v59 = vld [vmem:[#allocation20] ss:$8 sps:$4 sm:$0xff] (!%p6503_p10)   ;;  %v8236_v12 = vld [vmem:[#allocation20 + $0x14] ss:$8 sps:$4 sm:$0xff] (!%p6503_p10)  }
0x14c8   : > { %5593 = vmatprep.subr.bf16.mxu0 (!%p6503_p10), %v8233_v16  ;;  %v8262_v16 = vld [vmem:[%s11371_s22 + $0x28] sm:$0xff] (!%p6503_p10)  }
0x14c9   : > { %v5450_v26 = vmul.f32 %v10938_v54, %v5422_v63  ;;  %v5425_v18 = vadd.f32 %v6817_v13, %v5360_v21  ;;  %5594 = vmatpush1.bf16.msra.mxu0 (!%p6503_p10), %v8235_v59  ;;  %v8238_v63 = vld [vmem:[#allocation20 + $0x10] ss:$8 sps:$4 sm:$0xff] (!%p6503_p10)   ;;  %v8239_v21 = vld [vmem:[#allocation20 + $0x24] ss:$8 sps:$4 sm:$0xff] (!%p6503_p10)  }
0x14ca   : > { %v10963_v2 = vld [vmem:[#allocation2] sm:$0xff] (!%p6503_p10)  ;;  %5595 = vmatprep.subr.bf16.mxu0 (!%p6503_p10), %v8236_v12  ;;  %v8263_v59 = vld [vmem:[%s11371_s22 + $0x30] sm:$0xff] (!%p6503_p10)   ;;  %v8264_v12 = vld [vmem:[%s11371_s22 + $0x38] sm:$0xff] (!%p6503_p10)  }
0x14cb   : > { %v5458_v46 = vadd.f32 %v5450_v26, %v11363_v35  ;;  %v5451_v7 = vmul.f32 %v10938_v54, %v5425_v18  ;;  %v6778_v29 = vpop.f32.mrb[84].mxu1  ;;  %5642 = vadd.xlane.f32.xlu0 (!%p6503_p10), %v10963_v2  ;;  %v8241_v18 = vld [vmem:[#allocation20 + $0x20] ss:$8 sps:$4 sm:$0xff] (!%p6503_p10)   ;;  %v8242_v35 = vld [vmem:[#allocation20 + $0x34] ss:$8 sps:$4 sm:$0xff] (!%p6503_p10)  }
0x14cc   : > { %v6779_v51 = vpop.f32.mrb[85].mxu1 }
0x14cd   : > { %5466 = vst [vmem:[#allocation2 + $0x10] sm:$0xff] %v5458_v46  ;;  %v5459_v10 = vadd.f32 %v5451_v7, %v11364_v9  ;;  %v6780_v25 = vadd.f32 %v6779_v51, %v6778_v29  ;;  %v6781_v17 = vpop.f32.mrb[86].mxu1  ;;  %5596 = vmatpush1.bf16.msra.mxu0 (!%p6503_p10), %v8238_v63  ;;  %v8244_v46 = vld [vmem:[#allocation20 + $0x30] ss:$8 sps:$4 sm:$0xff] (!%p6503_p10)   ;;  %v5476_v7 = vld [vmem:[#allocation3] sm:$0x1] (!%p6503_p10) }
0x14ce   : > { %v6782_v3 = vpop.f32.mrb[87].mxu1  ;;  %5597 = vmatprep.subr.bf16.mxu0 (!%p6503_p10), %v8239_v21  ;;  %v8245_v29 = vld [vmem:[#allocation20 + $0x44] ss:$8 sps:$4 sm:$0xff] (!%p6503_p10)   ;;  %v6504_v51 = vmul.f32 (!%p6503_p10), -1.442695, %v5476_v7 }
0x14cf   : > { %5467 = vst [vmem:[#allocation2 + $0x18] sm:$0xff] %v5459_v10  ;;  %v6783_v57 = vadd.f32 %v6782_v3, %v6781_v17  ;;  %v5365_v61 = vadd.f32 %v6780_v25, %v10932_v45  ;;  %v8247_v9 = vld [vmem:[#allocation20 + $0x40] ss:$8 sps:$4 sm:$0xff] (!%p6503_p10)   ;;  %v8248_v10 = vld [vmem:[#allocation20 + $0x54] ss:$8 sps:$4 sm:$0xff] (!%p6503_p10)  }
0x14d0   : > { %v6818_v19 = vpop.f32.mrb[72].mxu0  ;;  %8265 = vpow2.f32 (!%p6503_p10), %v6504_v51  ;;  %v8250_v25 = vld [vmem:[#allocation20 + $0x50] ss:$8 sps:$4 sm:$0xff] (!%p6503_p10)   ;;  %v8251_v17 = vld [vmem:[#allocation20 + $0x64] ss:$8 sps:$4 sm:$0xff] (!%p6503_p10)  }
0x14d1   : > { %v6819_v6 = vpop.f32.mrb[73].mxu0  ;;  %v5368_v39 = vadd.f32 %v6783_v57, %v10932_v45  ;;  %5598 = vmatpush1.bf16.msra.mxu0 (!%p6503_p10), %v8241_v18  ;;  %v8253_v57 = vld [vmem:[#allocation20 + $0x60] ss:$8 sps:$4 sm:$0xff] (!%p6503_p10)  }
0x14d2   : > { %v6820_v56 = vadd.f32 %v6819_v6, %v6818_v19  ;;  %v6821_v5 = vpop.f32.mrb[74].mxu0  ;;  %5599 = vmatprep.subr.bf16.mxu0 (!%p6503_p10), %v8242_v35  ;;  %v8256_v6 = vld [vmem:[#allocation20 + $0x70] ss:$8 sps:$4 sm:$0xff] (!%p6503_p10)   ;;  %v11373_v35 = vld [vmem:[#allocation45_spill] sm:$0xff] (!%p6503_p10) }
0x14d3   : > { %v6822_v40 = vpop.f32.mrb[75].mxu0 }
0x14d4   : > { %v5430_v1 = vadd.f32 %v6820_v56, %v5365_v61  ;;  %v6823_v38 = vadd.f32 %v6822_v40, %v6821_v5  ;;  %v10965_v23 = vld [vmem:[#allocation2 + $0x10] sm:$0xff] (!%p6503_p10)  ;;  %v8257_v56 = vld [vmem:[%s11370_s6] sm:$0xff] (!%p6503_p10)  }
0x14d5   : > { %5646 = vadd.xlane.f32.xlu1 (!%p6503_p10), %v10965_v23  ;;  %5600 = vmatpush1.bf16.msra.mxu0 (!%p6503_p10), %v8244_v46  ;;  %v8254_v61 = vld [vmem:[#allocation20 + $0x74] ss:$8 sps:$4 sm:$0xff] (!%p6503_p10)  }
0x14d6   : > { %v5452_v36 = vmul.f32 %v10938_v54, %v5430_v1  ;;  %v5433_v53 = vadd.f32 %v6823_v38, %v5368_v39  ;;  %v10971_v30 = vld [vmem:[#allocation2 + $0x18] sm:$0xff] (!%p6503_p10)  ;;  %5601 = vmatprep.subr.bf16.mxu0 (!%p6503_p10), %v8245_v29  ;;  %7160 = vmatprep.subr.bf16.mxu1 (!%p6503_p10), %v8257_v56 }
0x14d7   : > { %7161 = vmatpush3.bf16.msra.mxu1 (!%p6503_p10), %v8257_v56 }
0x14d8   : > { %v5460_v0 = vadd.f32 %v5452_v36, %v11365_v49  ;;  %v5453_v55 = vmul.f32 %v10938_v54, %v5433_v53 }
0x14d9   : > { %5648 = vadd.xlane.f32.xlu1 (!%p6503_p10), %v10971_v30  ;;  %5602 = vmatpush1.bf16.msra.mxu0 (!%p6503_p10), %v8247_v9 }
0x14da   : > { %5468 = vst [vmem:[#allocation2 + $0x20] sm:$0xff] %v5460_v0  ;;  %v5461_v20 = vadd.f32 %v5453_v55, %v11366_v48  ;;  %5603 = vmatprep.subr.bf16.mxu0 (!%p6503_p10), %v8248_v10  ;;  %v8266_v3 = vpop.eup (!%p6503_p10), %8265 }
0x14db   : > { %v5480_v19 = vadd.f32 (!%p6503_p10), 1.0, %v8266_v3 }
0x14dc   : > { %5469 = vst [vmem:[#allocation2 + $0x28] sm:$0xff] %v5461_v20  ;;  %v6784_v22 = vpop.f32.mrb[88].mxu1 }
0x14dd   : > { %v6785_v24 = vpop.f32.mrb[89].mxu1  ;;  %5604 = vmatpush1.bf16.msra.mxu0 (!%p6503_p10), %v8250_v25  ;;  %8267 = vrcp.f32 (!%p6503_p10), %v5480_v19 }
0x14de   : > { %v6824_v50 = vpop.f32.mrb[76].mxu0  ;;  %v6786_v31 = vadd.f32 %v6785_v24, %v6784_v22  ;;  %v6787_v37 = vpop.f32.mrb[90].mxu1  ;;  %5605 = vmatprep.subr.bf16.mxu0 (!%p6503_p10), %v8251_v17 }
0x14df   : > { %v6825_v14 = vpop.f32.mrb[77].mxu0  ;;  %v6788_v42 = vpop.f32.mrb[91].mxu1 }
0x14e0   : > { %v5373_v52 = vadd.f32 %v6786_v31, %v10932_v45  ;;  %v6826_v41 = vadd.f32 %v6825_v14, %v6824_v50  ;;  %v6827_v28 = vpop.f32.mrb[78].mxu0  ;;  %v6789_v47 = vadd.f32 %v6788_v42, %v6787_v37 }
0x14e1   : > { %v6828_v60 = vpop.f32.mrb[79].mxu0  ;;  %v10975_v33 = vld [vmem:[#allocation2 + $0x20] sm:$0xff] (!%p6503_p10)  ;;  %5606 = vmatpush1.bf16.msra.mxu0 (!%p6503_p10), %v8253_v57 }
0x14e2   : > { %v5438_v27 = vadd.f32 %v6826_v41, %v5373_v52  ;;  %v5376_v44 = vadd.f32 %v6789_v47, %v10932_v45  ;;  %v6829_v15 = vadd.f32 %v6828_v60, %v6827_v28  ;;  %v10969_v45 = vld [vmem:[#allocation2 + $0x8] sm:$0xff] (!%p6503_p10)  ;;  %5607 = vmatprep.subr.bf16.mxu0 (!%p6503_p10), %v8254_v61  ;;  %v11374_v61 = vld [vmem:[#allocation46_spill] sm:$0xff] (!%p6503_p10) }
0x14e3   : > { %5644 = vadd.xlane.f32.xlu0 (!%p6503_p10), %v10969_v45  ;;  %v10977_v4 = vld [vmem:[#allocation2 + $0x28] sm:$0xff] (!%p6503_p10) }
0x14e4   : > { %v5454_v62 = vmul.f32 %v10938_v54, %v5438_v27  ;;  %v5441_v8 = vadd.f32 %v6829_v15, %v5376_v44  ;;  %5475 = sbr.rel (%p6503_p10) target bundleno = 5893 (0x1705), region = 172  ;;  %5652 = vadd.xlane.f32.xlu1 (!%p6503_p10), %v10977_v4 }
0x14e5   : > { %5608 = vmatpush1.bf16.msra.mxu0 (!%p6503_p10), %v8256_v6 }
0x14e6   : > { %v5462_v11 = vadd.f32 %v5454_v62, %v11367_v43  ;;  %v5455_v34 = vmul.f32 %v10938_v54, %v5441_v8  ;;  %v8805_v54 = vmov (!%p6503_p10), 0  }
0x14e7   : > { %5625 = vmatprep.mubr.bf16.mxu0 (!%p6503_p10), %v8805_v54  ;;  %5650 = vadd.xlane.f32.xlu0 (!%p6503_p10), %v10975_v33  ;;  %v8268_v5 = vpop.eup (!%p6503_p10), %8267  ;;  %v8261_v54 = vld [vmem:[%s11371_s22 + $0x20] sm:$0xff] (!%p6503_p10)  }
0x14e8   : > { %5470 = vst [vmem:[#allocation2 + $0x30] sm:$0xff] %v5462_v11  ;;  %v5463_v58 = vadd.f32 %v5455_v34, %v11368_v32  ;;  %v5483_v39 = vmul.f32 (!%p6503_p10), %v8268_v5, %v5476_v7 }
0x14ea   : > { %5471 = vst [vmem:[#allocation2 + $0x38] sm:$0xff] %v5463_v58  ;;  %v5500_v40 = vpack.c.bf16 (!%p6503_p10), %v5483_v39, %v5483_v39 }
0x14ec   : > { %5626 = vmatmul.mubr.bf16.vlgmr.msra.gmra.mrb[0].mxu0 %v5500_v40 }
0x14ef   : > { %v10981_v13 = vld [vmem:[#allocation2 + $0x30] sm:$0xff] }
0x14f0   : > { %5654 = vadd.xlane.f32.xlu0 %v10981_v13 }
0x14f1   : > { %v10983_v26 = vld [vmem:[#allocation2 + $0x38] sm:$0xff] }
0x14f2   : > { %5656 = vadd.xlane.f32.xlu1 %v10983_v26 }
0x1558   : > { %v5643_v1 = vpop.xlane.xlu0 %5642 }
0x1559   : > { %v5658_v36 = vmul.f32 0.0078125, %v5643_v1 }
0x155b   : > { %v10991_v49 = vsub.f32 %v10963_v2, %v5658_v36 }
0x155d   : > { %v5674_v22 = vmul.f32 %v10991_v49, %v10991_v49 }
0x155f   : > { %5682 = vadd.xlane.f32.xlu0 %v5674_v22 }
0x1562   : > { %v5647_v38 = vpop.xlane.xlu1 %5646 }
0x1563   : > { %v5660_v53 = vmul.f32 0.0078125, %v5647_v38 }
0x1565   : > { %v10994_v0 = vsub.f32 %v10965_v23, %v5660_v53  ;;  %v8258_v23 = vld [vmem:[%s11371_s22 + $0x8] sm:$0xff]  }
0x1566   : > { %v5649_v48 = vpop.xlane.xlu1 %5648  ;;  %7162 = vmatprep.subr.bf16.mxu1 %v8258_v23 }
0x1567   : > { %v5661_v24 = vmul.f32 0.0078125, %v5649_v48  ;;  %v5676_v37 = vmul.f32 %v10994_v0, %v10994_v0  ;;  %7163 = vmatpush3.bf16.msra.mxu1 %v8258_v23 }
0x1569   : > { %v11002_v31 = vsub.f32 %v10971_v30, %v5661_v24  ;;  %5686 = vadd.xlane.f32.xlu0 %v5676_v37  ;;  %v8260_v30 = vld [vmem:[%s11371_s22 + $0x18] sm:$0xff]  }
0x156b   : > { %v5677_v27 = vmul.f32 %v11002_v31, %v11002_v31 }
0x1570   : > { %v5645_v55 = vpop.xlane.xlu0 %5644 }
0x1571   : > { %v5659_v20 = vmul.f32 0.0078125, %v5645_v55  ;;  %v5653_v42 = vpop.xlane.xlu1 %5652 }
0x1572   : > { %v5663_v28 = vmul.f32 0.0078125, %v5653_v42 }
0x1573   : > { %v10999_v50 = vsub.f32 %v10969_v45, %v5659_v20  ;;  %v8259_v45 = vld [vmem:[%s11371_s22 + $0x10] sm:$0xff]  }
0x1574   : > { %v5651_v14 = vpop.xlane.xlu0 %5650  ;;  %v11012_v60 = vsub.f32 %v10977_v4, %v5663_v28  ;;  %7164 = vmatprep.subr.bf16.mxu1 %v8259_v45 }
0x1575   : > { %v5662_v52 = vmul.f32 0.0078125, %v5651_v14  ;;  %v5675_v41 = vmul.f32 %v10999_v50, %v10999_v50  ;;  %7165 = vmatpush3.bf16.msra.mxu1 %v8259_v45 }
0x1576   : > { %v5679_v32 = vmul.f32 %v11012_v60, %v11012_v60  ;;  %7166 = vmatprep.subr.bf16.mxu1 %v8260_v30 }
0x1577   : > { %v11009_v47 = vsub.f32 %v10975_v33, %v5662_v52  ;;  %5684 = vadd.xlane.f32.xlu1 %v5675_v41 }
0x1579   : > { %v5678_v8 = vmul.f32 %v11009_v47, %v11009_v47  ;;  %7167 = vmatpush3.bf16.msra.mxu1 %v8260_v30 }
0x157a   : > { %7168 = vmatprep.subr.bf16.mxu1 %v8261_v54 }
0x157b   : > { %5688 = vadd.xlane.f32.xlu1 %v5677_v27  ;;  %5690 = vadd.xlane.f32.xlu0 %v5678_v8 }
0x157d   : > { %v5655_v44 = vpop.xlane.xlu0 %5654  ;;  %7169 = vmatpush3.bf16.msra.mxu1 %v8261_v54 }
0x157e   : > { %v5664_v62 = vmul.f32 0.0078125, %v5655_v44  ;;  %7170 = vmatprep.subr.bf16.mxu1 %v8262_v16 }
0x157f   : > { %v5657_v15 = vpop.xlane.xlu1 %5656  ;;  %5692 = vadd.xlane.f32.xlu1 %v5679_v32 }
0x1580   : > { %v5665_v43 = vmul.f32 0.0078125, %v5657_v15  ;;  %v11019_v11 = vsub.f32 %v10981_v13, %v5664_v62  ;;  %v5501_v13 = vld [vmem:[%s11372_s16] sm:$0x3] }
0x1581   : > { %7171 = vmatpush3.bf16.msra.mxu1 %v8262_v16  ;;  %v5590_v46 = vrot.slane %v5501_v13, %v11373_v35  ;;  %v5586_v6 = vrot.slane %v5501_v13, %v11374_v61 }
0x1582   : > { %v11022_v34 = vsub.f32 %v10983_v26, %v5665_v43  ;;  %v5680_v58 = vmul.f32 %v11019_v11, %v11019_v11  ;;  %7172 = vmatprep.subr.bf16.mxu1 %v8263_v59 }
0x1584   : > { %5694 = vadd.xlane.f32.xlu0 %v5680_v58  ;;  %v5681_v2 = vmul.f32 %v11022_v34, %v11022_v34 }
0x1585   : > { %7173 = vmatpush3.bf16.msra.mxu1 %v8263_v59 }
0x1586   : > { %5696 = vadd.xlane.f32.xlu1 %v5681_v2  ;;  %7174 = vmatprep.subr.bf16.mxu1 %v8264_v12 }
0x1589   : > { %7175 = vmatpush3.bf16.msra.mxu1 %v8264_v12 }
0x15bf   : > { %v5627_v33 = vpop.f32.mrb[0].mxu0 }
0x15c0   : > { %v5629_v4 = vpop.f32.mrb[1].mxu0  ;;  %v5628_v38 = vadd.f32 %v5627_v33, %v5586_v6 }
0x15c1   : > { %v5631_v63 = vpop.f32.mrb[2].mxu0  ;;  %v5630_v25 = vadd.f32 %v5629_v4, %v5590_v46 }
0x15c2   : > { %v5632_v21 = vpop.f32.mrb[3].mxu0  ;;  %v5746_v14 = vrot.slane %v5628_v38, %v11374_v61 }
0x15c3   : > { %v5730_v39 = vadd.f32 1.0, %v5630_v25 }
0x15c5   : > { %v5734_v20 = vrot.slane %v5730_v39, %v11374_v61 }
0x15ec   : > { %v5683_v26 = vpop.xlane.xlu0 %5682 }
0x15ed   : > { %v5698_v18 = vmul.f32 0.0078125, %v5683_v26 }
0x15ef   : > { %v5706_v7 = vadd.f32 1e-06, %v5698_v18 }
0x15f1   : > { %8269 = vrsqrt.f32 %v5706_v7 }
0x15f6   : > { %v5687_v51 = vpop.xlane.xlu0 %5686 }
0x15f7   : > { %v5700_v10 = vmul.f32 0.0078125, %v5687_v51 }
0x15f9   : > { %v5708_v3 = vadd.f32 1e-06, %v5700_v10 }
0x15fb   : > { %v8270_v22 = vpop.eup %8269 }
0x15fc   : > { %v5722_v52 = vmul.f32 %v8270_v22, %v10991_v49 }
0x15fe   : > { %v5735_v28 = vmul.f32 %v5734_v20, %v5722_v52 }
0x1600   : > { %v5747_v8 = vadd.f32 %v5746_v14, %v5735_v28 }
0x1604   : > { %v5685_v29 = vpop.xlane.xlu1 %5684 }
0x1605   : > { %v5699_v9 = vmul.f32 0.0078125, %v5685_v29 }
0x1607   : > { %v5707_v17 = vadd.f32 1e-06, %v5699_v9 }
0x1608   : > { %v5689_v57 = vpop.xlane.xlu1 %5688  ;;  %v5691_v19 = vpop.xlane.xlu0 %5690 }
0x1609   : > { %8271 = vrsqrt.f32 %v5707_v17  ;;  %v5701_v56 = vmul.f32 0.0078125, %v5689_v57  ;;  %v5702_v5 = vmul.f32 0.0078125, %v5691_v19 }
0x160a   : > { %8273 = vrsqrt.f32 %v5708_v3 }
0x160b   : > { %v5709_v40 = vadd.f32 1e-06, %v5701_v56  ;;  %v5710_v1 = vadd.f32 1e-06, %v5702_v5 }
0x160c   : > { %v5693_v36 = vpop.xlane.xlu1 %5692 }
0x160d   : > { %8275 = vrsqrt.f32 %v5709_v40  ;;  %v5703_v55 = vmul.f32 0.0078125, %v5693_v36 }
0x160e   : > { %8277 = vrsqrt.f32 %v5710_v1 }
0x160f   : > { %v5711_v24 = vadd.f32 1e-06, %v5703_v55 }
0x1611   : > { %v5695_v53 = vpop.xlane.xlu0 %5694  ;;  %8279 = vrsqrt.f32 %v5711_v24 }
0x1612   : > { %v5704_v48 = vmul.f32 0.0078125, %v5695_v53 }
0x1613   : > { %v5697_v42 = vpop.xlane.xlu1 %5696  ;;  %v8272_v27 = vpop.eup %8271 }
0x1614   : > { %v5712_v37 = vadd.f32 1e-06, %v5704_v48  ;;  %v5705_v41 = vmul.f32 0.0078125, %v5697_v42  ;;  %v8274_v15 = vpop.eup %8273  ;;  %v5723_v62 = vmul.f32 %v8272_v27, %v10999_v50 }
0x1615   : > { %v5724_v43 = vmul.f32 %v8274_v15, %v10994_v0 }
0x1616   : > { %8281 = vrsqrt.f32 %v5712_v37  ;;  %v5713_v44 = vadd.f32 1e-06, %v5705_v41  ;;  %v5736_v32 = vmul.f32 %v5734_v20, %v5723_v62 }
0x1617   : > { %v8276_v58 = vpop.eup %8275  ;;  %v5737_v2 = vmul.f32 %v5734_v20, %v5724_v43 }
0x1618   : > { %8283 = vrsqrt.f32 %v5713_v44  ;;  %v8278_v23 = vpop.eup %8277  ;;  %v5748_v45 = vadd.f32 %v5746_v14, %v5736_v32  ;;  %v5725_v49 = vmul.f32 %v8276_v58, %v11002_v31 }
0x1619   : > { %v5749_v30 = vadd.f32 %v5746_v14, %v5737_v2  ;;  %v5726_v54 = vmul.f32 %v8278_v23, %v11009_v47 }
0x161a   : > { %v5771_v16 = vpack.c.bf16 %v5748_v45, %v5747_v8  ;;  %v5738_v59 = vmul.f32 %v5734_v20, %v5725_v49 }
0x161b   : > { %v8280_v12 = vpop.eup %8279  ;;  %v5739_v33 = vmul.f32 %v5734_v20, %v5726_v54 }
0x161c   : > { %7176 = vmatprep.mubr.bf16.mxu1 %v5771_v16  ;;  %v5750_v50 = vadd.f32 %v5746_v14, %v5738_v59  ;;  %v5727_v63 = vmul.f32 %v8280_v12, %v11012_v60 }
0x161d   : > { %v5751_v0 = vadd.f32 %v5746_v14, %v5739_v33 }
0x161e   : > { %v5772_v13 = vpack.c.bf16 %v5750_v50, %v5749_v30  ;;  %v5740_v26 = vmul.f32 %v5734_v20, %v5727_v63 }
0x1620   : > { %v8282_v4 = vpop.eup %8281  ;;  %7177 = vmatmul.mubr.bf16.vlgmr.msra.gmra.mrb[0].mxu1 %v5772_v13  ;;  %v5752_v31 = vadd.f32 %v5746_v14, %v5740_v26 }
0x1621   : > { %v5728_v21 = vmul.f32 %v8282_v4, %v11019_v11  ;;  %v6521_v11 = vld [vmem:[%s11375_s19] ss:$0 sm:$0xff] }
0x1622   : > { %v8284_v18 = vpop.eup %8283  ;;  %v5773_v7 = vpack.c.bf16 %v5752_v31, %v5751_v0 }
0x1623   : > { %v5741_v35 = vmul.f32 %v5734_v20, %v5728_v21  ;;  %v5729_v47 = vmul.f32 %v8284_v18, %v11022_v34 }
0x1624   : > { %7180 = vmatprep.mubr.bf16.mxu1 %v5773_v7 }
0x1625   : > { %v5753_v46 = vadd.f32 %v5746_v14, %v5741_v35  ;;  %v5742_v29 = vmul.f32 %v5734_v20, %v5729_v47 }
0x1627   : > { %v5754_v60 = vadd.f32 %v5746_v14, %v5742_v29 }
0x1629   : > { %v5774_v51 = vpack.c.bf16 %v5754_v60, %v5753_v46 }
0x162b   : > { %7181 = vmatmul.mubr.bf16.gmra.mrb[4].mxu1 %v5774_v51 }
0x16f3   : > { %v7178_v9 = vpop.f32.mrb[0].mxu1 }
0x16f4   : > { %v5873_v10 = vadd.f32 %v7178_v9, %v6521_v11  ;;  %v5864_v25 = vpop.f32.mrb[1].mxu1 }
0x16f5   : > { %v5865_v17 = vadd.f32 %v6521_v11, %v5864_v25  ;;  %v7179_v34 = vpop.f32.mrb[2].mxu1 }
0x16f6   : > { %5897 = vst.msk [vmem:[%s9523_s1 + $0x10] sm:$0xff] %vm2379_vm2, %v5873_v10  ;;  %v5876_v3 = vadd.f32 %v7179_v34, %v6521_v11  ;;  %v5867_v57 = vpop.f32.mrb[3].mxu1 }
0x16f7   : > { %5895 = vst.msk [vmem:[%s9523_s1] sm:$0xff] %vm2379_vm2, %v5865_v17  ;;  %v5868_v19 = vadd.f32 %v6521_v11, %v5867_v57 }
0x16f8   : > { %5898 = vst.msk [vmem:[%s9523_s1 + $0x18] sm:$0xff] %vm2379_vm2, %v5876_v3 }
0x16f9   : > { %5896 = vst.msk [vmem:[%s9523_s1 + $0x8] sm:$0xff] %vm2379_vm2, %v5868_v19 }
0x16fe   : > { %v7182_v61 = vpop.f32.mrb[4].mxu1 }
0x16ff   : > { %v5889_v6 = vadd.f32 %v7182_v61, %v6521_v11  ;;  %v5880_v56 = vpop.f32.mrb[5].mxu1 }
0x1700   : > { %v5881_v5 = vadd.f32 %v6521_v11, %v5880_v56  ;;  %v7183_v39 = vpop.f32.mrb[6].mxu1 }
0x1701   : > { %5901 = vst.msk [vmem:[%s9523_s1 + $0x30] sm:$0xff] %vm2379_vm2, %v5889_v6  ;;  %v5892_v40 = vadd.f32 %v7183_v39, %v6521_v11  ;;  %v5883_v1 = vpop.f32.mrb[7].mxu1 }
0x1702   : > { %5899 = vst.msk [vmem:[%s9523_s1 + $0x20] sm:$0xff] %vm2379_vm2, %v5881_v5  ;;  %v5884_v38 = vadd.f32 %v6521_v11, %v5883_v1 }
0x1703   : > { %5902 = vst.msk [vmem:[%s9523_s1 + $0x38] sm:$0xff] %vm2379_vm2, %v5892_v40 }
0x1704   : > { %5900 = vst.msk [vmem:[%s9523_s1 + $0x28] sm:$0xff] %vm2379_vm2, %v5884_v38 }
0x1705 PF: > { %s11376_s8 = sld [smem:[#allocation35_spill]]  ;;  %s11377_s4 = sld [smem:[#allocation27_spill]] }
0x1706   : > { %s11378_s30 = sld [smem:[#allocation28_spill]]  ;;  %s11380_s25 = sld [smem:[#allocation29_spill]] }
0x1707   : > { %s11379_s24 = sld [smem:[#allocation40_spill]]  ;;  %s11381_s5 = sld [smem:[#allocation30_spill]] }
0x1708   : > { %s11382_s1 = sld [smem:[#allocation41_spill]]  ;;  %s11383_s26 = sld [smem:[#allocation33_spill]] }
0x1709   : > { %s11384_s2 = sld [smem:[#allocation34_spill]]  ;;  %s11385_s6 = sld [smem:[#allocation36_spill]] }
0x170a   : > { %s11386_s27 = sld [smem:[#allocation38_spill]] }
0x170b   : > { %s39_s7 = sadd.s32 1, %s11376_s8  }
0x170c   : > { %p36_p4 = scmp.ge.s32.totalorder %s39_s7, 6  }
0x170e   :  { %38 = sbr.rel (!%p36_p4) target bundleno = 35 (0x23), region = 265 }
0x1715   :  { %5924 = vsyncpa [#allocation5], 1 }
0x1716   :  { %5926 = vsyncpa [#allocation5 + $0x1], 1 }
0x1717   :  { %5927 = vsyncpa [#allocation7], 1 }
0x1718   :  { %5928 = vsyncpa [#allocation10], 1 }
0x1719   :  { %5929 = vsyncpa [#allocation13], 1 }

</bundles_post_ra>
